<compile_context>
chip_gen: v7x
topology: tpu7x:2x2x1
jax: 0.10.0
libtpu: 0.0.40
codegen_flags: <defaults>
</compile_context>

<pallas_src>
import functools

import jax
import jax.numpy as jnp
from jax.experimental import pallas as pl
from jax.experimental.pallas import tpu as pltpu


NUM_NODES = 324
_ADJ_HUB_COLS = [7, 9, 24, 45, 59, 62, 63, 66, 67, 69, 70, 73, 74, 76, 77, 80, 81,
                 84, 95, 97, 99, 114, 116, 118, 143, 147, 150, 152, 156, 158, 159,
                 163, 167, 171]


def _cdiv(a, b):
    return -(-a // b)


def create_adj_template(n=NUM_NODES):
    """324x324 fixed adjacency: identity + hub rows 300..323 connected to indices."""
    adj = jnp.eye(n, dtype=jnp.float32)
    cols = jnp.asarray(_ADJ_HUB_COLS, dtype=jnp.int32)
    rows = jnp.arange(300, n, dtype=jnp.int32)
    adj = adj.at[rows[:, None], cols[None, :]].set(1.0)
    adj = adj.at[cols[:, None], rows[None, :]].set(1.0)
    return adj


def gcn_normalize(adj):
    """PyG gcn_norm with add_self_loops=False:  S = D^-1/2 A^T D^-1/2."""
    deg = jnp.sum(adj, axis=0)                               # target (column) degree
    dinv = jnp.where(deg > 0.0, jax.lax.rsqrt(deg), 0.0)
    return dinv[:, None] * adj.T * dinv[None, :]


def _select_bt(B, Fin, Fout):
    """Samples per grid step: lane-density driven, never below 128 out lanes."""
    bt_floor = _cdiv(128, max(Fout, 1))                 # out slab >= 128 lanes
    bt_pref = max(bt_floor, _cdiv(256, max(Fin, 1)))    # layer-0 agg slab >= 256 lanes
    bt = max(bt_floor, min(bt_pref, B))                 # don't over-pad tiny batches
    return min(bt, 64)                                  # bound block-diag weight size


def _block_diag(w, bt, dtype):
    """kron(I_bt, w): per-sample transform expressed in slab (lane-packed) layout."""
    return jnp.kron(jnp.eye(bt, dtype=w.dtype), w).astype(dtype)


def batch_gcn_kernel(x_ref, s_ref, w0_ref, b0_ref, bns_ref, bnb_ref, w1_ref, b1_ref,
                     o_ref, *, agg_first_l0, agg_first_l1):
    # x_ref : (1, N, bt*Fin)  lane-dense input slab for this grid step
    # s_ref : (N, N)          normalized adjacency (constant across the grid)
    # w0_ref: (bt*Fin, bt*H)  block-diagonal layer-0 weight
    # w1_ref: (bt*H, bt*Fout) block-diagonal layer-1 weight
    # b0/bns/bnb: (1, bt*H)   tiled bias / folded BatchNorm scale & shift (f32)
    # b1_ref: (1, bt*Fout)    tiled layer-1 bias (f32)
    # o_ref : (1, N, bt*Fout) lane-dense output slab
    s = s_ref[...]
    x = x_ref[0]
    op = s.dtype                          # f32 or bf16 MXU operand dtype

    # ---- GCN layer 0: S @ (x @ W0) + b0, N^2 matmul at the narrower slab width ----
    if agg_first_l0:
        agg = jnp.dot(s, x, preferred_element_type=jnp.float32)
        h = jnp.dot(agg.astype(op), w0_ref[...], preferred_element_type=jnp.float32)
    else:
        xw = jnp.dot(x, w0_ref[...], preferred_element_type=jnp.float32)
        h = jnp.dot(s, xw.astype(op), preferred_element_type=jnp.float32)
    h = h + b0_ref[...]

    # ---- inter-layer: LeakyReLU(0.01) -> dropout (identity, eval) -> BN (eval) ----
    h = jnp.where(h > 0.0, h, 0.01 * h)
    h = h * bns_ref[...] + bnb_ref[...]          # folded BatchNorm1d (running stats)
    # TODO(synk): training-mode dropout and BatchNorm batch-statistics update not implemented.
    h = h.astype(op)

    # ---- GCN layer 1: S @ (h @ W1) + b1, N^2 matmul at the narrower slab width ----
    if agg_first_l1:
        agg = jnp.dot(s, h, preferred_element_type=jnp.float32)
        out = jnp.dot(agg.astype(op), w1_ref[...], preferred_element_type=jnp.float32)
    else:
        hw = jnp.dot(h, w1_ref[...], preferred_element_type=jnp.float32)
        out = jnp.dot(s, hw.astype(op), preferred_element_type=jnp.float32)

    # single lane-dense slab store
    o_ref[0] = (out + b1_ref[...]).astype(o_ref.dtype)


def batch_gcn_forward(x, adj, w0, b0, w1, b1,
                      bn_gamma, bn_beta, bn_mean, bn_var, bn_eps=1e-5,
                      mxu_dtype=jnp.float32):
    B, N, Fin = x.shape
    H = w0.shape[1]
    Fout = w1.shape[1]

    # Fixed normalized adjacency: built once outside the kernel (batch-independent).
    s = gcn_normalize(adj.astype(jnp.float32)).astype(mxu_dtype)

    # Fold eval-mode BatchNorm1d into a per-feature scale/shift.
    bn_scale = bn_gamma / jnp.sqrt(bn_var + bn_eps)
    bn_shift = bn_beta - bn_mean * bn_scale

    # Batch elements per grid step; pad B up to a multiple of bt (never fall to bt=1).
    bt = _select_bt(B, Fin, Fout)
    G = _cdiv(B, bt)
    Bp = G * bt
    if Bp != B:
        x = jnp.pad(x, ((0, Bp - B), (0, 0), (0, 0)))

    # Pre-pack x into a lane-dense slab: (G, N, bt*Fin), columns sample-major.
    x_slab = (x.reshape(G, bt, N, Fin)
                .transpose(0, 2, 1, 3)
                .reshape(G, N, bt * Fin)
                .astype(mxu_dtype))

    # Block-diagonal weights keep the per-sample transforms in slab layout.
    w0_blk = _block_diag(w0, bt, mxu_dtype)             # (bt*Fin, bt*H)
    w1_blk = _block_diag(w1, bt, mxu_dtype)             # (bt*H,  bt*Fout)

    # Tiled (per-sample-replicated) bias / BN vectors, kept in f32.
    b0_t = jnp.tile(b0, (bt,)).reshape(1, bt * H).astype(jnp.float32)
    bns_t = jnp.tile(bn_scale, (bt,)).reshape(1, bt * H).astype(jnp.float32)
    bnb_t = jnp.tile(bn_shift, (bt,)).reshape(1, bt * H).astype(jnp.float32)
    b1_t = jnp.tile(b1, (bt,)).reshape(1, bt * Fout).astype(jnp.float32)

    # Run the N^2 aggregation at the narrower slab lane width per layer.
    agg_first_l0 = Fin <= H
    agg_first_l1 = H <= Fout

    kernel = functools.partial(batch_gcn_kernel,
                               agg_first_l0=agg_first_l0,
                               agg_first_l1=agg_first_l1)

    out_slab = pl.pallas_call(
        kernel,
        out_shape=jax.ShapeDtypeStruct((G, N, bt * Fout), jnp.float32),
        grid=(G,),
        in_specs=[
            pl.BlockSpec((1, N, bt * Fin), lambda g: (g, 0, 0)),   # x slab (lane-dense)
            pl.BlockSpec((N, N), lambda g: (0, 0)),                # S (constant)
            pl.BlockSpec((bt * Fin, bt * H), lambda g: (0, 0)),    # W0 block-diag
            pl.BlockSpec((1, bt * H), lambda g: (0, 0)),           # b0 tiled
            pl.BlockSpec((1, bt * H), lambda g: (0, 0)),           # BN scale tiled
            pl.BlockSpec((1, bt * H), lambda g: (0, 0)),           # BN shift tiled
            pl.BlockSpec((bt * H, bt * Fout), lambda g: (0, 0)),   # W1 block-diag
            pl.BlockSpec((1, bt * Fout), lambda g: (0, 0)),        # b1 tiled
        ],
        out_specs=pl.BlockSpec((1, N, bt * Fout), lambda g: (g, 0, 0)),
        compiler_params=pltpu.CompilerParams(
            dimension_semantics=("parallel",),
            vmem_limit_bytes=48 * 1024 * 1024,
        ),
    )(x_slab, s, w0_blk, b0_t, bns_t, bnb_t, w1_blk, b1_t)

    # Un-slab: (G, N, bt*Fout) -> (B, N, Fout); drop batch padding.
    out = (out_slab.reshape(G, N, bt, Fout)
                   .transpose(0, 2, 1, 3)
                   .reshape(G * bt, N, Fout))[:B]
    return out


def reference_batch_gcn(x, adj, w0, b0, w1, b1, bn_gamma, bn_beta, bn_mean, bn_var,
                        bn_eps=1e-5):
    """Pure-JAX reference mirroring the PyTorch BatchGCN inference forward."""
    adj = adj.astype(jnp.float32)
    deg = jnp.sum(adj, axis=0)
    dinv = jnp.where(deg > 0.0, 1.0 / jnp.sqrt(deg), 0.0)
    s = dinv[:, None] * adj.T * dinv[None, :]

    def one(xb):
        h = s @ (xb @ w0) + b0[None, :]
        h = jnp.where(h > 0.0, h, 0.01 * h)
        h = (h - bn_mean) / jnp.sqrt(bn_var + bn_eps) * bn_gamma + bn_beta
        return s @ (h @ w1) + b1[None, :]

    return jax.vmap(one)(x)


if __name__ == "__main__":
    key = jax.random.PRNGKey(0)
    k_x, k_w0, k_w1 = jax.random.split(key, 3)

    B = 2
    N = NUM_NODES                              # 324, fixed by the module's adjacency
    input_dim, hidden_dim, output_dim = 8, 32, 16

    x = jax.random.normal(k_x, (B, N, input_dim), dtype=jnp.float32)
    adj = create_adj_template(N)

    def xavier(k, fan_in, fan_out):
        lim = (6.0 / (fan_in + fan_out)) ** 0.5
        return jax.random.uniform(k, (fan_in, fan_out), minval=-lim, maxval=lim,
                                  dtype=jnp.float32)

    # GCNConv parameters (xavier weights, zero bias) and BatchNorm1d defaults (eval).
    w0 = xavier(k_w0, input_dim, hidden_dim)
    b0 = jnp.zeros((hidden_dim,), jnp.float32)
    w1 = xavier(k_w1, hidden_dim, output_dim)
    b1 = jnp.zeros((output_dim,), jnp.float32)
    bn_gamma = jnp.ones((hidden_dim,), jnp.float32)
    bn_beta = jnp.zeros((hidden_dim,), jnp.float32)
    bn_mean = jnp.zeros((hidden_dim,), jnp.float32)
    bn_var = jnp.ones((hidden_dim,), jnp.float32)

    ref = reference_batch_gcn(x, adj, w0, b0, w1, b1,
                              bn_gamma, bn_beta, bn_mean, bn_var)

    # f32 path (exactness check).
    out = batch_gcn_forward(x, adj, w0, b0, w1, b1,
                            bn_gamma, bn_beta, bn_mean, bn_var)
    out = jax.block_until_ready(out)
    assert out.shape == (B, N, output_dim)
    assert jnp.allclose(out, ref, atol=1e-3, rtol=1e-3)

    # bf16 MXU-operand path (valid on v5e/v6e/v7x) — looser tolerance (S cast to bf16).
    out_bf16 = batch_gcn_forward(x, adj, w0, b0, w1, b1,
                                 bn_gamma, bn_beta, bn_mean, bn_var,
                                 mxu_dtype=jnp.bfloat16)
    out_bf16 = jax.block_until_ready(out_bf16)
    assert jnp.allclose(out_bf16, ref, atol=0.25, rtol=0.05)

    print("KERNEL_OK")
</pallas_src>

<mosaic_0001>
module attributes {stable_mosaic.version = 11 : i64} {
  func.func @batch_gcn_kernel(%arg0: i32, %arg1: memref<1x324x64xf32, #tpu.memory_space<vmem>>, %arg2: memref<324x324xf32, #tpu.memory_space<vmem>>, %arg3: memref<64x256xf32, #tpu.memory_space<vmem>>, %arg4: memref<1x256xf32, #tpu.memory_space<vmem>>, %arg5: memref<1x256xf32, #tpu.memory_space<vmem>>, %arg6: memref<1x256xf32, #tpu.memory_space<vmem>>, %arg7: memref<256x128xf32, #tpu.memory_space<vmem>>, %arg8: memref<1x128xf32, #tpu.memory_space<vmem>>, %arg9: memref<1x324x128xf32, #tpu.memory_space<vmem>>) attributes {dimension_semantics = [#tpu.dimension_semantics<parallel>], iteration_bounds = array<i64: 1>, scalar_prefetch = 0 : i64, scratch_operands = 0 : i64, tpu.core_type = #tpu.core_type<tc>, window_params = [{transform_indices = @transform_0, window_bounds = array<i64: 1, 324, 64>}, {pipeline_mode = #tpu.pipeline_mode<synchronous>, transform_indices = @transform_1, window_bounds = array<i64: 324, 324>}, {pipeline_mode = #tpu.pipeline_mode<synchronous>, transform_indices = @transform_2, window_bounds = array<i64: 64, 256>}, {pipeline_mode = #tpu.pipeline_mode<synchronous>, transform_indices = @transform_3, window_bounds = array<i64: 1, 256>}, {pipeline_mode = #tpu.pipeline_mode<synchronous>, transform_indices = @transform_4, window_bounds = array<i64: 1, 256>}, {pipeline_mode = #tpu.pipeline_mode<synchronous>, transform_indices = @transform_5, window_bounds = array<i64: 1, 256>}, {pipeline_mode = #tpu.pipeline_mode<synchronous>, transform_indices = @transform_6, window_bounds = array<i64: 256, 128>}, {pipeline_mode = #tpu.pipeline_mode<synchronous>, transform_indices = @transform_7, window_bounds = array<i64: 1, 128>}, {transform_indices = @transform_8, window_bounds = array<i64: 1, 324, 128>}]} {
    %c0 = arith.constant 0 : index
    %c0_0 = arith.constant 0 : index
    %0 = vector.load %arg2[%c0, %c0_0] : memref<324x324xf32, #tpu.memory_space<vmem>>, vector<324x324xf32>
    %c0_1 = arith.constant 0 : index
    %c0_2 = arith.constant 0 : index
    %c0_3 = arith.constant 0 : index
    %1 = vector.load %arg1[%c0_1, %c0_2, %c0_3] : memref<1x324x64xf32, #tpu.memory_space<vmem>>, vector<1x324x64xf32>
    %2 = vector.shape_cast %1 : vector<1x324x64xf32> to vector<324x64xf32>
    %cst = arith.constant dense<0.000000e+00> : vector<324x64xf32>
    %3 = tpu.matmul %0, %2, %cst {dimension_numbers = #tpu.dot_dimension_numbers<[1], [0], [0], [1], [0, 0, 1, 1], [], []>} : vector<324x324xf32>, vector<324x64xf32>, vector<324x64xf32> -> vector<324x64xf32>
    %c0_4 = arith.constant 0 : index
    %c0_5 = arith.constant 0 : index
    %4 = vector.load %arg3[%c0_4, %c0_5] : memref<64x256xf32, #tpu.memory_space<vmem>>, vector<64x256xf32>
    %cst_6 = arith.constant dense<0.000000e+00> : vector<324x256xf32>
    %5 = tpu.matmul %3, %4, %cst_6 {dimension_numbers = #tpu.dot_dimension_numbers<[1], [0], [0], [1], [0, 0, 1, 1], [], []>} : vector<324x64xf32>, vector<64x256xf32>, vector<324x256xf32> -> vector<324x256xf32>
    %c0_7 = arith.constant 0 : index
    %c0_8 = arith.constant 0 : index
    %6 = vector.load %arg4[%c0_7, %c0_8] : memref<1x256xf32, #tpu.memory_space<vmem>>, vector<1x256xf32>
    %7 = vector.broadcast %6 : vector<1x256xf32> to vector<324x256xf32>
    %8 = arith.addf %5, %7 : vector<324x256xf32>
    %cst_9 = arith.constant 0.000000e+00 : f32
    %9 = vector.broadcast %cst_9 : f32 to vector<324x256xf32>
    %10 = arith.cmpf ogt, %8, %9 : vector<324x256xf32>
    %cst_10 = arith.constant 0.00999999977 : f32
    %11 = vector.broadcast %cst_10 : f32 to vector<324x256xf32>
    %12 = arith.mulf %11, %8 : vector<324x256xf32>
    %13 = arith.select %10, %8, %12 : vector<324x256xi1>, vector<324x256xf32>
    %c0_11 = arith.constant 0 : index
    %c0_12 = arith.constant 0 : index
    %14 = vector.load %arg5[%c0_11, %c0_12] : memref<1x256xf32, #tpu.memory_space<vmem>>, vector<1x256xf32>
    %15 = vector.broadcast %14 : vector<1x256xf32> to vector<324x256xf32>
    %16 = arith.mulf %13, %15 : vector<324x256xf32>
    %c0_13 = arith.constant 0 : index
    %c0_14 = arith.constant 0 : index
    %17 = vector.load %arg6[%c0_13, %c0_14] : memref<1x256xf32, #tpu.memory_space<vmem>>, vector<1x256xf32>
    %18 = vector.broadcast %17 : vector<1x256xf32> to vector<324x256xf32>
    %19 = arith.addf %16, %18 : vector<324x256xf32>
    %c0_15 = arith.constant 0 : index
    %c0_16 = arith.constant 0 : index
    %20 = vector.load %arg7[%c0_15, %c0_16] : memref<256x128xf32, #tpu.memory_space<vmem>>, vector<256x128xf32>
    %cst_17 = arith.constant dense<0.000000e+00> : vector<324x128xf32>
    %21 = tpu.matmul %19, %20, %cst_17 {dimension_numbers = #tpu.dot_dimension_numbers<[1], [0], [0], [1], [0, 0, 1, 1], [], []>} : vector<324x256xf32>, vector<256x128xf32>, vector<324x128xf32> -> vector<324x128xf32>
    %cst_18 = arith.constant dense<0.000000e+00> : vector<324x128xf32>
    %22 = tpu.matmul %0, %21, %cst_18 {dimension_numbers = #tpu.dot_dimension_numbers<[1], [0], [0], [1], [0, 0, 1, 1], [], []>} : vector<324x324xf32>, vector<324x128xf32>, vector<324x128xf32> -> vector<324x128xf32>
    %c0_19 = arith.constant 0 : index
    %c0_20 = arith.constant 0 : index
    %23 = vector.load %arg8[%c0_19, %c0_20] : memref<1x128xf32, #tpu.memory_space<vmem>>, vector<1x128xf32>
    %24 = vector.broadcast %23 : vector<1x128xf32> to vector<324x128xf32>
    %25 = arith.addf %22, %24 : vector<324x128xf32>
    %c0_21 = arith.constant 0 : index
    %c0_22 = arith.constant 0 : index
    %c0_23 = arith.constant 0 : index
    %26 = vector.load %arg9[%c0_21, %c0_22, %c0_23] : memref<1x324x128xf32, #tpu.memory_space<vmem>>, vector<1x324x128xf32>
    %27 = vector.shape_cast %26 : vector<1x324x128xf32> to vector<324x128xf32>
    %28 = vector.shape_cast %25 : vector<324x128xf32> to vector<1x324x128xf32>
    tpu.vector_store %arg9[%c0_21, %c0_22, %c0_23], %28 {strides = array<i32>} : memref<1x324x128xf32, #tpu.memory_space<vmem>>, vector<1x324x128xf32>,
    return
  }
  func.func @transform_0(%arg0: i32) -> (i32, i32, i32) {
    %c0_i32 = arith.constant 0 : i32
    %c0_i32_0 = arith.constant 0 : i32
    %c0_i32_1 = arith.constant 0 : i32
    return %arg0, %c0_i32, %c0_i32_0 : i32, i32, i32
  }
  func.func @transform_1(%arg0: i32) -> (i32, i32) {
    %c0_i32 = arith.constant 0 : i32
    %c0_i32_0 = arith.constant 0 : i32
    %c0_i32_1 = arith.constant 0 : i32
    return %c0_i32, %c0_i32_0 : i32, i32
  }
  func.func @transform_2(%arg0: i32) -> (i32, i32) {
    %c0_i32 = arith.constant 0 : i32
    %c0_i32_0 = arith.constant 0 : i32
    %c0_i32_1 = arith.constant 0 : i32
    return %c0_i32, %c0_i32_0 : i32, i32
  }
  func.func @transform_3(%arg0: i32) -> (i32, i32) {
    %c0_i32 = arith.constant 0 : i32
    %c0_i32_0 = arith.constant 0 : i32
    %c0_i32_1 = arith.constant 0 : i32
    return %c0_i32, %c0_i32_0 : i32, i32
  }
  func.func @transform_4(%arg0: i32) -> (i32, i32) {
    %c0_i32 = arith.constant 0 : i32
    %c0_i32_0 = arith.constant 0 : i32
    %c0_i32_1 = arith.constant 0 : i32
    return %c0_i32, %c0_i32_0 : i32, i32
  }
  func.func @transform_5(%arg0: i32) -> (i32, i32) {
    %c0_i32 = arith.constant 0 : i32
    %c0_i32_0 = arith.constant 0 : i32
    %c0_i32_1 = arith.constant 0 : i32
    return %c0_i32, %c0_i32_0 : i32, i32
  }
  func.func @transform_6(%arg0: i32) -> (i32, i32) {
    %c0_i32 = arith.constant 0 : i32
    %c0_i32_0 = arith.constant 0 : i32
    %c0_i32_1 = arith.constant 0 : i32
    return %c0_i32, %c0_i32_0 : i32, i32
  }
  func.func @transform_7(%arg0: i32) -> (i32, i32) {
    %c0_i32 = arith.constant 0 : i32
    %c0_i32_0 = arith.constant 0 : i32
    %c0_i32_1 = arith.constant 0 : i32
    return %c0_i32, %c0_i32_0 : i32, i32
  }
  func.func @transform_8(%arg0: i32) -> (i32, i32, i32) {
    %c0_i32 = arith.constant 0 : i32
    %c0_i32_0 = arith.constant 0 : i32
    %c0_i32_1 = arith.constant 0 : i32
    return %arg0, %c0_i32, %c0_i32_0 : i32, i32, i32
  }
}

</mosaic_0001>

<bundles_post_ra>
// kernel: tpu_custom_call.1
= control target key start
LH: loop header
LB: loop body
LE: loop exit
PB: predicated region body
PF: predicated region fallthrough
CT: control target
= control target key end

     0   :  { %13 = vsyncpa [#allocation3], 0  ;;  %s3716_s27 = smov [#allocation2]   ;;  %s4890_s0 = inlined_call_operand.vmem [shape: f32[1,324,64], index: 0, kind: input, shape index: {}]   ;;  %s4891_s1 = inlined_call_operand.hbm [shape: f32[324,324], index: 1, kind: input, shape index: {}]   ;;  %s4892_s2 = inlined_call_operand.vmem [shape: f32[64,256], index: 2, kind: input, shape index: {}]   ;;  %s4893_s3 = inlined_call_operand.vmem [shape: f32[1,256], index: 3, kind: input, shape index: {}]   ;;  %s4894_s4 = inlined_call_operand.vmem [shape: f32[1,256], index: 4, kind: input, shape index: {}]   ;;  %s4895_s5 = inlined_call_operand.vmem [shape: f32[1,256], index: 5, kind: input, shape index: {}]   ;;  %s4896_s6 = inlined_call_operand.vmem [shape: f32[256,128], index: 6, kind: input, shape index: {}]   ;;  %s4897_s7 = inlined_call_operand.vmem [shape: f32[1,128], index: 7, kind: input, shape index: {}]   ;;  %s4898_s8 = inlined_call_operand.vmem [shape: f32[1,324,128], index: 8, kind: output, shape index: {}]  }
   0x1   :  { %s21_s28 = sshll.u32 %s3716_s27, 4  ;;  %s3692_s9 = scalar_lea.hbm %s4891_s1, 15744  ;;  %s22_s28 = int_to_ptr.vmem [resolvable:$true] %s21_s28 }
   0x2   :  { %p3693_p0 = scmp.ne.s32.totalorder %s4891_s1, %s3692_s9  ;;  %p3696_p1 = scmp.lt.u32.totalorder %s3692_s9, %s4891_s1 }
   0x4   :  { %p3698_p2 = pnand %p3696_p1, %p3693_p0 }
   0x6   :  { %3701 = shalt.err (!%p3698_p2)
}
   0x7   :  { %s3702_s14 = scalar_lea.vmem %s22_s28, 15744  ;;  %p3707_p4 = scmp.lt.s32.totalorder %s22_s28, %s22_s28 }
   0x8   :  { %p3703_p3 = scmp.ne.s32.totalorder %s22_s28, %s3702_s14  ;;  %p3708_p5 = scmp.lt.s32.totalorder %s3702_s14, %s3702_s14 }
   0xa   :  { %p3709_p6 = por %p3708_p5, %p3707_p4 }
   0xc   :  { %p3710_p7 = pnand %p3709_p6, %p3703_p3 }
   0xe   :  { %3713 = shalt.err (!%p3710_p7)
}
   0xf   :  { %s3717_s15 = smov 384   ;;  %s3718_s16 = smov 24  }
  0x10   :  { %27 = dma.hbm_to_vmem [thread:$0]  %s4891_s1, 15744, %s22_s28, [#allocation3], %s3717_s15, %s3717_s15, %s3718_s16  }
  0x11   :  { %3714 = dma.done.wait [#allocation3], 15744  }
  0x12   :  { %3715 = vsyncadd [#allocation3], 4294951552  ;;  %v3719_v0 = vmov 0.0|0.0   ;;  %v166_v1 = vld [vmem:[%s4890_s0] sm:$0xff]  ;;  %v167_v2 = vld [vmem:[%s4890_s0 + $0x8] sm:$0xff]  ;;  %vm331_vm0 = vcmask 1043456  }
  0x13   :  { %3178 = vmatprep.subr.bf16.mxu0 %v3719_v0  ;;  %v168_v3 = vld [vmem:[%s4890_s0 + $0x10] sm:$0xff]  ;;  %v3179_v4 = vpack.c.bf16 %v167_v2, %v166_v1  ;;  %v169_v5 = vld [vmem:[%s4890_s0 + $0x18] sm:$0xff]  ;;  %v170_v7 = vld [vmem:[%s4890_s0 + $0x20] sm:$0xff]  ;;  %vm3721_vm1 = vmmov 0   ;;  %vm207_vm2 = vcmask 556032   ;;  %vm903_vm3 = vcmask 523264  }
  0x14   :  { %v3182_v6 = vpack.c.bf16 %v169_v5, %v168_v3  ;;  %v171_v8 = vld [vmem:[%s4890_s0 + $0x28] sm:$0xff]  ;;  %v172_v10 = vld [vmem:[%s4890_s0 + $0x30] sm:$0xff]  ;;  %v173_v11 = vld [vmem:[%s4890_s0 + $0x38] sm:$0xff] }
  0x15   :  { %3180 = vmatpush1.bf16.msra.mxu0 %v3179_v4  ;;  %v3185_v9 = vpack.c.bf16 %v171_v8, %v170_v7  ;;  %v3806_v12 = vld [vmem:[#allocation2 + $0x8] sm:$0xff]  ;;  %v3188_v13 = vpack.c.bf16 %v173_v11, %v172_v10  ;;  %v174_v14 = vld [vmem:[%s4890_s0 + $0x40] sm:$0xff]  ;;  %v176_v17 = vld [vmem:[%s4890_s0 + $0x50] sm:$0xff] }
  0x16   :  { %3181 = vmatprep.subr.bf16.mxu0 %v3719_v0  ;;  %399 = vmatprep.mubr.f32.mxu0 %v3806_v12  ;;  %v175_v15 = vld [vmem:[%s4890_s0 + $0x48] sm:$0xff]  ;;  %v177_v18 = vld [vmem:[%s4890_s0 + $0x58] sm:$0xff]  ;;  %v178_v20 = vld [vmem:[%s4890_s0 + $0x60] sm:$0xff] }
  0x17   :  { %v3191_v16 = vpack.c.bf16 %v175_v15, %v174_v14  ;;  %v3194_v19 = vpack.c.bf16 %v177_v18, %v176_v17  ;;  %v179_v21 = vld [vmem:[%s4890_s0 + $0x68] sm:$0xff]  ;;  %v180_v23 = vld [vmem:[%s4890_s0 + $0x70] sm:$0xff]  ;;  %v181_v24 = vld [vmem:[%s4890_s0 + $0x78] sm:$0xff] }
  0x18   :  { %v3197_v22 = vpack.c.bf16 %v179_v21, %v178_v20  ;;  %v3200_v25 = vpack.c.bf16 %v181_v24, %v180_v23  ;;  %v182_v26 = vld [vmem:[%s4890_s0 + $0x80] sm:$0xff]  ;;  %v183_v27 = vld [vmem:[%s4890_s0 + $0x88] sm:$0xff]  ;;  %v184_v29 = vld [vmem:[%s4890_s0 + $0x90] sm:$0xff]  ;;  %v3720_v20 = vmov 0.0  }
  0x19   :  { %3183 = vmatpush1.bf16.msra.mxu0 %v3182_v6  ;;  %v3203_v28 = vpack.c.bf16 %v183_v27, %v182_v26  ;;  %v185_v30 = vld [vmem:[%s4890_s0 + $0x98] sm:$0xff]  ;;  %v186_v32 = vld [vmem:[%s4890_s0 + $0xa0] sm:$0xff]  ;;  %v187_v33 = vld [vmem:[%s4890_s0 + $0xa8] sm:$0xff]  ;;  %1091 = vmatprep.mubr.f32.mxu1 %v3720_v20 }
  0x1a   :  { %3184 = vmatprep.subr.bf16.mxu0 %v3719_v0  ;;  %v3206_v31 = vpack.c.bf16 %v185_v30, %v184_v29  ;;  %v3209_v34 = vpack.c.bf16 %v187_v33, %v186_v32  ;;  %v188_v35 = vld [vmem:[%s4890_s0 + $0xb0] sm:$0xff]  ;;  %v189_v36 = vld [vmem:[%s4890_s0 + $0xb8] sm:$0xff]  ;;  %v190_v38 = vld [vmem:[%s4890_s0 + $0xc0] sm:$0xff] }
  0x1b   :  { %v3212_v37 = vpack.c.bf16 %v189_v36, %v188_v35  ;;  %v191_v39 = vld [vmem:[%s4890_s0 + $0xc8] sm:$0xff]  ;;  %v192_v41 = vld [vmem:[%s4890_s0 + $0xd0] sm:$0xff]  ;;  %v193_v42 = vld [vmem:[%s4890_s0 + $0xd8] sm:$0xff] }
  0x1c   :  { %v3215_v40 = vpack.c.bf16 %v191_v39, %v190_v38  ;;  %v3218_v43 = vpack.c.bf16 %v193_v42, %v192_v41  ;;  %v194_v44 = vld [vmem:[%s4890_s0 + $0xe0] sm:$0xff]  ;;  %v195_v45 = vld [vmem:[%s4890_s0 + $0xe8] sm:$0xff]  ;;  %v196_v47 = vld [vmem:[%s4890_s0 + $0xf0] sm:$0xff] }
  0x1d   :  { %3186 = vmatpush1.bf16.msra.mxu0 %v3185_v9  ;;  %v3221_v46 = vpack.c.bf16 %v195_v45, %v194_v44  ;;  %v197_v48 = vld [vmem:[%s4890_s0 + $0xf8] sm:$0xff]  ;;  %v198_v50 = vld [vmem:[%s4890_s0 + $0x100] sm:$0xff]  ;;  %v199_v51 = vld [vmem:[%s4890_s0 + $0x108] sm:$0xff] }
  0x1e   :  { %3187 = vmatprep.subr.bf16.mxu0 %v3719_v0  ;;  %v3224_v49 = vpack.c.bf16 %v197_v48, %v196_v47  ;;  %v43_v52 = vld [vmem:[#allocation2] sm:$0xff]  ;;  %v3227_v53 = vpack.c.bf16 %v199_v51, %v198_v50  ;;  %v200_v55 = vld [vmem:[%s4890_s0 + $0x110] sm:$0xff]  ;;  %v201_v56 = vld [vmem:[%s4890_s0 + $0x118] sm:$0xff] }
  0x1f   :  { %v47_v54 = vld [vmem:[#allocation2 + $0x20] sm:$0xff]  ;;  %v46_v57 = vld [vmem:[#allocation2 + $0x18] sm:$0xff]  ;;  %v3230_v58 = vpack.c.bf16 %v201_v56, %v200_v55  ;;  %v203_v61 = vld [vmem:[%s4890_s0 + $0x128] sm:$0xff] }
  0x20   :  { %v50_v59 = vld [vmem:[#allocation2 + $0x38] sm:$0xff]  ;;  %v202_v60 = vld [vmem:[%s4890_s0 + $0x120] sm:$0xff]  ;;  %v49_v62 = vld [vmem:[#allocation2 + $0x30] sm:$0xff] }
  0x21   :  { %3189 = vmatpush1.bf16.msra.mxu0 %v3188_v13  ;;  %v3233_v63 = vpack.c.bf16 %v203_v61, %v202_v60  ;;  %v53_v1 = vld [vmem:[#allocation2 + $0x50] sm:$0xff]  ;;  %v205_v3 = vld [vmem:[%s4890_s0 + $0x138] sm:$0xff]  ;;  %v52_v4 = vld [vmem:[#allocation2 + $0x48] sm:$0xff] }
  0x22   :  { %3190 = vmatprep.subr.bf16.mxu0 %v3719_v0  ;;  %v204_v2 = vld [vmem:[%s4890_s0 + $0x130] sm:$0xff]  ;;  %v56_v6 = vld [vmem:[#allocation2 + $0x68] sm:$0xff]  ;;  %v55_v7 = vld [vmem:[#allocation2 + $0x60] sm:$0xff] }
  0x23   :  { %v3236_v5 = vpack.c.bf16 %v205_v3, %v204_v2  ;;  %v59_v8 = vld [vmem:[#allocation2 + $0x80] sm:$0xff]  ;;  %v58_v9 = vld [vmem:[#allocation2 + $0x78] sm:$0xff]  ;;  %v61_v11 = vld [vmem:[#allocation2 + $0x90] sm:$0xff] }
  0x24   :  { %v62_v10 = vld [vmem:[#allocation2 + $0x98] sm:$0xff]  ;;  %v65_v13 = vld [vmem:[#allocation2 + $0xb0] sm:$0xff]  ;;  %v64_v14 = vld [vmem:[#allocation2 + $0xa8] sm:$0xff] }
  0x25   :  { %3192 = vmatpush1.bf16.msra.mxu0 %v3191_v16  ;;  %v68_v15 = vld [vmem:[#allocation2 + $0xc8] sm:$0xff]  ;;  %v67_v16 = vld [vmem:[#allocation2 + $0xc0] sm:$0xff]  ;;  %v74_v21 = vld [vmem:[#allocation2 + $0xf8] sm:$0xff] }
  0x26   :  { %3193 = vmatprep.subr.bf16.mxu0 %v3719_v0  ;;  %v71_v17 = vld [vmem:[#allocation2 + $0xe0] sm:$0xff]  ;;  %v77_v23 = vld [vmem:[#allocation2 + $0x110] sm:$0xff]  ;;  %v76_v24 = vld [vmem:[#allocation2 + $0x108] sm:$0xff] }
  0x27   :  { %v206_v18 = vld [vmem:[%s4890_s0 + $0x140] sm:$0xf]  ;;  %v86_v29 = vld [vmem:[#allocation2 + $0x158] sm:$0xff]  ;;  %v85_v30 = vld [vmem:[#allocation2 + $0x150] sm:$0xff] }
  0x28   :  { %v79_v26 = vld [vmem:[#allocation2 + $0x120] sm:$0xff]  ;;  %v88_v32 = vld [vmem:[#allocation2 + $0x168] sm:$0xff]  ;;  %v94_v36 = vld [vmem:[#allocation2 + $0x198] sm:$0xff] }
  0x29   :  { %3195 = vmatpush1.bf16.msra.mxu0 %v3194_v19  ;;  %v70_v19 = vld [vmem:[#allocation2 + $0xd8] sm:$0xff]  ;;  %v83_v27 = vld [vmem:[#allocation2 + $0x140] sm:$0xff]  ;;  %v92_v33 = vld [vmem:[#allocation2 + $0x188] sm:$0xff] }
  0x2a   :  { %3196 = vmatprep.subr.bf16.mxu0 %v3719_v0  ;;  %v95_v35 = vld [vmem:[#allocation2 + $0x1a0] sm:$0xff]  ;;  %v97_v38 = vld [vmem:[#allocation2 + $0x1b0] sm:$0xff]  ;;  %v104_v41 = vld [vmem:[#allocation2 + $0x1e8] sm:$0xff] }
  0x2b   :  { %v101_v39 = vld [vmem:[#allocation2 + $0x1d0] sm:$0xff]  ;;  %v103_v42 = vld [vmem:[#allocation2 + $0x1e0] sm:$0xff]  ;;  %v106_v44 = vld [vmem:[#allocation2 + $0x1f8] sm:$0xff] }
  0x2c   :  { %v110_v45 = vld [vmem:[#allocation2 + $0x218] sm:$0xff]  ;;  %v113_v47 = vld [vmem:[#allocation2 + $0x230] sm:$0xff]  ;;  %v112_v48 = vld [vmem:[#allocation2 + $0x228] sm:$0xff] }
  0x2d   :  { %3198 = vmatpush1.bf16.msra.mxu0 %v3197_v22  ;;  %v73_v22 = vld [vmem:[#allocation2 + $0xf0] sm:$0xff]  ;;  %v115_v50 = vld [vmem:[#allocation2 + $0x240] sm:$0xff]  ;;  %v124_v56 = vld [vmem:[#allocation2 + $0x288] sm:$0xff] }
  0x2e   :  { %3199 = vmatprep.subr.bf16.mxu0 %v3719_v0  ;;  %v119_v51 = vld [vmem:[#allocation2 + $0x260] sm:$0xff]  ;;  %v125_v55 = vld [vmem:[#allocation2 + $0x290] sm:$0xff]  ;;  %v130_v60 = vld [vmem:[#allocation2 + $0x2b8] sm:$0xff] }
  0x2f   :  { %v134_v61 = vld [vmem:[#allocation2 + $0x2d8] sm:$0xff]  ;;  %v140_v2 = vld [vmem:[#allocation2 + $0x308] sm:$0xff]  ;;  %v139_v3 = vld [vmem:[#allocation2 + $0x300] sm:$0xff] }
  0x31   :  { %3201 = vmatpush1.bf16.msra.mxu0 %v3200_v25  ;;  %v80_v25 = vld [vmem:[#allocation2 + $0x128] sm:$0xff] }
  0x32   :  { %3202 = vmatprep.subr.bf16.mxu0 %v3719_v0 }
  0x35   :  { %3204 = vmatpush1.bf16.msra.mxu0 %v3203_v28  ;;  %v82_v28 = vld [vmem:[#allocation2 + $0x138] sm:$0xff] }
  0x36   :  { %3205 = vmatprep.subr.bf16.mxu0 %v3719_v0 }
  0x39   :  { %3207 = vmatpush1.bf16.msra.mxu0 %v3206_v31  ;;  %v89_v31 = vld [vmem:[#allocation2 + $0x170] sm:$0xff] }
  0x3a   :  { %3208 = vmatprep.subr.bf16.mxu0 %v3719_v0 }
  0x3d   :  { %3210 = vmatpush1.bf16.msra.mxu0 %v3209_v34  ;;  %v91_v34 = vld [vmem:[#allocation2 + $0x180] sm:$0xff] }
  0x3e   :  { %3211 = vmatprep.subr.bf16.mxu0 %v3719_v0 }
  0x41   :  { %3213 = vmatpush1.bf16.msra.mxu0 %v3212_v37  ;;  %v98_v37 = vld [vmem:[#allocation2 + $0x1b8] sm:$0xff] }
  0x42   :  { %3214 = vmatprep.subr.bf16.mxu0 %v3719_v0 }
  0x45   :  { %3216 = vmatpush1.bf16.msra.mxu0 %v3215_v40  ;;  %v100_v40 = vld [vmem:[#allocation2 + $0x1c8] sm:$0xff] }
  0x46   :  { %3217 = vmatprep.subr.bf16.mxu0 %v3719_v0 }
  0x49   :  { %3219 = vmatpush1.bf16.msra.mxu0 %v3218_v43  ;;  %v107_v43 = vld [vmem:[#allocation2 + $0x200] sm:$0xff] }
  0x4a   :  { %3220 = vmatprep.subr.bf16.mxu0 %v3719_v0 }
  0x4d   :  { %3222 = vmatpush1.bf16.msra.mxu0 %v3221_v46  ;;  %v109_v46 = vld [vmem:[#allocation2 + $0x210] sm:$0xff] }
  0x4e   :  { %3223 = vmatprep.subr.bf16.mxu0 %v3719_v0 }
  0x51   :  { %3225 = vmatpush1.bf16.msra.mxu0 %v3224_v49  ;;  %v116_v49 = vld [vmem:[#allocation2 + $0x248] sm:$0xff] }
  0x52   :  { %3226 = vmatprep.subr.bf16.mxu0 %v3719_v0 }
  0x54   :  { %400 = vmatmul.mubr.f32.vlgmr.msra.gmra.mrb[0].mxu0 %v43_v52  ;;  %v118_v52 = vld [vmem:[#allocation2 + $0x258] sm:$0xff] }
  0x55   :  { %404 = vmatprep.mubr.f32.mxu0 %v47_v54  ;;  %3228 = vmatpush3.bf16.msra.mxu0 %v3227_v53  ;;  %v122_v53 = vld [vmem:[#allocation2 + $0x278] sm:$0xff]  ;;  %v121_v54 = vld [vmem:[#allocation2 + $0x270] sm:$0xff] }
  0x56   :  { %3229 = vmatprep.subr.bf16.mxu0 %v3719_v0 }
  0x58   :  { %405 = vmatmul.mubr.f32.gmra.mrb[2].mxu0 %v46_v57  ;;  %v128_v57 = vld [vmem:[#allocation2 + $0x2a8] sm:$0xff] }
  0x59   :  { %409 = vmatprep.mubr.f32.mxu0 %v50_v59  ;;  %3231 = vmatpush3.bf16.msra.mxu0 %v3230_v58  ;;  %v127_v58 = vld [vmem:[#allocation2 + $0x2a0] sm:$0xff] }
  0x5a   :  { %3232 = vmatprep.subr.bf16.mxu0 %v3719_v0  ;;  %v131_v59 = vld [vmem:[#allocation2 + $0x2c0] sm:$0xff] }
  0x5c   :  { %410 = vmatmul.mubr.f32.gmra.mrb[4].mxu0 %v49_v62  ;;  %v133_v62 = vld [vmem:[#allocation2 + $0x2d0] sm:$0xff] }
  0x5d   :  { %414 = vmatprep.mubr.f32.mxu0 %v53_v1  ;;  %3234 = vmatpush3.bf16.msra.mxu0 %v3233_v63  ;;  %v137_v63 = vld [vmem:[#allocation2 + $0x2f0] sm:$0xff]  ;;  %v136_v1 = vld [vmem:[#allocation2 + $0x2e8] sm:$0xff] }
  0x5e   :  { %3235 = vmatprep.subr.bf16.mxu0 %v3719_v0 }
  0x60   :  { %415 = vmatmul.mubr.f32.gmra.mrb[6].mxu0 %v52_v4  ;;  %v143_v4 = vld [vmem:[#allocation2 + $0x320] sm:$0xff] }
  0x61   :  { %419 = vmatprep.mubr.f32.mxu0 %v56_v6  ;;  %3237 = vmatpush3.bf16.msra.mxu0 %v3236_v5  ;;  %v142_v5 = vld [vmem:[#allocation2 + $0x318] sm:$0xff] }
  0x62   :  { %2912 = vmatprep.subr.mxu0 %v3720_v20  ;;  %v146_v6 = vld [vmem:[#allocation2 + $0x338] sm:$0xff] }
  0x64   :  { %420 = vmatmul.mubr.f32.gmra.mrb[8].mxu0 %v55_v7  ;;  %v145_v7 = vld [vmem:[#allocation2 + $0x330] sm:$0xff] }
  0x65   :  { %424 = vmatprep.mubr.f32.mxu0 %v59_v8  ;;  %2913 = vmatpush3.msk.msra.mxu0 %vm331_vm0, %v206_v18  ;;  %v149_v8 = vld [vmem:[#allocation2 + $0x350] sm:$0xff]  ;;  %v160_v18 = vld [vmem:[#allocation2 + $0x3a8] sm:$0xff] }
  0x66   :  { %3302 = vmatprep.subr.bf16.mxu0 %v3719_v0 }
  0x68   :  { %425 = vmatmul.mubr.f32.gmra.mrb[10].mxu0 %v58_v9  ;;  %v148_v9 = vld [vmem:[#allocation2 + $0x348] sm:$0xff] }
  0x69   :  { %429 = vmatprep.mubr.f32.mxu0 %v62_v10  ;;  %v152_v10 = vld [vmem:[#allocation2 + $0x368] sm:$0xff] }
  0x6c   :  { %430 = vmatmul.mubr.f32.gmra.mrb[12].mxu0 %v61_v11  ;;  %v151_v11 = vld [vmem:[#allocation2 + $0x360] sm:$0xff] }
  0x6d   :  { %434 = vmatprep.mubr.f32.mxu0 %v65_v13  ;;  %v155_v13 = vld [vmem:[#allocation2 + $0x380] sm:$0xff] }
  0x70   :  { %435 = vmatmul.mubr.f32.gmra.mrb[14].mxu0 %v64_v14  ;;  %v154_v14 = vld [vmem:[#allocation2 + $0x378] sm:$0xff] }
  0x71   :  { %439 = vmatprep.mubr.f32.mxu0 %v68_v15  ;;  %v158_v15 = vld [vmem:[#allocation2 + $0x398] sm:$0xff] }
  0x74   :  { %440 = vmatmul.mubr.f32.gmra.mrb[16].mxu0 %v67_v16  ;;  %v157_v16 = vld [vmem:[#allocation2 + $0x390] sm:$0xff] }
  0x75   :  { %444 = vmatprep.mubr.f32.mxu0 %v71_v17  ;;  %v161_v17 = vld [vmem:[#allocation2 + $0x3b0] sm:$0xff] }
  0x78   :  { %445 = vmatmul.mubr.f32.gmra.mrb[18].mxu0 %v70_v19  ;;  %v164_v19 = vld [vmem:[#allocation2 + $0x3c8] sm:$0xf] }
  0x79   :  { %449 = vmatprep.mubr.f32.mxu0 %v74_v21  ;;  %v163_v21 = vld [vmem:[#allocation2 + $0x3c0] sm:$0xf] }
  0x7c   :  { %450 = vmatmul.mubr.f32.gmra.mrb[20].mxu0 %v73_v22  ;;  %v45_v22 = vld [vmem:[#allocation2 + $0x10] sm:$0xff] }
  0x7d   :  { %454 = vmatprep.mubr.f32.mxu0 %v77_v23  ;;  %v48_v23 = vld [vmem:[#allocation2 + $0x28] sm:$0xff] }
  0x80   :  { %455 = vmatmul.mubr.f32.gmra.mrb[22].mxu0 %v76_v24  ;;  %v51_v24 = vld [vmem:[#allocation2 + $0x40] sm:$0xff] }
  0x81   :  { %459 = vmatprep.mubr.f32.mxu0 %v80_v25  ;;  %v54_v25 = vld [vmem:[#allocation2 + $0x58] sm:$0xff] }
  0x84   :  { %460 = vmatmul.mubr.f32.gmra.mrb[24].mxu0 %v79_v26  ;;  %v57_v26 = vld [vmem:[#allocation2 + $0x70] sm:$0xff] }
  0x85   :  { %464 = vmatprep.mubr.f32.mxu0 %v83_v27  ;;  %v60_v27 = vld [vmem:[#allocation2 + $0x88] sm:$0xff] }
  0x88   :  { %465 = vmatmul.mubr.f32.gmra.mrb[26].mxu0 %v82_v28  ;;  %v63_v28 = vld [vmem:[#allocation2 + $0xa0] sm:$0xff] }
  0x89   :  { %469 = vmatprep.mubr.f32.mxu0 %v86_v29  ;;  %v66_v29 = vld [vmem:[#allocation2 + $0xb8] sm:$0xff] }
  0x8c   :  { %470 = vmatmul.mubr.f32.gmra.mrb[28].mxu0 %v85_v30  ;;  %v69_v30 = vld [vmem:[#allocation2 + $0xd0] sm:$0xff] }
  0x8d   :  { %474 = vmatprep.mubr.f32.mxu0 %v89_v31  ;;  %v72_v31 = vld [vmem:[#allocation2 + $0xe8] sm:$0xff] }
  0x90   :  { %475 = vmatmul.mubr.f32.gmra.mrb[30].mxu0 %v88_v32  ;;  %v876_v32 = vld [vmem:[%s4892_s2 + $0x8] sm:$0xff] }
  0x91   :  { %479 = vmatprep.mubr.f32.mxu0 %v92_v33  ;;  %v878_v33 = vld [vmem:[%s4892_s2 + $0x18] sm:$0xff] }
  0x94   :  { %480 = vmatmul.mubr.f32.gmra.mrb[32].mxu0 %v91_v34  ;;  %v875_v34 = vld [vmem:[%s4892_s2] sm:$0xff] }
  0x95   :  { %484 = vmatprep.mubr.f32.mxu0 %v95_v35  ;;  %v3238_v35 = vpack.c.bf16 %v878_v33, %v876_v32  ;;  %v1776_v33 = vld [vmem:[%s4896_s6 + $0x20] sm:$0xff] }
  0x97   :  { %3239 = vmatprep.subr.bf16.mxu1 %v3238_v35 }
  0x98   :  { %485 = vmatmul.mubr.f32.gmra.mrb[34].mxu0 %v94_v36  ;;  %v877_v36 = vld [vmem:[%s4892_s2 + $0x10] sm:$0xff] }
  0x99   :  { %489 = vmatprep.mubr.f32.mxu0 %v98_v37  ;;  %v880_v37 = vld [vmem:[%s4892_s2 + $0x28] sm:$0xff] }
  0x9c   :  { %490 = vmatmul.mubr.f32.gmra.mrb[36].mxu0 %v97_v38  ;;  %v882_v38 = vld [vmem:[%s4892_s2 + $0x38] sm:$0xff] }
  0x9d   :  { %494 = vmatprep.mubr.f32.mxu0 %v101_v39  ;;  %v3240_v39 = vpack.c.bf16 %v877_v36, %v875_v34  ;;  %v1777_v34 = vld [vmem:[%s4896_s6 + $0x28] sm:$0xff] }
  0x9f   :  { %3241 = vmatpush1.bf16.msra.mxu1 %v3240_v39  ;;  %v1779_v39 = vld [vmem:[%s4896_s6 + $0x38] sm:$0xff] }
  0xa0   :  { %495 = vmatmul.mubr.f32.gmra.mrb[38].mxu0 %v100_v40  ;;  %v3242_v40 = vpack.c.bf16 %v882_v38, %v880_v37  ;;  %v3261_v37 = vpack.c.bf16 %v1777_v34, %v1776_v33  ;;  %v1778_v38 = vld [vmem:[%s4896_s6 + $0x30] sm:$0xff] }
  0xa1   :  { %499 = vmatprep.mubr.f32.mxu0 %v104_v41  ;;  %v879_v41 = vld [vmem:[%s4892_s2 + $0x20] sm:$0xff] }
  0xa2   :  { %3243 = vmatprep.subr.bf16.mxu1 %v3242_v40 }
  0xa4   :  { %500 = vmatmul.mubr.f32.gmra.mrb[40].mxu0 %v103_v42  ;;  %v881_v42 = vld [vmem:[%s4892_s2 + $0x30] sm:$0xff] }
  0xa5   :  { %504 = vmatprep.mubr.f32.mxu0 %v107_v43  ;;  %v884_v43 = vld [vmem:[%s4892_s2 + $0x48] sm:$0xff] }
  0xa8   :  { %505 = vmatmul.mubr.f32.gmra.mrb[42].mxu0 %v106_v44  ;;  %v886_v44 = vld [vmem:[%s4892_s2 + $0x58] sm:$0xff] }
  0xa9   :  { %509 = vmatprep.mubr.f32.mxu0 %v110_v45  ;;  %v3244_v45 = vpack.c.bf16 %v881_v42, %v879_v41  ;;  %v3264_v42 = vpack.c.bf16 %v1779_v39, %v1778_v38 }
  0xab   :  { %3245 = vmatpush1.bf16.msra.mxu1 %v3244_v45 }
  0xac   :  { %510 = vmatmul.mubr.f32.gmra.mrb[44].mxu0 %v109_v46  ;;  %v75_v46 = vld [vmem:[#allocation2 + $0x100] sm:$0xff] }
  0xad   :  { %514 = vmatprep.mubr.f32.mxu0 %v113_v47  ;;  %v3246_v47 = vpack.c.bf16 %v886_v44, %v884_v43  ;;  %v1780_v43 = vld [vmem:[%s4896_s6 + $0x40] sm:$0xff]  ;;  %v1781_v44 = vld [vmem:[%s4896_s6 + $0x48] sm:$0xff] }
  0xaf   :  { %3247 = vmatprep.subr.bf16.mxu1 %v3246_v47  ;;  %v3267_v47 = vpack.c.bf16 %v1781_v44, %v1780_v43  ;;  %v1798_v44 = vld [vmem:[%s4896_s6 + $0xd0] sm:$0xff] }
  0xb0   :  { %515 = vmatmul.mubr.f32.gmra.mrb[46].mxu0 %v112_v48  ;;  %v883_v48 = vld [vmem:[%s4892_s2 + $0x40] sm:$0xff] }
  0xb1   :  { %519 = vmatprep.mubr.f32.mxu0 %v116_v49  ;;  %v885_v49 = vld [vmem:[%s4892_s2 + $0x50] sm:$0xff] }
  0xb4   :  { %520 = vmatmul.mubr.f32.gmra.mrb[48].mxu0 %v115_v50  ;;  %v888_v50 = vld [vmem:[%s4892_s2 + $0x68] sm:$0xff] }
  0xb5   :  { %524 = vmatprep.mubr.f32.mxu0 %v119_v51  ;;  %v890_v51 = vld [vmem:[%s4892_s2 + $0x78] sm:$0xff] }
  0xb8   :  { %525 = vmatmul.mubr.f32.gmra.mrb[50].mxu0 %v118_v52  ;;  %v3248_v52 = vpack.c.bf16 %v885_v49, %v883_v48  ;;  %v1782_v48 = vld [vmem:[%s4896_s6 + $0x50] sm:$0xff]  ;;  %v1783_v49 = vld [vmem:[%s4896_s6 + $0x58] sm:$0xff] }
  0xb9   :  { %529 = vmatprep.mubr.f32.mxu0 %v122_v53  ;;  %v78_v53 = vld [vmem:[#allocation2 + $0x118] sm:$0xff] }
  0xba   :  { %3249 = vmatpush1.bf16.msra.mxu1 %v3248_v52  ;;  %v3270_v52 = vpack.c.bf16 %v1783_v49, %v1782_v48  ;;  %v1800_v49 = vld [vmem:[%s4896_s6 + $0xe0] sm:$0xff] }
  0xbc   :  { %530 = vmatmul.mubr.f32.gmra.mrb[52].mxu0 %v121_v54  ;;  %v3250_v54 = vpack.c.bf16 %v890_v51, %v888_v50 }
  0xbd   :  { %534 = vmatprep.mubr.f32.mxu0 %v125_v55  ;;  %v887_v55 = vld [vmem:[%s4892_s2 + $0x60] sm:$0xff] }
  0xbe   :  { %3251 = vmatprep.subr.bf16.mxu1 %v3250_v54 }
  0xc0   :  { %535 = vmatmul.mubr.f32.gmra.mrb[54].mxu0 %v124_v56  ;;  %v889_v56 = vld [vmem:[%s4892_s2 + $0x70] sm:$0xff] }
  0xc1   :  { %539 = vmatprep.mubr.f32.mxu0 %v128_v57  ;;  %v3252_v57 = vpack.c.bf16 %v889_v56, %v887_v55 }
  0xc3   :  { %3253 = vmatpush1.bf16.msra.mxu1 %v3252_v57  ;;  %v1784_v57 = vld [vmem:[%s4896_s6 + $0x60] sm:$0xff] }
  0xc4   :  { %540 = vmatmul.mubr.f32.gmra.mrb[56].mxu0 %v127_v58  ;;  %v81_v58 = vld [vmem:[#allocation2 + $0x130] sm:$0xff]  ;;  %3254 = vmatprep.subr.bf16.mxu1 %v3719_v0 }
  0xc5   :  { %544 = vmatprep.mubr.f32.mxu0 %v131_v59  ;;  %v84_v59 = vld [vmem:[#allocation2 + $0x148] sm:$0xff] }
  0xc8   :  { %545 = vmatmul.mubr.f32.gmra.mrb[58].mxu0 %v130_v60  ;;  %v87_v60 = vld [vmem:[#allocation2 + $0x160] sm:$0xff] }
  0xc9   :  { %549 = vmatprep.mubr.f32.mxu0 %v134_v61  ;;  %v90_v61 = vld [vmem:[#allocation2 + $0x178] sm:$0xff] }
  0xcc   :  { %550 = vmatmul.mubr.f32.gmra.mrb[60].mxu0 %v133_v62  ;;  %v93_v62 = vld [vmem:[#allocation2 + $0x190] sm:$0xff] }
  0xcd   :  { %554 = vmatprep.mubr.f32.mxu0 %v137_v63  ;;  %v96_v63 = vld [vmem:[#allocation2 + $0x1a8] sm:$0xff] }
  0xd0   :  { %555 = vmatmul.mubr.f32.gmra.mrb[62].mxu0 %v136_v1  ;;  %v99_v1 = vld [vmem:[#allocation2 + $0x1c0] sm:$0xff] }
  0xd1   :  { %559 = vmatprep.mubr.f32.mxu0 %v140_v2  ;;  %v102_v2 = vld [vmem:[#allocation2 + $0x1d8] sm:$0xff] }
  0xd4   :  { %560 = vmatmul.mubr.f32.gmra.mrb[64].mxu0 %v139_v3  ;;  %v105_v3 = vld [vmem:[#allocation2 + $0x1f0] sm:$0xff] }
  0xd5   :  { %564 = vmatprep.mubr.f32.mxu0 %v143_v4  ;;  %v108_v4 = vld [vmem:[#allocation2 + $0x208] sm:$0xff] }
  0xd8   :  { %565 = vmatmul.mubr.f32.gmra.mrb[66].mxu0 %v142_v5  ;;  %v111_v5 = vld [vmem:[#allocation2 + $0x220] sm:$0xff] }
  0xd9   :  { %569 = vmatprep.mubr.f32.mxu0 %v146_v6  ;;  %v114_v6 = vld [vmem:[#allocation2 + $0x238] sm:$0xff] }
  0xdc   :  { %570 = vmatmul.mubr.f32.gmra.mrb[68].mxu0 %v145_v7  ;;  %v117_v7 = vld [vmem:[#allocation2 + $0x250] sm:$0xff] }
  0xdd   :  { %574 = vmatprep.mubr.f32.mxu0 %v149_v8  ;;  %v120_v8 = vld [vmem:[#allocation2 + $0x268] sm:$0xff] }
  0xe0   :  { %575 = vmatmul.mubr.f32.gmra.mrb[70].mxu0 %v148_v9  ;;  %v123_v9 = vld [vmem:[#allocation2 + $0x280] sm:$0xff] }
  0xe1   :  { %579 = vmatprep.mubr.f32.mxu0 %v152_v10  ;;  %v126_v10 = vld [vmem:[#allocation2 + $0x298] sm:$0xff] }
  0xe4   :  { %580 = vmatmul.mubr.f32.gmra.mrb[72].mxu0 %v151_v11  ;;  %v129_v11 = vld [vmem:[#allocation2 + $0x2b0] sm:$0xff] }
  0xe5   :  { %584 = vmatprep.mubr.f32.mxu0 %v155_v13  ;;  %v132_v13 = vld [vmem:[#allocation2 + $0x2c8] sm:$0xff] }
  0xe8   :  { %585 = vmatmul.mubr.f32.gmra.mrb[74].mxu0 %v154_v14  ;;  %v135_v14 = vld [vmem:[#allocation2 + $0x2e0] sm:$0xff] }
  0xe9   :  { %589 = vmatprep.mubr.f32.mxu0 %v158_v15  ;;  %v138_v15 = vld [vmem:[#allocation2 + $0x2f8] sm:$0xff] }
  0xec   :  { %590 = vmatmul.mubr.f32.gmra.mrb[76].mxu0 %v157_v16  ;;  %v141_v16 = vld [vmem:[#allocation2 + $0x310] sm:$0xff] }
  0xed   :  { %594 = vmatprep.mubr.f32.mxu0 %v161_v17  ;;  %v144_v17 = vld [vmem:[#allocation2 + $0x328] sm:$0xff] }
  0xf0   :  { %595 = vmatmul.mubr.f32.gmra.mrb[78].mxu0 %v160_v18  ;;  %v147_v18 = vld [vmem:[#allocation2 + $0x340] sm:$0xff] }
  0xf1   :  { %599 = vmatprep.mubr.f32.mxu0 %v164_v19  ;;  %v150_v19 = vld [vmem:[#allocation2 + $0x358] sm:$0xff] }
  0xf4   :  { %600 = vmatmul.mubr.f32.gmra.mrb[80].mxu0 %v163_v21  ;;  %v153_v21 = vld [vmem:[#allocation2 + $0x370] sm:$0xff] }
  0xf5   :  { %2914 = vmatprep.mubr.msk.f32.mxu0 %vm3721_vm1, %v3720_v20 }
  0xf8   :  { %2915 = vmatmul.mubr.msk.f32.vlgmr.msra.gmra.mrb[0].mxu0 %vm207_vm2, %v45_v22  ;;  %v156_v22 = vld [vmem:[#allocation2 + $0x388] sm:$0xff] }
  0xf9   :  { %2917 = vmatprep.mubr.msk.f32.mxu0 %vm3721_vm1, %v3720_v20 }
  0xfc   :  { %2918 = vmatmul.mubr.msk.f32.gmra.mrb[2].mxu0 %vm207_vm2, %v48_v23  ;;  %v159_v23 = vld [vmem:[#allocation2 + $0x3a0] sm:$0xff] }
  0xfd   :  { %2920 = vmatprep.mubr.msk.f32.mxu0 %vm3721_vm1, %v3720_v20 }
 0x100   :  { %2921 = vmatmul.mubr.msk.f32.gmra.mrb[4].mxu0 %vm207_vm2, %v51_v24  ;;  %v162_v24 = vld [vmem:[#allocation2 + $0x3b8] sm:$0xff] }
 0x101   :  { %2923 = vmatprep.mubr.msk.f32.mxu0 %vm3721_vm1, %v3720_v20 }
 0x104   :  { %2924 = vmatmul.mubr.msk.f32.gmra.mrb[6].mxu0 %vm207_vm2, %v54_v25  ;;  %v165_v25 = vld [vmem:[#allocation2 + $0x3d0] sm:$0xf] }
 0x105   :  { %2926 = vmatprep.mubr.msk.f32.mxu0 %vm3721_vm1, %v3720_v20 }
 0x108   :  { %2927 = vmatmul.mubr.msk.f32.gmra.mrb[8].mxu0 %vm207_vm2, %v57_v26  ;;  %v1772_v26 = vld [vmem:[%s4896_s6] sm:$0xff] }
 0x109   :  { %2929 = vmatprep.mubr.msk.f32.mxu0 %vm3721_vm1, %v3720_v20 }
 0x10c   :  { %2930 = vmatmul.mubr.msk.f32.gmra.mrb[10].mxu0 %vm207_vm2, %v60_v27  ;;  %v1773_v27 = vld [vmem:[%s4896_s6 + $0x8] sm:$0xff] }
 0x10d   :  { %2932 = vmatprep.mubr.msk.f32.mxu0 %vm3721_vm1, %v3720_v20 }
 0x110   :  { %2933 = vmatmul.mubr.msk.f32.gmra.mrb[12].mxu0 %vm207_vm2, %v63_v28  ;;  %v3255_v28 = vpack.c.bf16 %v1773_v27, %v1772_v26  ;;  %v1796_v26 = vld [vmem:[%s4896_s6 + $0xc0] sm:$0xff]  ;;  %v1797_v27 = vld [vmem:[%s4896_s6 + $0xc8] sm:$0xff] }
 0x111   :  { %2935 = vmatprep.mubr.msk.f32.mxu0 %vm3721_vm1, %v3720_v20 }
 0x114   :  { %2936 = vmatmul.mubr.msk.f32.gmra.mrb[14].mxu0 %vm207_vm2, %v66_v29  ;;  %v1774_v29 = vld [vmem:[%s4896_s6 + $0x10] sm:$0xff] }
 0x115   :  { %2938 = vmatprep.mubr.msk.f32.mxu0 %vm3721_vm1, %v3720_v20 }
 0x118   :  { %2939 = vmatmul.mubr.msk.f32.gmra.mrb[16].mxu0 %vm207_vm2, %v69_v30  ;;  %v1775_v30 = vld [vmem:[%s4896_s6 + $0x18] sm:$0xff] }
 0x119   :  { %2941 = vmatprep.mubr.msk.f32.mxu0 %vm3721_vm1, %v3720_v20  ;;  %v3258_v32 = vpack.c.bf16 %v1775_v30, %v1774_v29  ;;  %v3291_v29 = vpack.c.bf16 %v1797_v27, %v1796_v26 }
 0x11c   :  { %2942 = vmatmul.mubr.msk.f32.gmra.mrb[18].mxu0 %vm207_vm2, %v72_v31 }
 0x11d   :  { %2944 = vmatprep.mubr.msk.f32.mxu0 %vm3721_vm1, %v3720_v20 }
 0x120   :  { %2945 = vmatmul.mubr.msk.f32.gmra.mrb[20].mxu0 %vm207_vm2, %v75_v46 }
 0x121   :  { %2947 = vmatprep.mubr.msk.f32.mxu0 %vm3721_vm1, %v3720_v20 }
 0x124   :  { %2948 = vmatmul.mubr.msk.f32.gmra.mrb[22].mxu0 %vm207_vm2, %v78_v53 }
 0x125   :  { %2950 = vmatprep.mubr.msk.f32.mxu0 %vm3721_vm1, %v3720_v20 }
 0x128   :  { %2951 = vmatmul.mubr.msk.f32.gmra.mrb[24].mxu0 %vm207_vm2, %v81_v58  ;;  %v1785_v58 = vld [vmem:[%s4896_s6 + $0x68] sm:$0xff] }
 0x129   :  { %2953 = vmatprep.mubr.msk.f32.mxu0 %vm3721_vm1, %v3720_v20 }
 0x12c   :  { %2954 = vmatmul.mubr.msk.f32.gmra.mrb[26].mxu0 %vm207_vm2, %v84_v59  ;;  %v3273_v59 = vpack.c.bf16 %v1785_v58, %v1784_v57 }
 0x12d   :  { %2956 = vmatprep.mubr.msk.f32.mxu0 %vm3721_vm1, %v3720_v20 }
 0x130   :  { %2957 = vmatmul.mubr.msk.f32.gmra.mrb[28].mxu0 %vm207_vm2, %v87_v60 }
 0x131   :  { %2959 = vmatprep.mubr.msk.f32.mxu0 %vm3721_vm1, %v3720_v20 }
 0x134   :  { %2960 = vmatmul.mubr.msk.f32.gmra.mrb[30].mxu0 %vm207_vm2, %v90_v61 }
 0x135   :  { %2962 = vmatprep.mubr.msk.f32.mxu0 %vm3721_vm1, %v3720_v20 }
 0x138   :  { %2963 = vmatmul.mubr.msk.f32.gmra.mrb[32].mxu0 %vm207_vm2, %v93_v62 }
 0x139   :  { %2965 = vmatprep.mubr.msk.f32.mxu0 %vm3721_vm1, %v3720_v20 }
 0x13c   :  { %2966 = vmatmul.mubr.msk.f32.gmra.mrb[34].mxu0 %vm207_vm2, %v96_v63 }
 0x13d   :  { %2968 = vmatprep.mubr.msk.f32.mxu0 %vm3721_vm1, %v3720_v20 }
 0x140   :  { %2969 = vmatmul.mubr.msk.f32.gmra.mrb[36].mxu0 %vm207_vm2, %v99_v1  ;;  %v1786_v1 = vld [vmem:[%s4896_s6 + $0x70] sm:$0xff] }
 0x141   :  { %2971 = vmatprep.mubr.msk.f32.mxu0 %vm3721_vm1, %v3720_v20 }
 0x144   :  { %2972 = vmatmul.mubr.msk.f32.gmra.mrb[38].mxu0 %vm207_vm2, %v102_v2  ;;  %v1787_v2 = vld [vmem:[%s4896_s6 + $0x78] sm:$0xff] }
 0x145   :  { %2974 = vmatprep.mubr.msk.f32.mxu0 %vm3721_vm1, %v3720_v20 }
 0x148   :  { %2975 = vmatmul.mubr.msk.f32.gmra.mrb[40].mxu0 %vm207_vm2, %v105_v3  ;;  %v1788_v3 = vld [vmem:[%s4896_s6 + $0x80] sm:$0xff] }
 0x149   :  { %2977 = vmatprep.mubr.msk.f32.mxu0 %vm3721_vm1, %v3720_v20 }
 0x14c   :  { %2978 = vmatmul.mubr.msk.f32.gmra.mrb[42].mxu0 %vm207_vm2, %v108_v4  ;;  %v3276_v4 = vpack.c.bf16 %v1787_v2, %v1786_v1 }
 0x14d   :  { %2980 = vmatprep.mubr.msk.f32.mxu0 %vm3721_vm1, %v3720_v20 }
 0x150   :  { %2981 = vmatmul.mubr.msk.f32.gmra.mrb[44].mxu0 %vm207_vm2, %v111_v5  ;;  %v1789_v5 = vld [vmem:[%s4896_s6 + $0x88] sm:$0xff] }
 0x151   :  { %2983 = vmatprep.mubr.msk.f32.mxu0 %vm3721_vm1, %v3720_v20 }
 0x154   :  { %2984 = vmatmul.mubr.msk.f32.gmra.mrb[46].mxu0 %vm207_vm2, %v114_v6 }
 0x155   :  { %2986 = vmatprep.mubr.msk.f32.mxu0 %vm3721_vm1, %v3720_v20 }
 0x158   :  { %2987 = vmatmul.mubr.msk.f32.gmra.mrb[48].mxu0 %vm207_vm2, %v117_v7  ;;  %v3279_v7 = vpack.c.bf16 %v1789_v5, %v1788_v3 }
 0x159   :  { %2989 = vmatprep.mubr.msk.f32.mxu0 %vm3721_vm1, %v3720_v20 }
 0x15c   :  { %2990 = vmatmul.mubr.msk.f32.gmra.mrb[50].mxu0 %vm207_vm2, %v120_v8 }
 0x15d   :  { %2992 = vmatprep.mubr.msk.f32.mxu0 %vm3721_vm1, %v3720_v20 }
 0x160   :  { %2993 = vmatmul.mubr.msk.f32.gmra.mrb[52].mxu0 %vm207_vm2, %v123_v9  ;;  %v1790_v9 = vld [vmem:[%s4896_s6 + $0x90] sm:$0xff] }
 0x161   :  { %2995 = vmatprep.mubr.msk.f32.mxu0 %vm3721_vm1, %v3720_v20 }
 0x164   :  { %2996 = vmatmul.mubr.msk.f32.gmra.mrb[54].mxu0 %vm207_vm2, %v126_v10  ;;  %v1791_v10 = vld [vmem:[%s4896_s6 + $0x98] sm:$0xff] }
 0x165   :  { %2998 = vmatprep.mubr.msk.f32.mxu0 %vm3721_vm1, %v3720_v20 }
 0x168   :  { %2999 = vmatmul.mubr.msk.f32.gmra.mrb[56].mxu0 %vm207_vm2, %v129_v11 }
 0x169   :  { %3001 = vmatprep.mubr.msk.f32.mxu0 %vm3721_vm1, %v3720_v20 }
 0x16c   :  { %3002 = vmatmul.mubr.msk.f32.gmra.mrb[58].mxu0 %vm207_vm2, %v132_v13  ;;  %v3282_v13 = vpack.c.bf16 %v1791_v10, %v1790_v9 }
 0x16d   :  { %3004 = vmatprep.mubr.msk.f32.mxu0 %vm3721_vm1, %v3720_v20 }
 0x170   :  { %3005 = vmatmul.mubr.msk.f32.gmra.mrb[60].mxu0 %vm207_vm2, %v135_v14 }
 0x171   :  { %3007 = vmatprep.mubr.msk.f32.mxu0 %vm3721_vm1, %v3720_v20 }
 0x174   :  { %3008 = vmatmul.mubr.msk.f32.gmra.mrb[62].mxu0 %vm207_vm2, %v138_v15  ;;  %v1792_v15 = vld [vmem:[%s4896_s6 + $0xa0] sm:$0xff] }
 0x175   :  { %3010 = vmatprep.mubr.msk.f32.mxu0 %vm3721_vm1, %v3720_v20 }
 0x178   :  { %3011 = vmatmul.mubr.msk.f32.gmra.mrb[64].mxu0 %vm207_vm2, %v141_v16  ;;  %v1793_v16 = vld [vmem:[%s4896_s6 + $0xa8] sm:$0xff] }
 0x179   :  { %3013 = vmatprep.mubr.msk.f32.mxu0 %vm3721_vm1, %v3720_v20 }
 0x17c   :  { %3014 = vmatmul.mubr.msk.f32.gmra.mrb[66].mxu0 %vm207_vm2, %v144_v17 }
 0x17d   :  { %3016 = vmatprep.mubr.msk.f32.mxu0 %vm3721_vm1, %v3720_v20 }
 0x180   :  { %3017 = vmatmul.mubr.msk.f32.gmra.mrb[68].mxu0 %vm207_vm2, %v147_v18  ;;  %v3285_v18 = vpack.c.bf16 %v1793_v16, %v1792_v15 }
 0x181   :  { %3019 = vmatprep.mubr.msk.f32.mxu0 %vm3721_vm1, %v3720_v20 }
 0x184   :  { %3020 = vmatmul.mubr.msk.f32.gmra.mrb[70].mxu0 %vm207_vm2, %v150_v19 }
 0x185   :  { %3022 = vmatprep.mubr.msk.f32.mxu0 %vm3721_vm1, %v3720_v20 }
 0x188   :  { %3023 = vmatmul.mubr.msk.f32.gmra.mrb[72].mxu0 %vm207_vm2, %v153_v21  ;;  %v1794_v21 = vld [vmem:[%s4896_s6 + $0xb0] sm:$0xff] }
 0x189   :  { %3025 = vmatprep.mubr.msk.f32.mxu0 %vm3721_vm1, %v3720_v20 }
 0x18c   :  { %3026 = vmatmul.mubr.msk.f32.gmra.mrb[74].mxu0 %vm207_vm2, %v156_v22  ;;  %v1795_v22 = vld [vmem:[%s4896_s6 + $0xb8] sm:$0xff] }
 0x18d   :  { %3028 = vmatprep.mubr.msk.f32.mxu0 %vm3721_vm1, %v3720_v20 }
 0x190   :  { %3029 = vmatmul.mubr.msk.f32.gmra.mrb[76].mxu0 %vm207_vm2, %v159_v23 }
 0x191   :  { %3031 = vmatprep.mubr.msk.f32.mxu0 %vm3721_vm1, %v3720_v20 }
 0x194   :  { %3032 = vmatmul.mubr.msk.f32.gmra.mrb[78].mxu0 %vm207_vm2, %v162_v24  ;;  %v3288_v24 = vpack.c.bf16 %v1795_v22, %v1794_v21 }
 0x195   :  { %3034 = vmatprep.mubr.msk.f32.mxu0 %vm3721_vm1, %v3720_v20 }
 0x198   :  { %3035 = vmatmul.mubr.msk.f32.gmra.mrb[80].mxu0 %vm207_vm2, %v165_v25 }
 0x199   :  { %2148 = vmatprep.mubr.f32.mxu0 %v3806_v12 }
 0x1cb   :  { %v671_v31 = vpop.f32.mrb[0].mxu0 }
 0x1cc   :  { %v2916_v12 = vpop.f32.mrb[1].mxu0  ;;  %2712 = vmatmul.mubr.msk.f32.vlgmr.msra.gmra.mrb[0].mxu1 %vm903_vm3, %v671_v31 }
 0x1cd   :  { %1097 = vmatprep.mubr.f32.mxu1 %v3720_v20  ;;  %3256 = vmatpush1.bf16.msra.mxu1 %v3255_v28 }
 0x1ce   :  { %3257 = vmatprep.subr.bf16.mxu1 %v3719_v0 }
 0x1cf   :  { %v676_v35 = vpop.f32.mrb[2].mxu0 }
 0x1d0   :  { %v2919_v36 = vpop.f32.mrb[3].mxu0  ;;  %2713 = vmatmul.mubr.msk.f32.gmra.mrb[2].mxu1 %vm903_vm3, %v676_v35 }
 0x1d1   :  { %1103 = vmatprep.mubr.f32.mxu1 %v3720_v20  ;;  %3259 = vmatpush1.bf16.msra.mxu1 %v3258_v32 }
 0x1d2   :  { %3260 = vmatprep.subr.bf16.mxu1 %v3719_v0 }
 0x1d3   :  { %v681_v40 = vpop.f32.mrb[4].mxu0 }
 0x1d4   :  { %v2922_v41 = vpop.f32.mrb[5].mxu0  ;;  %2714 = vmatmul.mubr.msk.f32.gmra.mrb[4].mxu1 %vm903_vm3, %v681_v40 }
 0x1d5   :  { %1109 = vmatprep.mubr.f32.mxu1 %v3720_v20  ;;  %3262 = vmatpush1.bf16.msra.mxu1 %v3261_v37 }
 0x1d6   :  { %3263 = vmatprep.subr.bf16.mxu1 %v3719_v0 }
 0x1d7   :  { %v686_v45 = vpop.f32.mrb[6].mxu0 }
 0x1d8   :  { %v2925_v46 = vpop.f32.mrb[7].mxu0  ;;  %2715 = vmatmul.mubr.msk.f32.gmra.mrb[6].mxu1 %vm903_vm3, %v686_v45  ;;  %v1799_v45 = vld [vmem:[%s4896_s6 + $0xd8] sm:$0xff] }
 0x1d9   :  { %1115 = vmatprep.mubr.f32.mxu1 %v3720_v20  ;;  %3265 = vmatpush1.bf16.msra.mxu1 %v3264_v42  ;;  %v3294_v46 = vpack.c.bf16 %v1799_v45, %v1798_v44 }
 0x1da   :  { %3266 = vmatprep.subr.bf16.mxu1 %v3719_v0 }
 0x1db   :  { %v691_v50 = vpop.f32.mrb[8].mxu0 }
 0x1dc   :  { %v2928_v51 = vpop.f32.mrb[9].mxu0  ;;  %2716 = vmatmul.mubr.msk.f32.gmra.mrb[8].mxu1 %vm903_vm3, %v691_v50  ;;  %v1801_v50 = vld [vmem:[%s4896_s6 + $0xe8] sm:$0xff] }
 0x1dd   :  { %1121 = vmatprep.mubr.f32.mxu1 %v3720_v20  ;;  %3268 = vmatpush1.bf16.msra.mxu1 %v3267_v47  ;;  %v3297_v51 = vpack.c.bf16 %v1801_v50, %v1800_v49 }
 0x1de   :  { %3269 = vmatprep.subr.bf16.mxu1 %v3719_v0 }
 0x1df   :  { %v696_v53 = vpop.f32.mrb[10].mxu0 }
 0x1e0   :  { %v2931_v54 = vpop.f32.mrb[11].mxu0  ;;  %2717 = vmatmul.mubr.msk.f32.gmra.mrb[10].mxu1 %vm903_vm3, %v696_v53 }
 0x1e1   :  { %1127 = vmatprep.mubr.f32.mxu1 %v3720_v20  ;;  %3271 = vmatpush1.bf16.msra.mxu1 %v3270_v52  ;;  %v1802_v54 = vld [vmem:[%s4896_s6 + $0xf0] sm:$0xff] }
 0x1e2   :  { %3272 = vmatprep.subr.bf16.mxu1 %v3719_v0 }
 0x1e3   :  { %v701_v55 = vpop.f32.mrb[12].mxu0 }
 0x1e4   :  { %v2934_v56 = vpop.f32.mrb[13].mxu0  ;;  %2718 = vmatmul.mubr.msk.f32.gmra.mrb[12].mxu1 %vm903_vm3, %v701_v55  ;;  %v1803_v55 = vld [vmem:[%s4896_s6 + $0xf8] sm:$0xff] }
 0x1e5   :  { %1133 = vmatprep.mubr.f32.mxu1 %v3720_v20  ;;  %3274 = vmatpush1.bf16.msra.mxu1 %v3273_v59  ;;  %v3300_v56 = vpack.c.bf16 %v1803_v55, %v1802_v54 }
 0x1e6   :  { %3275 = vmatprep.subr.bf16.mxu1 %v3719_v0 }
 0x1e7   :  { %v706_v60 = vpop.f32.mrb[14].mxu0 }
 0x1e8   :  { %v2937_v61 = vpop.f32.mrb[15].mxu0  ;;  %2719 = vmatmul.mubr.msk.f32.gmra.mrb[14].mxu1 %vm903_vm3, %v706_v60 }
 0x1e9   :  { %1139 = vmatprep.mubr.f32.mxu1 %v3720_v20  ;;  %3277 = vmatpush1.bf16.msra.mxu1 %v3276_v4 }
 0x1ea   :  { %3278 = vmatprep.subr.bf16.mxu1 %v3719_v0 }
 0x1eb   :  { %v711_v62 = vpop.f32.mrb[16].mxu0 }
 0x1ec   :  { %v2940_v63 = vpop.f32.mrb[17].mxu0  ;;  %2720 = vmatmul.mubr.msk.f32.gmra.mrb[16].mxu1 %vm903_vm3, %v711_v62 }
 0x1ed   :  { %1145 = vmatprep.mubr.f32.mxu1 %v3720_v20  ;;  %3280 = vmatpush1.bf16.msra.mxu1 %v3279_v7 }
 0x1ee   :  { %3281 = vmatprep.subr.bf16.mxu1 %v3719_v0 }
 0x1ef   :  { %v716_v6 = vpop.f32.mrb[18].mxu0 }
 0x1f0   :  { %v2943_v8 = vpop.f32.mrb[19].mxu0  ;;  %2721 = vmatmul.mubr.msk.f32.gmra.mrb[18].mxu1 %vm903_vm3, %v716_v6 }
 0x1f1   :  { %1151 = vmatprep.mubr.f32.mxu1 %v3720_v20  ;;  %3283 = vmatpush1.bf16.msra.mxu1 %v3282_v13 }
 0x1f2   :  { %3284 = vmatprep.subr.bf16.mxu1 %v3719_v0 }
 0x1f3   :  { %v721_v11 = vpop.f32.mrb[20].mxu0 }
 0x1f4   :  { %v2946_v14 = vpop.f32.mrb[21].mxu0  ;;  %2722 = vmatmul.mubr.msk.f32.gmra.mrb[20].mxu1 %vm903_vm3, %v721_v11 }
 0x1f5   :  { %1157 = vmatprep.mubr.f32.mxu1 %v3720_v20  ;;  %3286 = vmatpush1.bf16.msra.mxu1 %v3285_v18 }
 0x1f6   :  { %3287 = vmatprep.subr.bf16.mxu1 %v3719_v0 }
 0x1f7   :  { %v726_v17 = vpop.f32.mrb[22].mxu0 }
 0x1f8   :  { %v2949_v19 = vpop.f32.mrb[23].mxu0  ;;  %2723 = vmatmul.mubr.msk.f32.gmra.mrb[22].mxu1 %vm903_vm3, %v726_v17 }
 0x1f9   :  { %1163 = vmatprep.mubr.f32.mxu1 %v3720_v20  ;;  %3289 = vmatpush1.bf16.msra.mxu1 %v3288_v24 }
 0x1fa   :  { %3290 = vmatprep.subr.bf16.mxu1 %v3719_v0 }
 0x1fb   :  { %v731_v23 = vpop.f32.mrb[24].mxu0 }
 0x1fc   :  { %v2952_v25 = vpop.f32.mrb[25].mxu0  ;;  %2724 = vmatmul.mubr.msk.f32.gmra.mrb[24].mxu1 %vm903_vm3, %v731_v23 }
 0x1fd   :  { %1169 = vmatprep.mubr.f32.mxu1 %v3720_v20  ;;  %3292 = vmatpush1.bf16.msra.mxu1 %v3291_v29 }
 0x1fe   :  { %3293 = vmatprep.subr.bf16.mxu1 %v3719_v0 }
 0x1ff   :  { %v736_v28 = vpop.f32.mrb[26].mxu0 }
 0x200   :  { %v2955_v30 = vpop.f32.mrb[27].mxu0  ;;  %2725 = vmatmul.mubr.msk.f32.gmra.mrb[26].mxu1 %vm903_vm3, %v736_v28 }
 0x201   :  { %1175 = vmatprep.mubr.f32.mxu1 %v3720_v20  ;;  %3295 = vmatpush1.bf16.msra.mxu1 %v3294_v46 }
 0x202   :  { %3296 = vmatprep.subr.bf16.mxu1 %v3719_v0 }
 0x203   :  { %v741_v31 = vpop.f32.mrb[28].mxu0 }
 0x204   :  { %v2958_v12 = vpop.f32.mrb[29].mxu0  ;;  %2726 = vmatmul.mubr.msk.f32.gmra.mrb[28].mxu1 %vm903_vm3, %v741_v31 }
 0x205   :  { %1181 = vmatprep.mubr.f32.mxu1 %v3720_v20  ;;  %3298 = vmatpush1.bf16.msra.mxu1 %v3297_v51  ;;  %v893_v12 = vlaneseq }
 0x206   :  { %3299 = vmatprep.subr.bf16.mxu1 %v3719_v0 }
 0x207   :  { %v746_v32 = vpop.f32.mrb[30].mxu0 }
 0x208   :  { %v2961_v33 = vpop.f32.mrb[31].mxu0  ;;  %2727 = vmatmul.mubr.msk.f32.gmra.mrb[30].mxu1 %vm903_vm3, %v746_v32  ;;  %v894_v32 = vshrl.u32 %v893_v12, 7 }
 0x209   :  { %1187 = vmatprep.mubr.f32.mxu1 %v3720_v20  ;;  %3301 = vmatpush1.bf16.msra.mxu1 %v3300_v56 }
 0x20a   :  { %3362 = vmatprep.subr.bf16.mxu1 %v3719_v0  ;;  %v895_v33 = vsub.s32 0, %v894_v32 }
 0x20b   :  { %v751_v34 = vpop.f32.mrb[32].mxu0 }
 0x20c   :  { %v2964_v35 = vpop.f32.mrb[33].mxu0  ;;  %2728 = vmatmul.mubr.msk.f32.gmra.mrb[32].mxu1 %vm903_vm3, %v751_v34  ;;  %v891_v34 = vld [vmem:[%s4893_s3] sm:$0x3] }
 0x20d   :  { %1193 = vmatprep.mubr.f32.mxu1 %v3720_v20  ;;  %v899_v35 = vsub.s32 1, %v894_v32 }
 0x20f   :  { %v756_v36 = vpop.f32.mrb[34].mxu0 }
 0x210   :  { %v2967_v37 = vpop.f32.mrb[35].mxu0  ;;  %2729 = vmatmul.mubr.msk.f32.gmra.mrb[34].mxu1 %vm903_vm3, %v756_v36  ;;  %v4298_v36 = vrot.slane %v891_v34, %v895_v33 }
 0x211   :  { %1199 = vmatprep.mubr.f32.mxu1 %v3720_v20  ;;  %v4300_v37 = vrot.slane %v891_v34, %v899_v35 }
 0x213   :  { %v761_v38 = vpop.f32.mrb[36].mxu0 }
 0x214   :  { %v2970_v39 = vpop.f32.mrb[37].mxu0  ;;  %2730 = vmatmul.mubr.msk.f32.gmra.mrb[36].mxu1 %vm903_vm3, %v761_v38  ;;  %v1584_v38 = vld [vmem:[%s4894_s4] sm:$0x3] }
 0x215   :  { %1205 = vmatprep.mubr.f32.mxu1 %v3720_v20  ;;  %v4312_v46 = vrot.slane %v1584_v38, %v899_v35 }
 0x217   :  { %v766_v40 = vpop.f32.mrb[38].mxu0 }
 0x218   :  { %v2973_v41 = vpop.f32.mrb[39].mxu0  ;;  %2731 = vmatmul.mubr.msk.f32.gmra.mrb[38].mxu1 %vm903_vm3, %v766_v40 }
 0x219   :  { %1211 = vmatprep.mubr.f32.mxu1 %v3720_v20 }
 0x21b   :  { %v771_v42 = vpop.f32.mrb[40].mxu0 }
 0x21c   :  { %v2976_v43 = vpop.f32.mrb[41].mxu0  ;;  %2732 = vmatmul.mubr.msk.f32.gmra.mrb[40].mxu1 %vm903_vm3, %v771_v42  ;;  %v4306_v42 = vrot.slane %v1584_v38, %v895_v33 }
 0x21d   :  { %1217 = vmatprep.mubr.f32.mxu1 %v3720_v20  ;;  %v1678_v43 = vld [vmem:[%s4895_s5] sm:$0x3] }
 0x21e   :  { %v4318_v54 = vrot.slane %v1678_v43, %v895_v33 }
 0x21f   :  { %v776_v47 = vpop.f32.mrb[42].mxu0 }
 0x220   :  { %v2979_v48 = vpop.f32.mrb[43].mxu0  ;;  %2733 = vmatmul.mubr.msk.f32.gmra.mrb[42].mxu1 %vm903_vm3, %v776_v47 }
 0x221   :  { %1223 = vmatprep.mubr.f32.mxu1 %v3720_v20 }
 0x223   :  { %v781_v52 = vpop.f32.mrb[44].mxu0 }
 0x224   :  { %v2982_v53 = vpop.f32.mrb[45].mxu0  ;;  %2734 = vmatmul.mubr.msk.f32.gmra.mrb[44].mxu1 %vm903_vm3, %v781_v52  ;;  %v4315_v52 = vrot.slane %v1678_v43, %v899_v35 }
 0x225   :  { %1229 = vmatprep.mubr.f32.mxu1 %v3720_v20 }
 0x227   :  { %v786_v57 = vpop.f32.mrb[46].mxu0 }
 0x228   :  { %v2985_v58 = vpop.f32.mrb[47].mxu0  ;;  %2735 = vmatmul.mubr.msk.f32.gmra.mrb[46].mxu1 %vm903_vm3, %v786_v57 }
 0x229   :  { %1235 = vmatprep.mubr.f32.mxu1 %v3720_v20 }
 0x22b   :  { %v791_v59 = vpop.f32.mrb[48].mxu0 }
 0x22c   :  { %v2988_v60 = vpop.f32.mrb[49].mxu0  ;;  %2736 = vmatmul.mubr.msk.f32.gmra.mrb[48].mxu1 %vm903_vm3, %v791_v59 }
 0x22d   :  { %1241 = vmatprep.mubr.f32.mxu1 %v3720_v20 }
 0x22f   :  { %v796_v61 = vpop.f32.mrb[50].mxu0 }
 0x230   :  { %v2991_v62 = vpop.f32.mrb[51].mxu0  ;;  %2737 = vmatmul.mubr.msk.f32.gmra.mrb[50].mxu1 %vm903_vm3, %v796_v61 }
 0x231   :  { %1247 = vmatprep.mubr.f32.mxu1 %v3720_v20 }
 0x233   :  { %v801_v63 = vpop.f32.mrb[52].mxu0 }
 0x234   :  { %v2994_v1 = vpop.f32.mrb[53].mxu0  ;;  %2738 = vmatmul.mubr.msk.f32.gmra.mrb[52].mxu1 %vm903_vm3, %v801_v63 }
 0x235   :  { %1253 = vmatprep.mubr.f32.mxu1 %v3720_v20 }
 0x237   :  { %v806_v2 = vpop.f32.mrb[54].mxu0 }
 0x238   :  { %v2997_v3 = vpop.f32.mrb[55].mxu0  ;;  %2739 = vmatmul.mubr.msk.f32.gmra.mrb[54].mxu1 %vm903_vm3, %v806_v2 }
 0x239   :  { %1259 = vmatprep.mubr.f32.mxu1 %v3720_v20 }
 0x23b   :  { %v811_v4 = vpop.f32.mrb[56].mxu0 }
 0x23c   :  { %v3000_v5 = vpop.f32.mrb[57].mxu0  ;;  %2740 = vmatmul.mubr.msk.f32.gmra.mrb[56].mxu1 %vm903_vm3, %v811_v4 }
 0x23d   :  { %1265 = vmatprep.mubr.f32.mxu1 %v3720_v20 }
 0x23f   :  { %v816_v6 = vpop.f32.mrb[58].mxu0 }
 0x240   :  { %v3003_v7 = vpop.f32.mrb[59].mxu0  ;;  %2741 = vmatmul.mubr.msk.f32.gmra.mrb[58].mxu1 %vm903_vm3, %v816_v6 }
 0x241   :  { %1271 = vmatprep.mubr.f32.mxu1 %v3720_v20 }
 0x243   :  { %v821_v8 = vpop.f32.mrb[60].mxu0 }
 0x244   :  { %v3006_v9 = vpop.f32.mrb[61].mxu0  ;;  %2742 = vmatmul.mubr.msk.f32.gmra.mrb[60].mxu1 %vm903_vm3, %v821_v8 }
 0x245   :  { %1277 = vmatprep.mubr.f32.mxu1 %v3720_v20 }
 0x247   :  { %v826_v10 = vpop.f32.mrb[62].mxu0 }
 0x248   :  { %v3009_v11 = vpop.f32.mrb[63].mxu0  ;;  %2743 = vmatmul.mubr.msk.f32.gmra.mrb[62].mxu1 %vm903_vm3, %v826_v10 }
 0x249   :  { %1283 = vmatprep.mubr.f32.mxu1 %v3720_v20 }
 0x24b   :  { %v831_v13 = vpop.f32.mrb[64].mxu0 }
 0x24c   :  { %v3012_v14 = vpop.f32.mrb[65].mxu0  ;;  %2744 = vmatmul.mubr.msk.f32.gmra.mrb[64].mxu1 %vm903_vm3, %v831_v13 }
 0x24d   :  { %1289 = vmatprep.mubr.f32.mxu1 %v3720_v20 }
 0x24f   :  { %v836_v15 = vpop.f32.mrb[66].mxu0 }
 0x250   :  { %v3015_v16 = vpop.f32.mrb[67].mxu0  ;;  %2745 = vmatmul.mubr.msk.f32.gmra.mrb[66].mxu1 %vm903_vm3, %v836_v15 }
 0x251   :  { %1295 = vmatprep.mubr.f32.mxu1 %v3720_v20 }
 0x253   :  { %v841_v17 = vpop.f32.mrb[68].mxu0 }
 0x254   :  { %v3018_v18 = vpop.f32.mrb[69].mxu0  ;;  %2746 = vmatmul.mubr.msk.f32.gmra.mrb[68].mxu1 %vm903_vm3, %v841_v17 }
 0x255   :  { %1301 = vmatprep.mubr.f32.mxu1 %v3720_v20 }
 0x257   :  { %v846_v19 = vpop.f32.mrb[70].mxu0 }
 0x258   :  { %v3021_v21 = vpop.f32.mrb[71].mxu0  ;;  %2747 = vmatmul.mubr.msk.f32.gmra.mrb[70].mxu1 %vm903_vm3, %v846_v19 }
 0x259   :  { %1307 = vmatprep.mubr.f32.mxu1 %v3720_v20 }
 0x25b   :  { %v851_v22 = vpop.f32.mrb[72].mxu0 }
 0x25c   :  { %v3024_v23 = vpop.f32.mrb[73].mxu0  ;;  %2748 = vmatmul.mubr.msk.f32.gmra.mrb[72].mxu1 %vm903_vm3, %v851_v22 }
 0x25d   :  { %1313 = vmatprep.mubr.f32.mxu1 %v3720_v20 }
 0x25f   :  { %v856_v24 = vpop.f32.mrb[74].mxu0 }
 0x260   :  { %v3027_v25 = vpop.f32.mrb[75].mxu0  ;;  %2749 = vmatmul.mubr.msk.f32.gmra.mrb[74].mxu1 %vm903_vm3, %v856_v24 }
 0x261   :  { %1319 = vmatprep.mubr.f32.mxu1 %v3720_v20 }
 0x263   :  { %v861_v26 = vpop.f32.mrb[76].mxu0 }
 0x264   :  { %v3030_v27 = vpop.f32.mrb[77].mxu0  ;;  %2750 = vmatmul.mubr.msk.f32.gmra.mrb[76].mxu1 %vm903_vm3, %v861_v26 }
 0x265   :  { %1325 = vmatprep.mubr.f32.mxu1 %v3720_v20 }
 0x267   :  { %v866_v28 = vpop.f32.mrb[78].mxu0 }
 0x268   :  { %v3033_v29 = vpop.f32.mrb[79].mxu0  ;;  %2751 = vmatmul.mubr.msk.f32.gmra.mrb[78].mxu1 %vm903_vm3, %v866_v28 }
 0x269   :  { %1331 = vmatprep.mubr.f32.mxu1 %v3720_v20 }
 0x26b   :  { %v871_v30 = vpop.f32.mrb[80].mxu0 }
 0x26c   :  { %v3036_v31 = vpop.f32.mrb[81].mxu0  ;;  %2752 = vmatmul.mubr.msk.f32.gmra.mrb[80].mxu1 %vm903_vm3, %v871_v30 }
 0x29f   :  { %v1093_v39 = vpop.f32.mrb[0].mxu1 }
 0x2a0   :  { %v1094_v40 = vadd.f32 %v1093_v39, %v4298_v36  ;;  %v1095_v41 = vpop.f32.mrb[1].mxu1 }
 0x2a1   :  { %v1096_v44 = vadd.f32 %v1095_v41, %v4300_v37 }
 0x2a2   :  { %vm1338_vm4 = vcmp.gt.f32.partialorder %v1094_v40, 0.0  ;;  %v1420_v45 = vmul.f32 0.01, %v1094_v40 }
 0x2a3   :  { %vm1339_vm5 = vcmp.gt.f32.partialorder %v1096_v44, 0.0  ;;  %v1421_v47 = vmul.f32 0.01, %v1096_v44  ;;  %v1099_v48 = vpop.f32.mrb[2].mxu1 }
 0x2a4   :  { %v1502_v49 = vsel %vm1338_vm4, %v1094_v40, %v1420_v45  ;;  %v1100_v50 = vadd.f32 %v1099_v48, %v4298_v36  ;;  %v1101_v51 = vpop.f32.mrb[3].mxu1 }
 0x2a5   :  { %v1596_v53 = vmul.f32 %v4306_v42, %v1502_v49  ;;  %v1503_v55 = vsel %vm1339_vm5, %v1096_v44, %v1421_v47  ;;  %v1102_v56 = vadd.f32 %v1101_v51, %v4300_v37 }
 0x2a6   :  { %vm1340_vm6 = vcmp.gt.f32.partialorder %v1100_v50, 0.0  ;;  %v1422_v57 = vmul.f32 0.01, %v1100_v50  ;;  %v1597_v58 = vmul.f32 %v4312_v46, %v1503_v55 }
 0x2a7   :  { %vm1341_vm7 = vcmp.gt.f32.partialorder %v1102_v56, 0.0  ;;  %v1423_v59 = vmul.f32 0.01, %v1102_v56  ;;  %v1105_v60 = vpop.f32.mrb[4].mxu1  ;;  %v1690_v2 = vadd.f32 %v4318_v54, %v1596_v53 }
 0x2a8   :  { %v1504_v61 = vsel %vm1340_vm6, %v1100_v50, %v1422_v57  ;;  %v1106_v62 = vadd.f32 %v1105_v60, %v4298_v36  ;;  %v1107_v63 = vpop.f32.mrb[5].mxu1  ;;  %v1691_v1 = vadd.f32 %v4315_v52, %v1597_v58 }
 0x2a9   :  { %v1505_v3 = vsel %vm1341_vm7, %v1102_v56, %v1423_v59  ;;  %v1108_v4 = vadd.f32 %v1107_v63, %v4300_v37  ;;  %v1598_v5 = vmul.f32 %v4306_v42, %v1504_v61 }
 0x2aa   :  { %vm1342_vm8 = vcmp.gt.f32.partialorder %v1106_v62, 0.0  ;;  %v1424_v6 = vmul.f32 0.01, %v1106_v62  ;;  %1868 = vmatprep.mubr.f32.mxu1 %v1691_v1  ;;  %v1599_v7 = vmul.f32 %v4312_v46, %v1505_v3 }
 0x2ab   :  { %vm1343_vm9 = vcmp.gt.f32.partialorder %v1108_v4, 0.0  ;;  %v1425_v8 = vmul.f32 0.01, %v1108_v4  ;;  %v1111_v9 = vpop.f32.mrb[6].mxu1  ;;  %1869 = vmatmul.mubr.f32.vlgmr.msra.gmra.mrb[82].mxu1 %v1690_v2  ;;  %v1692_v17 = vadd.f32 %v4318_v54, %v1598_v5 }
 0x2ac   :  { %v1506_v10 = vsel %vm1342_vm8, %v1106_v62, %v1424_v6  ;;  %v1112_v11 = vadd.f32 %v1111_v9, %v4298_v36  ;;  %v1113_v13 = vpop.f32.mrb[7].mxu1  ;;  %v1693_v14 = vadd.f32 %v4315_v52, %v1599_v7 }
 0x2ad   :  { %v1507_v15 = vsel %vm1343_vm9, %v1108_v4, %v1425_v8  ;;  %v1114_v16 = vadd.f32 %v1113_v13, %v4300_v37  ;;  %v1600_v18 = vmul.f32 %v4306_v42, %v1506_v10 }
 0x2ae   :  { %vm1344_vm10 = vcmp.gt.f32.partialorder %v1112_v11, 0.0  ;;  %v1426_v19 = vmul.f32 0.01, %v1112_v11  ;;  %1873 = vmatprep.mubr.f32.mxu1 %v1693_v14  ;;  %v1601_v21 = vmul.f32 %v4312_v46, %v1507_v15 }
 0x2af   :  { %vm1345_vm11 = vcmp.gt.f32.partialorder %v1114_v16, 0.0  ;;  %v1427_v22 = vmul.f32 0.01, %v1114_v16  ;;  %v1117_v23 = vpop.f32.mrb[8].mxu1  ;;  %1874 = vmatmul.mubr.f32.gmra.mrb[84].mxu1 %v1692_v17  ;;  %v1694_v30 = vadd.f32 %v4318_v54, %v1600_v18 }
 0x2b0   :  { %v1508_v24 = vsel %vm1344_vm10, %v1112_v11, %v1426_v19  ;;  %v1118_v25 = vadd.f32 %v1117_v23, %v4298_v36  ;;  %v1119_v26 = vpop.f32.mrb[9].mxu1  ;;  %v1695_v27 = vadd.f32 %v4315_v52, %v1601_v21 }
 0x2b1   :  { %v1509_v28 = vsel %vm1345_vm11, %v1114_v16, %v1427_v22  ;;  %v1120_v29 = vadd.f32 %v1119_v26, %v4300_v37  ;;  %v1602_v31 = vmul.f32 %v4306_v42, %v1508_v24 }
 0x2b2   :  { %vm1346_vm12 = vcmp.gt.f32.partialorder %v1118_v25, 0.0  ;;  %v1428_v12 = vmul.f32 0.01, %v1118_v25  ;;  %1878 = vmatprep.mubr.f32.mxu1 %v1695_v27  ;;  %v1603_v32 = vmul.f32 %v4312_v46, %v1509_v28 }
 0x2b3   :  { %vm1347_vm13 = vcmp.gt.f32.partialorder %v1120_v29, 0.0  ;;  %v1429_v33 = vmul.f32 0.01, %v1120_v29  ;;  %v1123_v34 = vpop.f32.mrb[10].mxu1  ;;  %1879 = vmatmul.mubr.f32.gmra.mrb[86].mxu1 %v1694_v30  ;;  %v1696_v44 = vadd.f32 %v4318_v54, %v1602_v31 }
 0x2b4   :  { %v1510_v35 = vsel %vm1346_vm12, %v1118_v25, %v1428_v12  ;;  %v1124_v38 = vadd.f32 %v1123_v34, %v4298_v36  ;;  %v1125_v39 = vpop.f32.mrb[11].mxu1  ;;  %v1697_v40 = vadd.f32 %v4315_v52, %v1603_v32 }
 0x2b5   :  { %v1511_v41 = vsel %vm1347_vm13, %v1120_v29, %v1429_v33  ;;  %v1126_v43 = vadd.f32 %v1125_v39, %v4300_v37  ;;  %v1604_v45 = vmul.f32 %v4306_v42, %v1510_v35 }
 0x2b6   :  { %vm1348_vm14 = vcmp.gt.f32.partialorder %v1124_v38, 0.0  ;;  %v1430_v47 = vmul.f32 0.01, %v1124_v38  ;;  %1883 = vmatprep.mubr.f32.mxu1 %v1697_v40  ;;  %v1605_v48 = vmul.f32 %v4312_v46, %v1511_v41 }
 0x2b7   :  { %vm1349_vm15 = vcmp.gt.f32.partialorder %v1126_v43, 0.0  ;;  %v1431_v49 = vmul.f32 0.01, %v1126_v43  ;;  %v1129_v50 = vpop.f32.mrb[12].mxu1  ;;  %1884 = vmatmul.mubr.f32.gmra.mrb[88].mxu1 %v1696_v44  ;;  %v1698_v59 = vadd.f32 %v4318_v54, %v1604_v45 }
 0x2b8   :  { %v1512_v51 = vsel %vm1348_vm14, %v1124_v38, %v1430_v47  ;;  %v1130_v53 = vadd.f32 %v1129_v50, %v4298_v36  ;;  %v1131_v55 = vpop.f32.mrb[13].mxu1  ;;  %v1699_v56 = vadd.f32 %v4315_v52, %v1605_v48 }
 0x2b9   :  { %v1513_v57 = vsel %vm1349_vm15, %v1126_v43, %v1431_v49  ;;  %v1132_v58 = vadd.f32 %v1131_v55, %v4300_v37  ;;  %v1606_v60 = vmul.f32 %v4306_v42, %v1512_v51 }
 0x2ba   :  { %vm1350_vm3 = vcmp.gt.f32.partialorder %v1130_v53, 0.0  ;;  %v1432_v61 = vmul.f32 0.01, %v1130_v53  ;;  %1888 = vmatprep.mubr.f32.mxu1 %v1699_v56  ;;  %v1607_v62 = vmul.f32 %v4312_v46, %v1513_v57 }
 0x2bb   :  { %vm1351_vm4 = vcmp.gt.f32.partialorder %v1132_v58, 0.0  ;;  %v1433_v63 = vmul.f32 0.01, %v1132_v58  ;;  %v1135_v1 = vpop.f32.mrb[14].mxu1  ;;  %1889 = vmatmul.mubr.f32.gmra.mrb[90].mxu1 %v1698_v59  ;;  %v1700_v8 = vadd.f32 %v4318_v54, %v1606_v60 }
 0x2bc   :  { %v1514_v2 = vsel %vm1350_vm3, %v1130_v53, %v1432_v61  ;;  %v1136_v3 = vadd.f32 %v1135_v1, %v4298_v36  ;;  %v1137_v4 = vpop.f32.mrb[15].mxu1  ;;  %v1701_v5 = vadd.f32 %v4315_v52, %v1607_v62 }
 0x2bd   :  { %v1515_v6 = vsel %vm1351_vm4, %v1132_v58, %v1433_v63  ;;  %v1138_v7 = vadd.f32 %v1137_v4, %v4300_v37  ;;  %v1608_v9 = vmul.f32 %v4306_v42, %v1514_v2 }
 0x2be   :  { %vm1352_vm5 = vcmp.gt.f32.partialorder %v1136_v3, 0.0  ;;  %v1434_v10 = vmul.f32 0.01, %v1136_v3  ;;  %1893 = vmatprep.mubr.f32.mxu1 %v1701_v5  ;;  %v1609_v11 = vmul.f32 %v4312_v46, %v1515_v6 }
 0x2bf   :  { %vm1353_vm6 = vcmp.gt.f32.partialorder %v1138_v7, 0.0  ;;  %v1435_v13 = vmul.f32 0.01, %v1138_v7  ;;  %v1141_v14 = vpop.f32.mrb[16].mxu1  ;;  %1894 = vmatmul.mubr.f32.gmra.mrb[92].mxu1 %v1700_v8  ;;  %v1702_v22 = vadd.f32 %v4318_v54, %v1608_v9 }
 0x2c0   :  { %v1516_v15 = vsel %vm1352_vm5, %v1136_v3, %v1434_v10  ;;  %v1142_v16 = vadd.f32 %v1141_v14, %v4298_v36  ;;  %v1143_v17 = vpop.f32.mrb[17].mxu1  ;;  %v1703_v18 = vadd.f32 %v4315_v52, %v1609_v11 }
 0x2c1   :  { %v1517_v19 = vsel %vm1353_vm6, %v1138_v7, %v1435_v13  ;;  %v1144_v21 = vadd.f32 %v1143_v17, %v4300_v37  ;;  %v1610_v23 = vmul.f32 %v4306_v42, %v1516_v15 }
 0x2c2   :  { %vm1354_vm7 = vcmp.gt.f32.partialorder %v1142_v16, 0.0  ;;  %v1436_v24 = vmul.f32 0.01, %v1142_v16  ;;  %1898 = vmatprep.mubr.f32.mxu1 %v1703_v18  ;;  %v1611_v25 = vmul.f32 %v4312_v46, %v1517_v19 }
 0x2c3   :  { %vm1355_vm8 = vcmp.gt.f32.partialorder %v1144_v21, 0.0  ;;  %v1437_v26 = vmul.f32 0.01, %v1144_v21  ;;  %v1147_v27 = vpop.f32.mrb[18].mxu1  ;;  %1899 = vmatmul.mubr.f32.gmra.mrb[94].mxu1 %v1702_v22  ;;  %v1704_v33 = vadd.f32 %v4318_v54, %v1610_v23 }
 0x2c4   :  { %v1518_v28 = vsel %vm1354_vm7, %v1142_v16, %v1436_v24  ;;  %v1148_v29 = vadd.f32 %v1147_v27, %v4298_v36  ;;  %v1149_v30 = vpop.f32.mrb[19].mxu1  ;;  %v1705_v31 = vadd.f32 %v4315_v52, %v1611_v25 }
 0x2c5   :  { %v1519_v12 = vsel %vm1355_vm8, %v1144_v21, %v1437_v26  ;;  %v1150_v32 = vadd.f32 %v1149_v30, %v4300_v37  ;;  %v1612_v34 = vmul.f32 %v4306_v42, %v1518_v28 }
 0x2c6   :  { %vm1356_vm9 = vcmp.gt.f32.partialorder %v1148_v29, 0.0  ;;  %v1438_v35 = vmul.f32 0.01, %v1148_v29  ;;  %1903 = vmatprep.mubr.f32.mxu1 %v1705_v31  ;;  %v1613_v38 = vmul.f32 %v4312_v46, %v1519_v12 }
 0x2c7   :  { %vm1357_vm10 = vcmp.gt.f32.partialorder %v1150_v32, 0.0  ;;  %v1439_v39 = vmul.f32 0.01, %v1150_v32  ;;  %v1153_v40 = vpop.f32.mrb[20].mxu1  ;;  %1904 = vmatmul.mubr.f32.gmra.mrb[96].mxu1 %v1704_v33  ;;  %v1706_v49 = vadd.f32 %v4318_v54, %v1612_v34 }
 0x2c8   :  { %v1520_v41 = vsel %vm1356_vm9, %v1148_v29, %v1438_v35  ;;  %v1154_v43 = vadd.f32 %v1153_v40, %v4298_v36  ;;  %v1155_v44 = vpop.f32.mrb[21].mxu1  ;;  %v1707_v45 = vadd.f32 %v4315_v52, %v1613_v38 }
 0x2c9   :  { %v1521_v47 = vsel %vm1357_vm10, %v1150_v32, %v1439_v39  ;;  %v1156_v48 = vadd.f32 %v1155_v44, %v4300_v37  ;;  %v1614_v50 = vmul.f32 %v4306_v42, %v1520_v41 }
 0x2ca   :  { %vm1358_vm11 = vcmp.gt.f32.partialorder %v1154_v43, 0.0  ;;  %v1440_v51 = vmul.f32 0.01, %v1154_v43  ;;  %1908 = vmatprep.mubr.f32.mxu1 %v1707_v45  ;;  %v1615_v53 = vmul.f32 %v4312_v46, %v1521_v47 }
 0x2cb   :  { %vm1359_vm12 = vcmp.gt.f32.partialorder %v1156_v48, 0.0  ;;  %v1441_v55 = vmul.f32 0.01, %v1156_v48  ;;  %v1159_v56 = vpop.f32.mrb[22].mxu1  ;;  %1909 = vmatmul.mubr.f32.gmra.mrb[98].mxu1 %v1706_v49  ;;  %v1708_v63 = vadd.f32 %v4318_v54, %v1614_v50 }
 0x2cc   :  { %v1522_v57 = vsel %vm1358_vm11, %v1154_v43, %v1440_v51  ;;  %v1160_v58 = vadd.f32 %v1159_v56, %v4298_v36  ;;  %v1161_v59 = vpop.f32.mrb[23].mxu1  ;;  %v1709_v60 = vadd.f32 %v4315_v52, %v1615_v53 }
 0x2cd   :  { %v1523_v61 = vsel %vm1359_vm12, %v1156_v48, %v1441_v55  ;;  %v1162_v62 = vadd.f32 %v1161_v59, %v4300_v37  ;;  %v1616_v1 = vmul.f32 %v4306_v42, %v1522_v57 }
 0x2ce   :  { %vm1360_vm13 = vcmp.gt.f32.partialorder %v1160_v58, 0.0  ;;  %v1442_v2 = vmul.f32 0.01, %v1160_v58  ;;  %1913 = vmatprep.mubr.f32.mxu1 %v1709_v60  ;;  %v1617_v3 = vmul.f32 %v4312_v46, %v1523_v61 }
 0x2cf   :  { %vm1361_vm14 = vcmp.gt.f32.partialorder %v1162_v62, 0.0  ;;  %v1443_v4 = vmul.f32 0.01, %v1162_v62  ;;  %v1165_v5 = vpop.f32.mrb[24].mxu1  ;;  %1914 = vmatmul.mubr.f32.gmra.mrb[100].mxu1 %v1708_v63  ;;  %v1710_v13 = vadd.f32 %v4318_v54, %v1616_v1 }
 0x2d0   :  { %v1524_v6 = vsel %vm1360_vm13, %v1160_v58, %v1442_v2  ;;  %v1166_v7 = vadd.f32 %v1165_v5, %v4298_v36  ;;  %v1167_v8 = vpop.f32.mrb[25].mxu1  ;;  %v1711_v9 = vadd.f32 %v4315_v52, %v1617_v3 }
 0x2d1   :  { %v1525_v10 = vsel %vm1361_vm14, %v1162_v62, %v1443_v4  ;;  %v1168_v11 = vadd.f32 %v1167_v8, %v4300_v37  ;;  %v1618_v14 = vmul.f32 %v4306_v42, %v1524_v6 }
 0x2d2   :  { %vm1362_vm15 = vcmp.gt.f32.partialorder %v1166_v7, 0.0  ;;  %v1444_v15 = vmul.f32 0.01, %v1166_v7  ;;  %1918 = vmatprep.mubr.f32.mxu1 %v1711_v9  ;;  %v1619_v16 = vmul.f32 %v4312_v46, %v1525_v10 }
 0x2d3   :  { %vm1363_vm3 = vcmp.gt.f32.partialorder %v1168_v11, 0.0  ;;  %v1445_v17 = vmul.f32 0.01, %v1168_v11  ;;  %v1171_v18 = vpop.f32.mrb[26].mxu1  ;;  %1919 = vmatmul.mubr.f32.gmra.mrb[102].mxu1 %v1710_v13  ;;  %v1712_v26 = vadd.f32 %v4318_v54, %v1618_v14 }
 0x2d4   :  { %v1526_v19 = vsel %vm1362_vm15, %v1166_v7, %v1444_v15  ;;  %v1172_v21 = vadd.f32 %v1171_v18, %v4298_v36  ;;  %v1173_v22 = vpop.f32.mrb[27].mxu1  ;;  %v1713_v23 = vadd.f32 %v4315_v52, %v1619_v16 }
 0x2d5   :  { %v1527_v24 = vsel %vm1363_vm3, %v1168_v11, %v1445_v17  ;;  %v1174_v25 = vadd.f32 %v1173_v22, %v4300_v37  ;;  %v1620_v27 = vmul.f32 %v4306_v42, %v1526_v19 }
 0x2d6   :  { %vm1364_vm4 = vcmp.gt.f32.partialorder %v1172_v21, 0.0  ;;  %v1446_v28 = vmul.f32 0.01, %v1172_v21  ;;  %1923 = vmatprep.mubr.f32.mxu1 %v1713_v23  ;;  %v1621_v29 = vmul.f32 %v4312_v46, %v1527_v24 }
 0x2d7   :  { %vm1365_vm5 = vcmp.gt.f32.partialorder %v1174_v25, 0.0  ;;  %v1447_v30 = vmul.f32 0.01, %v1174_v25  ;;  %v1177_v31 = vpop.f32.mrb[28].mxu1  ;;  %1924 = vmatmul.mubr.f32.gmra.mrb[104].mxu1 %v1712_v26  ;;  %v1714_v39 = vadd.f32 %v4318_v54, %v1620_v27 }
 0x2d8   :  { %v1528_v12 = vsel %vm1364_vm4, %v1172_v21, %v1446_v28  ;;  %v1178_v32 = vadd.f32 %v1177_v31, %v4298_v36  ;;  %v1179_v33 = vpop.f32.mrb[29].mxu1  ;;  %v1715_v34 = vadd.f32 %v4315_v52, %v1621_v29 }
 0x2d9   :  { %v1529_v35 = vsel %vm1365_vm5, %v1174_v25, %v1447_v30  ;;  %v1180_v38 = vadd.f32 %v1179_v33, %v4300_v37  ;;  %v1622_v40 = vmul.f32 %v4306_v42, %v1528_v12 }
 0x2da   :  { %vm1366_vm6 = vcmp.gt.f32.partialorder %v1178_v32, 0.0  ;;  %v1448_v41 = vmul.f32 0.01, %v1178_v32  ;;  %1928 = vmatprep.mubr.f32.mxu1 %v1715_v34  ;;  %v1623_v43 = vmul.f32 %v4312_v46, %v1529_v35 }
 0x2db   :  { %vm1367_vm7 = vcmp.gt.f32.partialorder %v1180_v38, 0.0  ;;  %v1449_v44 = vmul.f32 0.01, %v1180_v38  ;;  %v1183_v45 = vpop.f32.mrb[30].mxu1  ;;  %1929 = vmatmul.mubr.f32.gmra.mrb[106].mxu1 %v1714_v39  ;;  %v1716_v55 = vadd.f32 %v4318_v54, %v1622_v40 }
 0x2dc   :  { %v1530_v47 = vsel %vm1366_vm6, %v1178_v32, %v1448_v41  ;;  %v1184_v48 = vadd.f32 %v1183_v45, %v4298_v36  ;;  %v1185_v49 = vpop.f32.mrb[31].mxu1  ;;  %v1717_v50 = vadd.f32 %v4315_v52, %v1623_v43 }
 0x2dd   :  { %v1531_v51 = vsel %vm1367_vm7, %v1180_v38, %v1449_v44  ;;  %v1186_v53 = vadd.f32 %v1185_v49, %v4300_v37  ;;  %v1624_v56 = vmul.f32 %v4306_v42, %v1530_v47 }
 0x2de   :  { %vm1368_vm8 = vcmp.gt.f32.partialorder %v1184_v48, 0.0  ;;  %v1450_v57 = vmul.f32 0.01, %v1184_v48  ;;  %1933 = vmatprep.mubr.f32.mxu1 %v1717_v50  ;;  %v1625_v58 = vmul.f32 %v4312_v46, %v1531_v51 }
 0x2df   :  { %vm1369_vm9 = vcmp.gt.f32.partialorder %v1186_v53, 0.0  ;;  %v1451_v59 = vmul.f32 0.01, %v1186_v53  ;;  %v1189_v60 = vpop.f32.mrb[32].mxu1  ;;  %1934 = vmatmul.mubr.f32.gmra.mrb[108].mxu1 %v1716_v55  ;;  %v1718_v4 = vadd.f32 %v4318_v54, %v1624_v56 }
 0x2e0   :  { %v1532_v61 = vsel %vm1368_vm8, %v1184_v48, %v1450_v57  ;;  %v1190_v62 = vadd.f32 %v1189_v60, %v4298_v36  ;;  %v1191_v63 = vpop.f32.mrb[33].mxu1  ;;  %v1719_v1 = vadd.f32 %v4315_v52, %v1625_v58 }
 0x2e1   :  { %v1533_v2 = vsel %vm1369_vm9, %v1186_v53, %v1451_v59  ;;  %v1192_v3 = vadd.f32 %v1191_v63, %v4300_v37  ;;  %v1626_v5 = vmul.f32 %v4306_v42, %v1532_v61 }
 0x2e2   :  { %vm1370_vm10 = vcmp.gt.f32.partialorder %v1190_v62, 0.0  ;;  %v1452_v6 = vmul.f32 0.01, %v1190_v62  ;;  %1938 = vmatprep.mubr.f32.mxu1 %v1719_v1  ;;  %v1627_v7 = vmul.f32 %v4312_v46, %v1533_v2 }
 0x2e3   :  { %vm1371_vm11 = vcmp.gt.f32.partialorder %v1192_v3, 0.0  ;;  %v1453_v8 = vmul.f32 0.01, %v1192_v3  ;;  %v1195_v9 = vpop.f32.mrb[34].mxu1  ;;  %1939 = vmatmul.mubr.f32.gmra.mrb[110].mxu1 %v1718_v4  ;;  %v1720_v17 = vadd.f32 %v4318_v54, %v1626_v5 }
 0x2e4   :  { %v1534_v10 = vsel %vm1370_vm10, %v1190_v62, %v1452_v6  ;;  %v1196_v11 = vadd.f32 %v1195_v9, %v4298_v36  ;;  %v1197_v13 = vpop.f32.mrb[35].mxu1  ;;  %v1721_v14 = vadd.f32 %v4315_v52, %v1627_v7 }
 0x2e5   :  { %v1535_v15 = vsel %vm1371_vm11, %v1192_v3, %v1453_v8  ;;  %v1198_v16 = vadd.f32 %v1197_v13, %v4300_v37  ;;  %v1628_v18 = vmul.f32 %v4306_v42, %v1534_v10 }
 0x2e6   :  { %vm1372_vm12 = vcmp.gt.f32.partialorder %v1196_v11, 0.0  ;;  %v1454_v19 = vmul.f32 0.01, %v1196_v11  ;;  %1943 = vmatprep.mubr.f32.mxu1 %v1721_v14  ;;  %v1629_v21 = vmul.f32 %v4312_v46, %v1535_v15 }
 0x2e7   :  { %vm1373_vm13 = vcmp.gt.f32.partialorder %v1198_v16, 0.0  ;;  %v1455_v22 = vmul.f32 0.01, %v1198_v16  ;;  %v1201_v23 = vpop.f32.mrb[36].mxu1  ;;  %1944 = vmatmul.mubr.f32.gmra.mrb[112].mxu1 %v1720_v17  ;;  %v1722_v30 = vadd.f32 %v4318_v54, %v1628_v18 }
 0x2e8   :  { %v1536_v24 = vsel %vm1372_vm12, %v1196_v11, %v1454_v19  ;;  %v1202_v25 = vadd.f32 %v1201_v23, %v4298_v36  ;;  %v1203_v26 = vpop.f32.mrb[37].mxu1  ;;  %v1723_v27 = vadd.f32 %v4315_v52, %v1629_v21 }
 0x2e9   :  { %v1537_v28 = vsel %vm1373_vm13, %v1198_v16, %v1455_v22  ;;  %v1204_v29 = vadd.f32 %v1203_v26, %v4300_v37  ;;  %v1630_v31 = vmul.f32 %v4306_v42, %v1536_v24 }
 0x2ea   :  { %vm1374_vm14 = vcmp.gt.f32.partialorder %v1202_v25, 0.0  ;;  %v1456_v12 = vmul.f32 0.01, %v1202_v25  ;;  %1948 = vmatprep.mubr.f32.mxu1 %v1723_v27  ;;  %v1631_v32 = vmul.f32 %v4312_v46, %v1537_v28 }
 0x2eb   :  { %vm1375_vm15 = vcmp.gt.f32.partialorder %v1204_v29, 0.0  ;;  %v1457_v33 = vmul.f32 0.01, %v1204_v29  ;;  %v1207_v34 = vpop.f32.mrb[38].mxu1  ;;  %1949 = vmatmul.mubr.f32.gmra.mrb[114].mxu1 %v1722_v30  ;;  %v1724_v44 = vadd.f32 %v4318_v54, %v1630_v31 }
 0x2ec   :  { %v1538_v35 = vsel %vm1374_vm14, %v1202_v25, %v1456_v12  ;;  %v1208_v38 = vadd.f32 %v1207_v34, %v4298_v36  ;;  %v1209_v39 = vpop.f32.mrb[39].mxu1  ;;  %v1725_v40 = vadd.f32 %v4315_v52, %v1631_v32 }
 0x2ed   :  { %v1539_v41 = vsel %vm1375_vm15, %v1204_v29, %v1457_v33  ;;  %v1210_v43 = vadd.f32 %v1209_v39, %v4300_v37  ;;  %v1632_v45 = vmul.f32 %v4306_v42, %v1538_v35 }
 0x2ee   :  { %vm1376_vm3 = vcmp.gt.f32.partialorder %v1208_v38, 0.0  ;;  %v1458_v47 = vmul.f32 0.01, %v1208_v38  ;;  %1953 = vmatprep.mubr.f32.mxu1 %v1725_v40  ;;  %v1633_v48 = vmul.f32 %v4312_v46, %v1539_v41 }
 0x2ef   :  { %vm1377_vm4 = vcmp.gt.f32.partialorder %v1210_v43, 0.0  ;;  %v1459_v49 = vmul.f32 0.01, %v1210_v43  ;;  %v1213_v50 = vpop.f32.mrb[40].mxu1  ;;  %1954 = vmatmul.mubr.f32.gmra.mrb[116].mxu1 %v1724_v44  ;;  %v1726_v59 = vadd.f32 %v4318_v54, %v1632_v45 }
 0x2f0   :  { %v1540_v51 = vsel %vm1376_vm3, %v1208_v38, %v1458_v47  ;;  %v1214_v53 = vadd.f32 %v1213_v50, %v4298_v36  ;;  %v1215_v55 = vpop.f32.mrb[41].mxu1  ;;  %v1727_v56 = vadd.f32 %v4315_v52, %v1633_v48 }
 0x2f1   :  { %v1541_v57 = vsel %vm1377_vm4, %v1210_v43, %v1459_v49  ;;  %v1216_v58 = vadd.f32 %v1215_v55, %v4300_v37  ;;  %v1634_v60 = vmul.f32 %v4306_v42, %v1540_v51 }
 0x2f2   :  { %vm1378_vm5 = vcmp.gt.f32.partialorder %v1214_v53, 0.0  ;;  %v1460_v61 = vmul.f32 0.01, %v1214_v53  ;;  %1958 = vmatprep.mubr.f32.mxu1 %v1727_v56  ;;  %v1635_v62 = vmul.f32 %v4312_v46, %v1541_v57 }
 0x2f3   :  { %vm1379_vm6 = vcmp.gt.f32.partialorder %v1216_v58, 0.0  ;;  %v1461_v63 = vmul.f32 0.01, %v1216_v58  ;;  %v1219_v1 = vpop.f32.mrb[42].mxu1  ;;  %1959 = vmatmul.mubr.f32.gmra.mrb[118].mxu1 %v1726_v59  ;;  %v1728_v8 = vadd.f32 %v4318_v54, %v1634_v60 }
 0x2f4   :  { %v1542_v2 = vsel %vm1378_vm5, %v1214_v53, %v1460_v61  ;;  %v1220_v3 = vadd.f32 %v1219_v1, %v4298_v36  ;;  %v1221_v4 = vpop.f32.mrb[43].mxu1  ;;  %v1729_v5 = vadd.f32 %v4315_v52, %v1635_v62 }
 0x2f5   :  { %v1543_v6 = vsel %vm1379_vm6, %v1216_v58, %v1461_v63  ;;  %v1222_v7 = vadd.f32 %v1221_v4, %v4300_v37  ;;  %v1636_v9 = vmul.f32 %v4306_v42, %v1542_v2 }
 0x2f6   :  { %vm1380_vm7 = vcmp.gt.f32.partialorder %v1220_v3, 0.0  ;;  %v1462_v10 = vmul.f32 0.01, %v1220_v3  ;;  %1963 = vmatprep.mubr.f32.mxu1 %v1729_v5  ;;  %v1637_v11 = vmul.f32 %v4312_v46, %v1543_v6 }
 0x2f7   :  { %vm1381_vm8 = vcmp.gt.f32.partialorder %v1222_v7, 0.0  ;;  %v1463_v13 = vmul.f32 0.01, %v1222_v7  ;;  %v1225_v14 = vpop.f32.mrb[44].mxu1  ;;  %1964 = vmatmul.mubr.f32.gmra.mrb[120].mxu1 %v1728_v8  ;;  %v1730_v22 = vadd.f32 %v4318_v54, %v1636_v9 }
 0x2f8   :  { %v1544_v15 = vsel %vm1380_vm7, %v1220_v3, %v1462_v10  ;;  %v1226_v16 = vadd.f32 %v1225_v14, %v4298_v36  ;;  %v1227_v17 = vpop.f32.mrb[45].mxu1  ;;  %v1731_v18 = vadd.f32 %v4315_v52, %v1637_v11 }
 0x2f9   :  { %v1545_v19 = vsel %vm1381_vm8, %v1222_v7, %v1463_v13  ;;  %v1228_v21 = vadd.f32 %v1227_v17, %v4300_v37  ;;  %v1638_v23 = vmul.f32 %v4306_v42, %v1544_v15 }
 0x2fa   :  { %vm1382_vm9 = vcmp.gt.f32.partialorder %v1226_v16, 0.0  ;;  %v1464_v24 = vmul.f32 0.01, %v1226_v16  ;;  %1968 = vmatprep.mubr.f32.mxu1 %v1731_v18  ;;  %v1639_v25 = vmul.f32 %v4312_v46, %v1545_v19 }
 0x2fb   :  { %vm1383_vm10 = vcmp.gt.f32.partialorder %v1228_v21, 0.0  ;;  %v1465_v26 = vmul.f32 0.01, %v1228_v21  ;;  %v1231_v27 = vpop.f32.mrb[46].mxu1  ;;  %1969 = vmatmul.mubr.f32.gmra.mrb[122].mxu1 %v1730_v22  ;;  %v1732_v33 = vadd.f32 %v4318_v54, %v1638_v23 }
 0x2fc   :  { %v1546_v28 = vsel %vm1382_vm9, %v1226_v16, %v1464_v24  ;;  %v1232_v29 = vadd.f32 %v1231_v27, %v4298_v36  ;;  %v1233_v30 = vpop.f32.mrb[47].mxu1  ;;  %v1733_v31 = vadd.f32 %v4315_v52, %v1639_v25 }
 0x2fd   :  { %v1547_v12 = vsel %vm1383_vm10, %v1228_v21, %v1465_v26  ;;  %v1234_v32 = vadd.f32 %v1233_v30, %v4300_v37  ;;  %v1640_v34 = vmul.f32 %v4306_v42, %v1546_v28 }
 0x2fe   :  { %vm1384_vm11 = vcmp.gt.f32.partialorder %v1232_v29, 0.0  ;;  %v1466_v35 = vmul.f32 0.01, %v1232_v29  ;;  %1973 = vmatprep.mubr.f32.mxu1 %v1733_v31  ;;  %v1641_v38 = vmul.f32 %v4312_v46, %v1547_v12 }
 0x2ff   :  { %vm1385_vm12 = vcmp.gt.f32.partialorder %v1234_v32, 0.0  ;;  %v1467_v39 = vmul.f32 0.01, %v1234_v32  ;;  %v1237_v40 = vpop.f32.mrb[48].mxu1  ;;  %1974 = vmatmul.mubr.f32.gmra.mrb[124].mxu1 %v1732_v33  ;;  %v1734_v49 = vadd.f32 %v4318_v54, %v1640_v34 }
 0x300   :  { %v1548_v41 = vsel %vm1384_vm11, %v1232_v29, %v1466_v35  ;;  %v1238_v43 = vadd.f32 %v1237_v40, %v4298_v36  ;;  %v1239_v44 = vpop.f32.mrb[49].mxu1  ;;  %v1735_v45 = vadd.f32 %v4315_v52, %v1641_v38 }
 0x301   :  { %v1549_v47 = vsel %vm1385_vm12, %v1234_v32, %v1467_v39  ;;  %v1240_v48 = vadd.f32 %v1239_v44, %v4300_v37  ;;  %v1642_v50 = vmul.f32 %v4306_v42, %v1548_v41 }
 0x302   :  { %vm1386_vm13 = vcmp.gt.f32.partialorder %v1238_v43, 0.0  ;;  %v1468_v51 = vmul.f32 0.01, %v1238_v43  ;;  %1978 = vmatprep.mubr.f32.mxu1 %v1735_v45  ;;  %v1643_v53 = vmul.f32 %v4312_v46, %v1549_v47 }
 0x303   :  { %vm1387_vm14 = vcmp.gt.f32.partialorder %v1240_v48, 0.0  ;;  %v1469_v55 = vmul.f32 0.01, %v1240_v48  ;;  %v1243_v56 = vpop.f32.mrb[50].mxu1  ;;  %1979 = vmatmul.mubr.f32.gmra.mrb[126].mxu1 %v1734_v49  ;;  %v1736_v63 = vadd.f32 %v4318_v54, %v1642_v50 }
 0x304   :  { %v1550_v57 = vsel %vm1386_vm13, %v1238_v43, %v1468_v51  ;;  %v1244_v58 = vadd.f32 %v1243_v56, %v4298_v36  ;;  %v1245_v59 = vpop.f32.mrb[51].mxu1  ;;  %v1737_v60 = vadd.f32 %v4315_v52, %v1643_v53 }
 0x305   :  { %v1551_v61 = vsel %vm1387_vm14, %v1240_v48, %v1469_v55  ;;  %v1246_v62 = vadd.f32 %v1245_v59, %v4300_v37  ;;  %v1644_v1 = vmul.f32 %v4306_v42, %v1550_v57 }
 0x306   :  { %vm1388_vm15 = vcmp.gt.f32.partialorder %v1244_v58, 0.0  ;;  %v1470_v2 = vmul.f32 0.01, %v1244_v58  ;;  %1983 = vmatprep.mubr.f32.mxu1 %v1737_v60  ;;  %v1645_v3 = vmul.f32 %v4312_v46, %v1551_v61 }
 0x307   :  { %vm1389_vm3 = vcmp.gt.f32.partialorder %v1246_v62, 0.0  ;;  %v1471_v4 = vmul.f32 0.01, %v1246_v62  ;;  %v1249_v5 = vpop.f32.mrb[52].mxu1  ;;  %1984 = vmatmul.mubr.f32.gmra.mrb[128].mxu1 %v1736_v63  ;;  %v1738_v13 = vadd.f32 %v4318_v54, %v1644_v1 }
 0x308   :  { %v1552_v6 = vsel %vm1388_vm15, %v1244_v58, %v1470_v2  ;;  %v1250_v7 = vadd.f32 %v1249_v5, %v4298_v36  ;;  %v1251_v8 = vpop.f32.mrb[53].mxu1  ;;  %v1739_v9 = vadd.f32 %v4315_v52, %v1645_v3 }
 0x309   :  { %v1553_v10 = vsel %vm1389_vm3, %v1246_v62, %v1471_v4  ;;  %v1252_v11 = vadd.f32 %v1251_v8, %v4300_v37  ;;  %v1646_v14 = vmul.f32 %v4306_v42, %v1552_v6 }
 0x30a   :  { %vm1390_vm4 = vcmp.gt.f32.partialorder %v1250_v7, 0.0  ;;  %v1472_v15 = vmul.f32 0.01, %v1250_v7  ;;  %1988 = vmatprep.mubr.f32.mxu1 %v1739_v9  ;;  %v1647_v16 = vmul.f32 %v4312_v46, %v1553_v10 }
 0x30b   :  { %vm1391_vm5 = vcmp.gt.f32.partialorder %v1252_v11, 0.0  ;;  %v1473_v17 = vmul.f32 0.01, %v1252_v11  ;;  %v1255_v18 = vpop.f32.mrb[54].mxu1  ;;  %1989 = vmatmul.mubr.f32.gmra.mrb[130].mxu1 %v1738_v13  ;;  %v1740_v26 = vadd.f32 %v4318_v54, %v1646_v14 }
 0x30c   :  { %v1554_v19 = vsel %vm1390_vm4, %v1250_v7, %v1472_v15  ;;  %v1256_v21 = vadd.f32 %v1255_v18, %v4298_v36  ;;  %v1257_v22 = vpop.f32.mrb[55].mxu1  ;;  %v1741_v23 = vadd.f32 %v4315_v52, %v1647_v16 }
 0x30d   :  { %v1555_v24 = vsel %vm1391_vm5, %v1252_v11, %v1473_v17  ;;  %v1258_v25 = vadd.f32 %v1257_v22, %v4300_v37  ;;  %v1648_v27 = vmul.f32 %v4306_v42, %v1554_v19 }
 0x30e   :  { %vm1392_vm6 = vcmp.gt.f32.partialorder %v1256_v21, 0.0  ;;  %v1474_v28 = vmul.f32 0.01, %v1256_v21  ;;  %1993 = vmatprep.mubr.f32.mxu1 %v1741_v23  ;;  %v1649_v29 = vmul.f32 %v4312_v46, %v1555_v24 }
 0x30f   :  { %vm1393_vm7 = vcmp.gt.f32.partialorder %v1258_v25, 0.0  ;;  %v1475_v30 = vmul.f32 0.01, %v1258_v25  ;;  %v1261_v31 = vpop.f32.mrb[56].mxu1  ;;  %1994 = vmatmul.mubr.f32.gmra.mrb[132].mxu1 %v1740_v26  ;;  %v1742_v39 = vadd.f32 %v4318_v54, %v1648_v27 }
 0x310   :  { %v1556_v12 = vsel %vm1392_vm6, %v1256_v21, %v1474_v28  ;;  %v1262_v32 = vadd.f32 %v1261_v31, %v4298_v36  ;;  %v1263_v33 = vpop.f32.mrb[57].mxu1  ;;  %v1743_v34 = vadd.f32 %v4315_v52, %v1649_v29 }
 0x311   :  { %v1557_v35 = vsel %vm1393_vm7, %v1258_v25, %v1475_v30  ;;  %v1264_v38 = vadd.f32 %v1263_v33, %v4300_v37  ;;  %v1650_v40 = vmul.f32 %v4306_v42, %v1556_v12 }
 0x312   :  { %vm1394_vm8 = vcmp.gt.f32.partialorder %v1262_v32, 0.0  ;;  %v1476_v41 = vmul.f32 0.01, %v1262_v32  ;;  %1998 = vmatprep.mubr.f32.mxu1 %v1743_v34  ;;  %v1651_v43 = vmul.f32 %v4312_v46, %v1557_v35 }
 0x313   :  { %vm1395_vm9 = vcmp.gt.f32.partialorder %v1264_v38, 0.0  ;;  %v1477_v44 = vmul.f32 0.01, %v1264_v38  ;;  %v1267_v45 = vpop.f32.mrb[58].mxu1  ;;  %1999 = vmatmul.mubr.f32.gmra.mrb[134].mxu1 %v1742_v39  ;;  %v1744_v55 = vadd.f32 %v4318_v54, %v1650_v40 }
 0x314   :  { %v1558_v47 = vsel %vm1394_vm8, %v1262_v32, %v1476_v41  ;;  %v1268_v48 = vadd.f32 %v1267_v45, %v4298_v36  ;;  %v1269_v49 = vpop.f32.mrb[59].mxu1  ;;  %v1745_v50 = vadd.f32 %v4315_v52, %v1651_v43 }
 0x315   :  { %v1559_v51 = vsel %vm1395_vm9, %v1264_v38, %v1477_v44  ;;  %v1270_v53 = vadd.f32 %v1269_v49, %v4300_v37  ;;  %v1652_v56 = vmul.f32 %v4306_v42, %v1558_v47 }
 0x316   :  { %vm1396_vm10 = vcmp.gt.f32.partialorder %v1268_v48, 0.0  ;;  %v1478_v57 = vmul.f32 0.01, %v1268_v48  ;;  %2003 = vmatprep.mubr.f32.mxu1 %v1745_v50  ;;  %v1653_v58 = vmul.f32 %v4312_v46, %v1559_v51 }
 0x317   :  { %vm1397_vm11 = vcmp.gt.f32.partialorder %v1270_v53, 0.0  ;;  %v1479_v59 = vmul.f32 0.01, %v1270_v53  ;;  %v1273_v60 = vpop.f32.mrb[60].mxu1  ;;  %2004 = vmatmul.mubr.f32.gmra.mrb[136].mxu1 %v1744_v55  ;;  %v1746_v4 = vadd.f32 %v4318_v54, %v1652_v56 }
 0x318   :  { %v1560_v61 = vsel %vm1396_vm10, %v1268_v48, %v1478_v57  ;;  %v1274_v62 = vadd.f32 %v1273_v60, %v4298_v36  ;;  %v1275_v63 = vpop.f32.mrb[61].mxu1  ;;  %v1747_v1 = vadd.f32 %v4315_v52, %v1653_v58 }
 0x319   :  { %v1561_v2 = vsel %vm1397_vm11, %v1270_v53, %v1479_v59  ;;  %v1276_v3 = vadd.f32 %v1275_v63, %v4300_v37  ;;  %v1654_v5 = vmul.f32 %v4306_v42, %v1560_v61 }
 0x31a   :  { %vm1398_vm12 = vcmp.gt.f32.partialorder %v1274_v62, 0.0  ;;  %v1480_v6 = vmul.f32 0.01, %v1274_v62  ;;  %2008 = vmatprep.mubr.f32.mxu1 %v1747_v1  ;;  %v1655_v7 = vmul.f32 %v4312_v46, %v1561_v2 }
 0x31b   :  { %vm1399_vm13 = vcmp.gt.f32.partialorder %v1276_v3, 0.0  ;;  %v1481_v8 = vmul.f32 0.01, %v1276_v3  ;;  %v1279_v9 = vpop.f32.mrb[62].mxu1  ;;  %2009 = vmatmul.mubr.f32.gmra.mrb[138].mxu1 %v1746_v4  ;;  %v1748_v17 = vadd.f32 %v4318_v54, %v1654_v5 }
 0x31c   :  { %v1562_v10 = vsel %vm1398_vm12, %v1274_v62, %v1480_v6  ;;  %v1280_v11 = vadd.f32 %v1279_v9, %v4298_v36  ;;  %v1281_v13 = vpop.f32.mrb[63].mxu1  ;;  %v1749_v14 = vadd.f32 %v4315_v52, %v1655_v7 }
 0x31d   :  { %v1563_v15 = vsel %vm1399_vm13, %v1276_v3, %v1481_v8  ;;  %v1282_v16 = vadd.f32 %v1281_v13, %v4300_v37  ;;  %v1656_v18 = vmul.f32 %v4306_v42, %v1562_v10 }
 0x31e   :  { %vm1400_vm14 = vcmp.gt.f32.partialorder %v1280_v11, 0.0  ;;  %v1482_v19 = vmul.f32 0.01, %v1280_v11  ;;  %2013 = vmatprep.mubr.f32.mxu1 %v1749_v14  ;;  %v1657_v21 = vmul.f32 %v4312_v46, %v1563_v15 }
 0x31f   :  { %vm1401_vm15 = vcmp.gt.f32.partialorder %v1282_v16, 0.0  ;;  %v1483_v22 = vmul.f32 0.01, %v1282_v16  ;;  %v1285_v23 = vpop.f32.mrb[64].mxu1  ;;  %2014 = vmatmul.mubr.f32.gmra.mrb[140].mxu1 %v1748_v17  ;;  %v1750_v30 = vadd.f32 %v4318_v54, %v1656_v18 }
 0x320   :  { %v1564_v24 = vsel %vm1400_vm14, %v1280_v11, %v1482_v19  ;;  %v1286_v25 = vadd.f32 %v1285_v23, %v4298_v36  ;;  %v1287_v26 = vpop.f32.mrb[65].mxu1  ;;  %v1751_v27 = vadd.f32 %v4315_v52, %v1657_v21 }
 0x321   :  { %v1565_v28 = vsel %vm1401_vm15, %v1282_v16, %v1483_v22  ;;  %v1288_v29 = vadd.f32 %v1287_v26, %v4300_v37  ;;  %v1658_v31 = vmul.f32 %v4306_v42, %v1564_v24 }
 0x322   :  { %vm1402_vm3 = vcmp.gt.f32.partialorder %v1286_v25, 0.0  ;;  %v1484_v12 = vmul.f32 0.01, %v1286_v25  ;;  %2018 = vmatprep.mubr.f32.mxu1 %v1751_v27  ;;  %v1659_v32 = vmul.f32 %v4312_v46, %v1565_v28 }
 0x323   :  { %vm1403_vm4 = vcmp.gt.f32.partialorder %v1288_v29, 0.0  ;;  %v1485_v33 = vmul.f32 0.01, %v1288_v29  ;;  %v1291_v34 = vpop.f32.mrb[66].mxu1  ;;  %2019 = vmatmul.mubr.f32.gmra.mrb[142].mxu1 %v1750_v30  ;;  %v1752_v44 = vadd.f32 %v4318_v54, %v1658_v31 }
 0x324   :  { %v1566_v35 = vsel %vm1402_vm3, %v1286_v25, %v1484_v12  ;;  %v1292_v38 = vadd.f32 %v1291_v34, %v4298_v36  ;;  %v1293_v39 = vpop.f32.mrb[67].mxu1  ;;  %v1753_v40 = vadd.f32 %v4315_v52, %v1659_v32 }
 0x325   :  { %v1567_v41 = vsel %vm1403_vm4, %v1288_v29, %v1485_v33  ;;  %v1294_v43 = vadd.f32 %v1293_v39, %v4300_v37  ;;  %v1660_v45 = vmul.f32 %v4306_v42, %v1566_v35 }
 0x326   :  { %vm1404_vm5 = vcmp.gt.f32.partialorder %v1292_v38, 0.0  ;;  %v1486_v47 = vmul.f32 0.01, %v1292_v38  ;;  %2023 = vmatprep.mubr.f32.mxu1 %v1753_v40  ;;  %v1661_v48 = vmul.f32 %v4312_v46, %v1567_v41 }
 0x327   :  { %vm1405_vm6 = vcmp.gt.f32.partialorder %v1294_v43, 0.0  ;;  %v1487_v49 = vmul.f32 0.01, %v1294_v43  ;;  %v1297_v50 = vpop.f32.mrb[68].mxu1  ;;  %2024 = vmatmul.mubr.f32.gmra.mrb[144].mxu1 %v1752_v44  ;;  %v1754_v59 = vadd.f32 %v4318_v54, %v1660_v45 }
 0x328   :  { %v1568_v51 = vsel %vm1404_vm5, %v1292_v38, %v1486_v47  ;;  %v1298_v53 = vadd.f32 %v1297_v50, %v4298_v36  ;;  %v1299_v55 = vpop.f32.mrb[69].mxu1  ;;  %v1755_v56 = vadd.f32 %v4315_v52, %v1661_v48 }
 0x329   :  { %v1569_v57 = vsel %vm1405_vm6, %v1294_v43, %v1487_v49  ;;  %v1300_v58 = vadd.f32 %v1299_v55, %v4300_v37  ;;  %v1662_v60 = vmul.f32 %v4306_v42, %v1568_v51 }
 0x32a   :  { %vm1406_vm7 = vcmp.gt.f32.partialorder %v1298_v53, 0.0  ;;  %v1488_v61 = vmul.f32 0.01, %v1298_v53  ;;  %2028 = vmatprep.mubr.f32.mxu1 %v1755_v56  ;;  %v1663_v62 = vmul.f32 %v4312_v46, %v1569_v57 }
 0x32b   :  { %vm1407_vm8 = vcmp.gt.f32.partialorder %v1300_v58, 0.0  ;;  %v1489_v63 = vmul.f32 0.01, %v1300_v58  ;;  %v1303_v1 = vpop.f32.mrb[70].mxu1  ;;  %2029 = vmatmul.mubr.f32.gmra.mrb[146].mxu1 %v1754_v59  ;;  %v1756_v8 = vadd.f32 %v4318_v54, %v1662_v60 }
 0x32c   :  { %v1570_v2 = vsel %vm1406_vm7, %v1298_v53, %v1488_v61  ;;  %v1304_v3 = vadd.f32 %v1303_v1, %v4298_v36  ;;  %v1305_v4 = vpop.f32.mrb[71].mxu1  ;;  %v1757_v5 = vadd.f32 %v4315_v52, %v1663_v62 }
 0x32d   :  { %v1571_v6 = vsel %vm1407_vm8, %v1300_v58, %v1489_v63  ;;  %v1306_v7 = vadd.f32 %v1305_v4, %v4300_v37  ;;  %v1664_v9 = vmul.f32 %v4306_v42, %v1570_v2 }
 0x32e   :  { %vm1408_vm9 = vcmp.gt.f32.partialorder %v1304_v3, 0.0  ;;  %v1490_v10 = vmul.f32 0.01, %v1304_v3  ;;  %2033 = vmatprep.mubr.f32.mxu1 %v1757_v5  ;;  %v1665_v11 = vmul.f32 %v4312_v46, %v1571_v6 }
 0x32f   :  { %vm1409_vm10 = vcmp.gt.f32.partialorder %v1306_v7, 0.0  ;;  %v1491_v13 = vmul.f32 0.01, %v1306_v7  ;;  %v1309_v14 = vpop.f32.mrb[72].mxu1  ;;  %2034 = vmatmul.mubr.f32.gmra.mrb[148].mxu1 %v1756_v8  ;;  %v1758_v22 = vadd.f32 %v4318_v54, %v1664_v9 }
 0x330   :  { %v1572_v15 = vsel %vm1408_vm9, %v1304_v3, %v1490_v10  ;;  %v1310_v16 = vadd.f32 %v1309_v14, %v4298_v36  ;;  %v1311_v17 = vpop.f32.mrb[73].mxu1  ;;  %v1759_v18 = vadd.f32 %v4315_v52, %v1665_v11 }
 0x331   :  { %v1573_v19 = vsel %vm1409_vm10, %v1306_v7, %v1491_v13  ;;  %v1312_v21 = vadd.f32 %v1311_v17, %v4300_v37  ;;  %v1666_v23 = vmul.f32 %v4306_v42, %v1572_v15 }
 0x332   :  { %vm1410_vm11 = vcmp.gt.f32.partialorder %v1310_v16, 0.0  ;;  %v1492_v24 = vmul.f32 0.01, %v1310_v16  ;;  %2038 = vmatprep.mubr.f32.mxu1 %v1759_v18  ;;  %v1667_v25 = vmul.f32 %v4312_v46, %v1573_v19 }
 0x333   :  { %vm1411_vm12 = vcmp.gt.f32.partialorder %v1312_v21, 0.0  ;;  %v1493_v26 = vmul.f32 0.01, %v1312_v21  ;;  %v1315_v27 = vpop.f32.mrb[74].mxu1  ;;  %2039 = vmatmul.mubr.f32.gmra.mrb[150].mxu1 %v1758_v22  ;;  %v1760_v33 = vadd.f32 %v4318_v54, %v1666_v23 }
 0x334   :  { %v1574_v28 = vsel %vm1410_vm11, %v1310_v16, %v1492_v24  ;;  %v1316_v29 = vadd.f32 %v1315_v27, %v4298_v36  ;;  %v1317_v30 = vpop.f32.mrb[75].mxu1  ;;  %v1761_v31 = vadd.f32 %v4315_v52, %v1667_v25  ;;  %v3570_v25 = vld [vmem:[#allocation2 + $0x350] sm:$0xff] }
 0x335   :  { %v1575_v12 = vsel %vm1411_vm12, %v1312_v21, %v1493_v26  ;;  %v1318_v32 = vadd.f32 %v1317_v30, %v4300_v37  ;;  %v1668_v34 = vmul.f32 %v4306_v42, %v1574_v28 }
 0x336   :  { %vm1412_vm13 = vcmp.gt.f32.partialorder %v1316_v29, 0.0  ;;  %v1494_v35 = vmul.f32 0.01, %v1316_v29  ;;  %2043 = vmatprep.mubr.f32.mxu1 %v1761_v31  ;;  %v1669_v38 = vmul.f32 %v4312_v46, %v1575_v12 }
 0x337   :  { %vm1413_vm14 = vcmp.gt.f32.partialorder %v1318_v32, 0.0  ;;  %v1495_v39 = vmul.f32 0.01, %v1318_v32  ;;  %v1321_v40 = vpop.f32.mrb[76].mxu1  ;;  %2044 = vmatmul.mubr.f32.gmra.mrb[152].mxu1 %v1760_v33  ;;  %v1762_v49 = vadd.f32 %v4318_v54, %v1668_v34 }
 0x338   :  { %v1576_v41 = vsel %vm1412_vm13, %v1316_v29, %v1494_v35  ;;  %v1322_v43 = vadd.f32 %v1321_v40, %v4298_v36  ;;  %v1323_v44 = vpop.f32.mrb[77].mxu1  ;;  %v1763_v45 = vadd.f32 %v4315_v52, %v1669_v38 }
 0x339   :  { %v1577_v47 = vsel %vm1413_vm14, %v1318_v32, %v1495_v39  ;;  %v1324_v48 = vadd.f32 %v1323_v44, %v4300_v37  ;;  %v1670_v50 = vmul.f32 %v4306_v42, %v1576_v41 }
 0x33a   :  { %vm1414_vm15 = vcmp.gt.f32.partialorder %v1322_v43, 0.0  ;;  %v1496_v51 = vmul.f32 0.01, %v1322_v43  ;;  %2048 = vmatprep.mubr.f32.mxu1 %v1763_v45  ;;  %v1671_v53 = vmul.f32 %v4312_v46, %v1577_v47 }
 0x33b   :  { %vm1415_vm3 = vcmp.gt.f32.partialorder %v1324_v48, 0.0  ;;  %v1497_v55 = vmul.f32 0.01, %v1324_v48  ;;  %v1327_v56 = vpop.f32.mrb[78].mxu1  ;;  %2049 = vmatmul.mubr.f32.gmra.mrb[154].mxu1 %v1762_v49  ;;  %v1764_v63 = vadd.f32 %v4318_v54, %v1670_v50 }
 0x33c   :  { %v1578_v57 = vsel %vm1414_vm15, %v1322_v43, %v1496_v51  ;;  %v1328_v58 = vadd.f32 %v1327_v56, %v4298_v36  ;;  %v1329_v59 = vpop.f32.mrb[79].mxu1  ;;  %v1765_v60 = vadd.f32 %v4315_v52, %v1671_v53 }
 0x33d   :  { %v1579_v61 = vsel %vm1415_vm3, %v1324_v48, %v1497_v55  ;;  %v1330_v62 = vadd.f32 %v1329_v59, %v4300_v37  ;;  %v1672_v1 = vmul.f32 %v4306_v42, %v1578_v57 }
 0x33e   :  { %vm1416_vm4 = vcmp.gt.f32.partialorder %v1328_v58, 0.0  ;;  %v1498_v2 = vmul.f32 0.01, %v1328_v58  ;;  %2053 = vmatprep.mubr.f32.mxu1 %v1765_v60  ;;  %v1673_v3 = vmul.f32 %v4312_v46, %v1579_v61 }
 0x33f   :  { %vm1417_vm5 = vcmp.gt.f32.partialorder %v1330_v62, 0.0  ;;  %v1499_v4 = vmul.f32 0.01, %v1330_v62  ;;  %v1333_v5 = vpop.f32.mrb[80].mxu1  ;;  %2054 = vmatmul.mubr.f32.gmra.mrb[156].mxu1 %v1764_v63  ;;  %v1766_v13 = vadd.f32 %v4318_v54, %v1672_v1 }
 0x340   :  { %v1580_v6 = vsel %vm1416_vm4, %v1328_v58, %v1498_v2  ;;  %v1334_v7 = vadd.f32 %v1333_v5, %v4298_v36  ;;  %v1335_v8 = vpop.f32.mrb[81].mxu1  ;;  %v1767_v9 = vadd.f32 %v4315_v52, %v1673_v3 }
 0x341   :  { %v1581_v10 = vsel %vm1417_vm5, %v1330_v62, %v1499_v4  ;;  %v1336_v11 = vadd.f32 %v1335_v8, %v4300_v37  ;;  %v1674_v14 = vmul.f32 %v4306_v42, %v1580_v6 }
 0x342   :  { %vm1418_vm6 = vcmp.gt.f32.partialorder %v1334_v7, 0.0  ;;  %v1500_v15 = vmul.f32 0.01, %v1334_v7  ;;  %2058 = vmatprep.mubr.f32.mxu1 %v1767_v9  ;;  %v1675_v16 = vmul.f32 %v4312_v46, %v1581_v10 }
 0x343   :  { %vm1419_vm7 = vcmp.gt.f32.partialorder %v1336_v11, 0.0  ;;  %v1501_v17 = vmul.f32 0.01, %v1336_v11  ;;  %2059 = vmatmul.mubr.f32.gmra.mrb[158].mxu1 %v1766_v13  ;;  %v1768_v21 = vadd.f32 %v4318_v54, %v1674_v14 }
 0x344   :  { %v1582_v18 = vsel %vm1418_vm6, %v1334_v7, %v1500_v15  ;;  %v1769_v36 = vadd.f32 %v4315_v52, %v1675_v16 }
 0x345   :  { %v1583_v19 = vsel %vm1419_vm7, %v1336_v11, %v1501_v17  ;;  %v1676_v37 = vmul.f32 %v4306_v42, %v1582_v18 }
 0x346   :  { %2063 = vmatprep.mubr.f32.mxu1 %v1769_v36  ;;  %v1677_v22 = vmul.f32 %v4312_v46, %v1583_v19 }
 0x347   :  { %2064 = vmatmul.mubr.f32.gmra.mrb[160].mxu1 %v1768_v21  ;;  %v1770_v24 = vadd.f32 %v4318_v54, %v1676_v37 }
 0x348   :  { %v1771_v23 = vadd.f32 %v4315_v52, %v1677_v22 }
 0x34a   :  { %2068 = vmatprep.mubr.f32.mxu1 %v1771_v23 }
 0x34b   :  { %2069 = vmatmul.mubr.f32.gmra.mrb[162].mxu1 %v1770_v24 }
 0x34c   :  { %2323 = vmatprep.mubr.f32.mxu1 %v3570_v25 }
 0x37e   :  { %v1870_v26 = vpop.f32.mrb[82].mxu1 }
 0x37f   :  { %v1872_v27 = vpop.f32.mrb[83].mxu1 }
 0x382   :  { %v1875_v28 = vpop.f32.mrb[84].mxu1 }
 0x383   :  { %v3303_v29 = vpack.c.bf16 %v1875_v28, %v1870_v26  ;;  %v1877_v30 = vpop.f32.mrb[85].mxu1 }
 0x385   :  { %3304 = vmatpush1.bf16.msra.mxu0 %v3303_v29  ;;  %3378 = vmatpush1.bf16.msra.mxu1 %v3303_v29 }
 0x386   :  { %v1880_v42 = vpop.f32.mrb[86].mxu1  ;;  %3305 = vmatprep.subr.bf16.mxu0 %v3719_v0  ;;  %3363 = vmatprep.subr.bf16.mxu1 %v3719_v0 }
 0x387   :  { %v1882_v46 = vpop.f32.mrb[87].mxu1 }
 0x38a   :  { %v1885_v52 = vpop.f32.mrb[88].mxu1 }
 0x38b   :  { %v3306_v31 = vpack.c.bf16 %v1885_v52, %v1880_v42  ;;  %v1887_v54 = vpop.f32.mrb[89].mxu1 }
 0x38d   :  { %3307 = vmatpush1.bf16.msra.mxu0 %v3306_v31  ;;  %3379 = vmatpush1.bf16.msra.mxu1 %v3306_v31 }
 0x38e   :  { %v1890_v12 = vpop.f32.mrb[90].mxu1  ;;  %3308 = vmatprep.subr.bf16.mxu0 %v3719_v0  ;;  %3364 = vmatprep.subr.bf16.mxu1 %v3719_v0 }
 0x38f   :  { %v1892_v32 = vpop.f32.mrb[91].mxu1 }
 0x392   :  { %v1895_v33 = vpop.f32.mrb[92].mxu1 }
 0x393   :  { %v3309_v34 = vpack.c.bf16 %v1895_v33, %v1890_v12  ;;  %v1897_v35 = vpop.f32.mrb[93].mxu1 }
 0x395   :  { %3310 = vmatpush1.bf16.msra.mxu0 %v3309_v34  ;;  %3380 = vmatpush1.bf16.msra.mxu1 %v3309_v34 }
 0x396   :  { %v1900_v38 = vpop.f32.mrb[94].mxu1  ;;  %3311 = vmatprep.subr.bf16.mxu0 %v3719_v0  ;;  %3365 = vmatprep.subr.bf16.mxu1 %v3719_v0 }
 0x397   :  { %v1902_v39 = vpop.f32.mrb[95].mxu1 }
 0x39a   :  { %v1905_v40 = vpop.f32.mrb[96].mxu1 }
 0x39b   :  { %v3312_v41 = vpack.c.bf16 %v1905_v40, %v1900_v38  ;;  %v1907_v43 = vpop.f32.mrb[97].mxu1 }
 0x39d   :  { %3313 = vmatpush1.bf16.msra.mxu0 %v3312_v41  ;;  %3381 = vmatpush1.bf16.msra.mxu1 %v3312_v41 }
 0x39e   :  { %v1910_v44 = vpop.f32.mrb[98].mxu1  ;;  %3314 = vmatprep.subr.bf16.mxu0 %v3719_v0  ;;  %3366 = vmatprep.subr.bf16.mxu1 %v3719_v0 }
 0x39f   :  { %v1912_v45 = vpop.f32.mrb[99].mxu1 }
 0x3a0   :  { %v3572_v45 = vld [vmem:[#allocation2] sm:$0xff] }
 0x3a2   :  { %v1915_v47 = vpop.f32.mrb[100].mxu1 }
 0x3a3   :  { %v3315_v48 = vpack.c.bf16 %v1915_v47, %v1910_v44  ;;  %v1917_v49 = vpop.f32.mrb[101].mxu1  ;;  %v3571_v44 = vld [vmem:[#allocation2 + $0x348] sm:$0xff] }
 0x3a4   :  { %v3573_v47 = vld [vmem:[#allocation2 + $0x368] sm:$0xff] }
 0x3a5   :  { %3316 = vmatpush1.bf16.msra.mxu0 %v3315_v48  ;;  %3382 = vmatpush1.bf16.msra.mxu1 %v3315_v48  ;;  %v3574_v48 = vld [vmem:[#allocation2 + $0x20] sm:$0xff] }
 0x3a6   :  { %v1920_v50 = vpop.f32.mrb[102].mxu1  ;;  %3317 = vmatprep.subr.bf16.mxu0 %v3719_v0  ;;  %3367 = vmatprep.subr.bf16.mxu1 %v3719_v0 }
 0x3a7   :  { %v1922_v51 = vpop.f32.mrb[103].mxu1 }
 0x3aa   :  { %v1925_v53 = vpop.f32.mrb[104].mxu1 }
 0x3ab   :  { %v3318_v55 = vpack.c.bf16 %v1925_v53, %v1920_v50  ;;  %v1927_v56 = vpop.f32.mrb[105].mxu1  ;;  %v3575_v53 = vld [vmem:[#allocation2 + $0x360] sm:$0xff] }
 0x3ac   :  { %v3577_v56 = vld [vmem:[#allocation2 + $0x380] sm:$0xff] }
 0x3ad   :  { %3319 = vmatpush1.bf16.msra.mxu0 %v3318_v55  ;;  %3383 = vmatpush1.bf16.msra.mxu1 %v3318_v55  ;;  %v3576_v55 = vld [vmem:[#allocation2 + $0x18] sm:$0xff] }
 0x3ae   :  { %v1930_v57 = vpop.f32.mrb[106].mxu1  ;;  %3320 = vmatprep.subr.bf16.mxu0 %v3719_v0  ;;  %3368 = vmatprep.subr.bf16.mxu1 %v3719_v0 }
 0x3af   :  { %v1932_v58 = vpop.f32.mrb[107].mxu1 }
 0x3b0   :  { %v3578_v58 = vld [vmem:[#allocation2 + $0x38] sm:$0xff] }
 0x3b2   :  { %v1935_v59 = vpop.f32.mrb[108].mxu1 }
 0x3b3   :  { %v3321_v60 = vpack.c.bf16 %v1935_v59, %v1930_v57  ;;  %v1937_v61 = vpop.f32.mrb[109].mxu1 }
 0x3b4   :  { %v3580_v61 = vld [vmem:[#allocation2 + $0x30] sm:$0xff] }
 0x3b5   :  { %3322 = vmatpush1.bf16.msra.mxu0 %v3321_v60  ;;  %3384 = vmatpush1.bf16.msra.mxu1 %v3321_v60  ;;  %v3579_v60 = vld [vmem:[#allocation2 + $0x378] sm:$0xff] }
 0x3b6   :  { %v1940_v62 = vpop.f32.mrb[110].mxu1  ;;  %3323 = vmatprep.subr.bf16.mxu0 %v3719_v0  ;;  %3369 = vmatprep.subr.bf16.mxu1 %v3719_v0 }
 0x3b7   :  { %v1942_v63 = vpop.f32.mrb[111].mxu1 }
 0x3b8   :  { %v3582_v63 = vld [vmem:[#allocation2 + $0x50] sm:$0xff] }
 0x3ba   :  { %v1945_v1 = vpop.f32.mrb[112].mxu1 }
 0x3bb   :  { %v3324_v2 = vpack.c.bf16 %v1945_v1, %v1940_v62  ;;  %v1947_v3 = vpop.f32.mrb[113].mxu1  ;;  %v3581_v62 = vld [vmem:[#allocation2 + $0x398] sm:$0xff] }
 0x3bd   :  { %3325 = vmatpush1.bf16.msra.mxu0 %v3324_v2  ;;  %3385 = vmatpush1.bf16.msra.mxu1 %v3324_v2 }
 0x3be   :  { %v1950_v4 = vpop.f32.mrb[114].mxu1  ;;  %3326 = vmatprep.subr.bf16.mxu0 %v3719_v0  ;;  %3370 = vmatprep.subr.bf16.mxu1 %v3719_v0 }
 0x3bf   :  { %v1952_v5 = vpop.f32.mrb[115].mxu1 }
 0x3c0   :  { %v3584_v5 = vld [vmem:[#allocation2 + $0x48] sm:$0xff] }
 0x3c2   :  { %v1955_v6 = vpop.f32.mrb[116].mxu1 }
 0x3c3   :  { %v3327_v7 = vpack.c.bf16 %v1955_v6, %v1950_v4  ;;  %v1957_v8 = vpop.f32.mrb[117].mxu1  ;;  %v3583_v4 = vld [vmem:[#allocation2 + $0x390] sm:$0xff] }
 0x3c4   :  { %v3585_v6 = vld [vmem:[#allocation2 + $0x3b0] sm:$0xff]  ;;  %v3586_v8 = vld [vmem:[#allocation2 + $0x68] sm:$0xff] }
 0x3c5   :  { %3328 = vmatpush1.bf16.msra.mxu0 %v3327_v7  ;;  %3386 = vmatpush1.bf16.msra.mxu1 %v3327_v7 }
 0x3c6   :  { %v1960_v9 = vpop.f32.mrb[118].mxu1  ;;  %3329 = vmatprep.subr.bf16.mxu0 %v3719_v0  ;;  %3371 = vmatprep.subr.bf16.mxu1 %v3719_v0 }
 0x3c7   :  { %v1962_v10 = vpop.f32.mrb[119].mxu1 }
 0x3c8   :  { %v3587_v10 = vld [vmem:[#allocation2 + $0x3a8] sm:$0xff] }
 0x3ca   :  { %v1965_v11 = vpop.f32.mrb[120].mxu1 }
 0x3cb   :  { %v3330_v13 = vpack.c.bf16 %v1965_v11, %v1960_v9  ;;  %v1967_v14 = vpop.f32.mrb[121].mxu1  ;;  %v3588_v11 = vld [vmem:[#allocation2 + $0x60] sm:$0xff] }
 0x3cc   :  { %v3590_v14 = vld [vmem:[#allocation2 + $0x80] sm:$0xff] }
 0x3cd   :  { %3331 = vmatpush1.bf16.msra.mxu0 %v3330_v13  ;;  %3387 = vmatpush1.bf16.msra.mxu1 %v3330_v13  ;;  %v3589_v13 = vld [vmem:[#allocation2 + $0x3c8] sm:$0xf] }
 0x3ce   :  { %v1970_v15 = vpop.f32.mrb[122].mxu1  ;;  %3332 = vmatprep.subr.bf16.mxu0 %v3719_v0  ;;  %3372 = vmatprep.subr.bf16.mxu1 %v3719_v0 }
 0x3cf   :  { %v1972_v16 = vpop.f32.mrb[123].mxu1 }
 0x3d2   :  { %v1975_v17 = vpop.f32.mrb[124].mxu1 }
 0x3d3   :  { %v3333_v18 = vpack.c.bf16 %v1975_v17, %v1970_v15  ;;  %v1977_v36 = vpop.f32.mrb[125].mxu1 }
 0x3d4   :  { %v3592_v36 = vld [vmem:[#allocation2 + $0x78] sm:$0xff] }
 0x3d5   :  { %3334 = vmatpush1.bf16.msra.mxu0 %v3333_v18  ;;  %3388 = vmatpush1.bf16.msra.mxu1 %v3333_v18  ;;  %v3591_v18 = vld [vmem:[#allocation2 + $0x3c0] sm:$0xf] }
 0x3d6   :  { %v1980_v19 = vpop.f32.mrb[126].mxu1  ;;  %3335 = vmatprep.subr.bf16.mxu0 %v3719_v0  ;;  %3373 = vmatprep.subr.bf16.mxu1 %v3719_v0 }
 0x3d7   :  { %v1982_v21 = vpop.f32.mrb[127].mxu1 }
 0x3d8   :  { %v3593_v21 = vld [vmem:[#allocation2 + $0x98] sm:$0xff] }
 0x3da   :  { %v1985_v37 = vpop.f32.mrb[128].mxu1 }
 0x3db   :  { %v3336_v22 = vpack.c.bf16 %v1985_v37, %v1980_v19  ;;  %v1987_v23 = vpop.f32.mrb[129].mxu1 }
 0x3dc   :  { %v3595_v23 = vld [vmem:[#allocation2 + $0xb0] sm:$0xff] }
 0x3dd   :  { %3337 = vmatpush1.bf16.msra.mxu0 %v3336_v22  ;;  %3389 = vmatpush1.bf16.msra.mxu1 %v3336_v22  ;;  %v3594_v22 = vld [vmem:[#allocation2 + $0x90] sm:$0xff] }
 0x3de   :  { %v1990_v24 = vpop.f32.mrb[130].mxu1  ;;  %3338 = vmatprep.subr.bf16.mxu0 %v3719_v0  ;;  %3374 = vmatprep.subr.bf16.mxu1 %v3719_v0 }
 0x3df   :  { %v1992_v25 = vpop.f32.mrb[131].mxu1 }
 0x3e2   :  { %v1995_v26 = vpop.f32.mrb[132].mxu1 }
 0x3e3   :  { %v3339_v27 = vpack.c.bf16 %v1995_v26, %v1990_v24  ;;  %v1997_v28 = vpop.f32.mrb[133].mxu1 }
 0x3e4   :  { %v3597_v28 = vld [vmem:[#allocation2 + $0xc8] sm:$0xff] }
 0x3e5   :  { %3340 = vmatpush1.bf16.msra.mxu0 %v3339_v27  ;;  %3390 = vmatpush1.bf16.msra.mxu1 %v3339_v27  ;;  %v3596_v27 = vld [vmem:[#allocation2 + $0xa8] sm:$0xff] }
 0x3e6   :  { %v2000_v29 = vpop.f32.mrb[134].mxu1  ;;  %3341 = vmatprep.subr.bf16.mxu0 %v3719_v0  ;;  %3375 = vmatprep.subr.bf16.mxu1 %v3719_v0 }
 0x3e7   :  { %v2002_v30 = vpop.f32.mrb[135].mxu1 }
 0x3ea   :  { %v2005_v42 = vpop.f32.mrb[136].mxu1 }
 0x3eb   :  { %v3342_v46 = vpack.c.bf16 %v2005_v42, %v2000_v29  ;;  %v2007_v52 = vpop.f32.mrb[137].mxu1  ;;  %v3599_v42 = vld [vmem:[#allocation2 + $0xe0] sm:$0xff] }
 0x3ec   :  { %v3601_v52 = vld [vmem:[#allocation2 + $0xd8] sm:$0xff] }
 0x3ed   :  { %3343 = vmatpush1.bf16.msra.mxu0 %v3342_v46  ;;  %3391 = vmatpush1.bf16.msra.mxu1 %v3342_v46  ;;  %v3600_v46 = vld [vmem:[#allocation2 + $0x10] sm:$0xff] }
 0x3ee   :  { %v2010_v31 = vpop.f32.mrb[138].mxu1  ;;  %3344 = vmatprep.subr.bf16.mxu0 %v3719_v0  ;;  %3376 = vmatprep.subr.bf16.mxu1 %v3719_v0 }
 0x3ef   :  { %v2012_v54 = vpop.f32.mrb[139].mxu1 }
 0x3f0   :  { %v3603_v54 = vld [vmem:[#allocation2 + $0x28] sm:$0xff] }
 0x3f2   :  { %v2015_v12 = vpop.f32.mrb[140].mxu1 }
 0x3f3   :  { %v3345_v32 = vpack.c.bf16 %v2015_v12, %v2010_v31  ;;  %v2017_v33 = vpop.f32.mrb[141].mxu1  ;;  %v3602_v31 = vld [vmem:[#allocation2 + $0xf8] sm:$0xff]  ;;  %v3604_v12 = vld [vmem:[#allocation2 + $0xf0] sm:$0xff] }
 0x3f4   :  { %v3606_v33 = vld [vmem:[#allocation2 + $0x40] sm:$0xff] }
 0x3f5   :  { %3346 = vmatpush1.bf16.msra.mxu0 %v3345_v32  ;;  %3392 = vmatpush1.bf16.msra.mxu1 %v3345_v32  ;;  %v3605_v32 = vld [vmem:[#allocation2 + $0x110] sm:$0xff] }
 0x3f6   :  { %v2020_v34 = vpop.f32.mrb[142].mxu1  ;;  %3347 = vmatprep.subr.bf16.mxu0 %v3719_v0  ;;  %3377 = vmatprep.subr.bf16.mxu1 %v3719_v0 }
 0x3f7   :  { %v2022_v35 = vpop.f32.mrb[143].mxu1 }
 0x3f8   :  { %v3608_v35 = vld [vmem:[#allocation2 + $0x128] sm:$0xff] }
 0x3fa   :  { %v2025_v38 = vpop.f32.mrb[144].mxu1 }
 0x3fb   :  { %v3348_v39 = vpack.c.bf16 %v2025_v38, %v2020_v34  ;;  %v2027_v40 = vpop.f32.mrb[145].mxu1  ;;  %v3607_v34 = vld [vmem:[#allocation2 + $0x108] sm:$0xff]  ;;  %v3609_v38 = vld [vmem:[#allocation2 + $0x58] sm:$0xff] }
 0x3fc   :  { %v3611_v40 = vld [vmem:[#allocation2 + $0x140] sm:$0xff] }
 0x3fd   :  { %3349 = vmatpush1.bf16.msra.mxu0 %v3348_v39  ;;  %3393 = vmatpush1.bf16.msra.mxu1 %v3348_v39  ;;  %v3610_v39 = vld [vmem:[#allocation2 + $0x120] sm:$0xff] }
 0x3fe   :  { %v2030_v41 = vpop.f32.mrb[146].mxu1  ;;  %3350 = vmatprep.subr.bf16.mxu1 %v3719_v0 }
 0x3ff   :  { %v2032_v43 = vpop.f32.mrb[147].mxu1 }
 0x400   :  { %2324 = vmatmul.mubr.f32.vlgmr.msra.gmra.mrb[164].mxu1 %v3571_v44  ;;  %2149 = vmatmul.mubr.f32.vlgmr.msra.gmra.mrb[82].mxu0 %v3572_v45  ;;  %v3613_v43 = vld [vmem:[#allocation2 + $0x138] sm:$0xff]  ;;  %v3615_v45 = vld [vmem:[#allocation2 + $0x88] sm:$0xff] }
 0x401   :  { %2328 = vmatprep.mubr.f32.mxu1 %v3573_v47  ;;  %2153 = vmatprep.mubr.f32.mxu0 %v3574_v48  ;;  %v3614_v44 = vld [vmem:[#allocation2 + $0x158] sm:$0xff]  ;;  %v3616_v47 = vld [vmem:[#allocation2 + $0x150] sm:$0xff] }
 0x402   :  { %v2035_v49 = vpop.f32.mrb[148].mxu1  ;;  %v3617_v48 = vld [vmem:[#allocation2 + $0x170] sm:$0xff] }
 0x403   :  { %v3351_v50 = vpack.c.bf16 %v2035_v49, %v2030_v41  ;;  %v2037_v51 = vpop.f32.mrb[149].mxu1  ;;  %v3612_v41 = vld [vmem:[#allocation2 + $0x70] sm:$0xff]  ;;  %v3618_v49 = vld [vmem:[#allocation2 + $0xa0] sm:$0xff] }
 0x404   :  { %2329 = vmatmul.mubr.f32.gmra.mrb[166].mxu1 %v3575_v53  ;;  %2154 = vmatmul.mubr.f32.gmra.mrb[84].mxu0 %v3576_v55  ;;  %v3620_v51 = vld [vmem:[#allocation2 + $0x188] sm:$0xff]  ;;  %v3621_v53 = vld [vmem:[#allocation2 + $0xb8] sm:$0xff]  ;;  %v3622_v55 = vld [vmem:[#allocation2 + $0x180] sm:$0xff] }
 0x405   :  { %3352 = vmatpush3.bf16.msra.mxu1 %v3351_v50  ;;  %2333 = vmatprep.mubr.f32.mxu1 %v3577_v56  ;;  %v3619_v50 = vld [vmem:[#allocation2 + $0x168] sm:$0xff]  ;;  %v3623_v56 = vld [vmem:[#allocation2 + $0x1a0] sm:$0xff] }
 0x406   :  { %v2040_v57 = vpop.f32.mrb[150].mxu1  ;;  %3353 = vmatprep.subr.bf16.mxu1 %v3719_v0  ;;  %2158 = vmatprep.mubr.f32.mxu0 %v3578_v58  ;;  %v3625_v58 = vld [vmem:[#allocation2 + $0x198] sm:$0xff] }
 0x407   :  { %v2042_v59 = vpop.f32.mrb[151].mxu1 }
 0x408   :  { %2334 = vmatmul.mubr.f32.gmra.mrb[168].mxu1 %v3579_v60  ;;  %2159 = vmatmul.mubr.f32.gmra.mrb[86].mxu0 %v3580_v61  ;;  %v3626_v59 = vld [vmem:[#allocation2 + $0x1b8] sm:$0xff]  ;;  %v3627_v60 = vld [vmem:[#allocation2 + $0xe8] sm:$0xff]  ;;  %v3628_v61 = vld [vmem:[#allocation2 + $0x1b0] sm:$0xff] }
 0x409   :  { %2338 = vmatprep.mubr.f32.mxu1 %v3581_v62  ;;  %2163 = vmatprep.mubr.f32.mxu0 %v3582_v63  ;;  %v3629_v62 = vld [vmem:[#allocation2 + $0x1d0] sm:$0xff]  ;;  %v3630_v63 = vld [vmem:[#allocation2 + $0x100] sm:$0xff] }
 0x40a   :  { %v2045_v1 = vpop.f32.mrb[152].mxu1 }
 0x40b   :  { %v3354_v2 = vpack.c.bf16 %v2045_v1, %v2040_v57  ;;  %v2047_v3 = vpop.f32.mrb[153].mxu1  ;;  %v3624_v57 = vld [vmem:[#allocation2 + $0xd0] sm:$0xff]  ;;  %v3631_v1 = vld [vmem:[#allocation2 + $0x1c8] sm:$0xff] }
 0x40c   :  { %2339 = vmatmul.mubr.f32.gmra.mrb[170].mxu1 %v3583_v4  ;;  %2164 = vmatmul.mubr.f32.gmra.mrb[88].mxu0 %v3584_v5  ;;  %v3633_v3 = vld [vmem:[#allocation2 + $0x118] sm:$0xff]  ;;  %v3634_v4 = vld [vmem:[#allocation2 + $0x1e0] sm:$0xff] }
 0x40d   :  { %3355 = vmatpush3.bf16.msra.mxu1 %v3354_v2  ;;  %2343 = vmatprep.mubr.f32.mxu1 %v3585_v6  ;;  %v3632_v2 = vld [vmem:[#allocation2 + $0x1e8] sm:$0xff]  ;;  %v3635_v5 = vld [vmem:[#allocation2 + $0x200] sm:$0xff]  ;;  %v3636_v6 = vld [vmem:[#allocation2 + $0x130] sm:$0xff] }
 0x40e   :  { %v2050_v7 = vpop.f32.mrb[154].mxu1  ;;  %3356 = vmatprep.subr.bf16.mxu1 %v3719_v0  ;;  %2168 = vmatprep.mubr.f32.mxu0 %v3586_v8  ;;  %v3638_v8 = vld [vmem:[#allocation2 + $0x218] sm:$0xff] }
 0x40f   :  { %v2052_v9 = vpop.f32.mrb[155].mxu1 }
 0x410   :  { %2344 = vmatmul.mubr.f32.gmra.mrb[172].mxu1 %v3587_v10  ;;  %2169 = vmatmul.mubr.f32.gmra.mrb[90].mxu0 %v3588_v11  ;;  %v3639_v9 = vld [vmem:[#allocation2 + $0x148] sm:$0xff]  ;;  %v3640_v10 = vld [vmem:[#allocation2 + $0x210] sm:$0xff] }
 0x411   :  { %2348 = vmatprep.mubr.f32.mxu1 %v3589_v13  ;;  %2173 = vmatprep.mubr.f32.mxu0 %v3590_v14  ;;  %v3641_v11 = vld [vmem:[#allocation2 + $0x230] sm:$0xff]  ;;  %v3642_v13 = vld [vmem:[#allocation2 + $0x160] sm:$0xff]  ;;  %v3643_v14 = vld [vmem:[#allocation2 + $0x228] sm:$0xff] }
 0x412   :  { %v2055_v15 = vpop.f32.mrb[156].mxu1 }
 0x413   :  { %v3357_v16 = vpack.c.bf16 %v2055_v15, %v2050_v7  ;;  %v2057_v17 = vpop.f32.mrb[157].mxu1  ;;  %v3637_v7 = vld [vmem:[#allocation2 + $0x1f8] sm:$0xff]  ;;  %v3644_v15 = vld [vmem:[#allocation2 + $0x248] sm:$0xff] }
 0x414   :  { %2349 = vmatmul.mubr.f32.gmra.mrb[174].mxu1 %v3591_v18  ;;  %2174 = vmatmul.mubr.f32.gmra.mrb[92].mxu0 %v3592_v36  ;;  %v3646_v17 = vld [vmem:[#allocation2 + $0x240] sm:$0xff]  ;;  %v3648_v36 = vld [vmem:[#allocation2 + $0x190] sm:$0xff] }
 0x415   :  { %3358 = vmatpush3.bf16.msra.mxu1 %v3357_v16  ;;  %3055 = vmatprep.mubr.msk.f32.mxu1 %vm3721_vm1, %v3720_v20  ;;  %v3645_v16 = vld [vmem:[#allocation2 + $0x178] sm:$0xff]  ;;  %v3647_v18 = vld [vmem:[#allocation2 + $0x260] sm:$0xff] }
 0x416   :  { %v2060_v19 = vpop.f32.mrb[158].mxu1  ;;  %3359 = vmatprep.subr.bf16.mxu1 %v3719_v0  ;;  %2178 = vmatprep.mubr.f32.mxu0 %v3593_v21  ;;  %v3598_v0 = vld [vmem:[#allocation2 + $0xc0] sm:$0xff]  ;;  %v3650_v21 = vld [vmem:[#allocation2 + $0x278] sm:$0xff] }
 0x417   :  { %v2062_v37 = vpop.f32.mrb[159].mxu1 }
 0x418   :  { %2179 = vmatmul.mubr.f32.gmra.mrb[94].mxu0 %v3594_v22  ;;  %v3651_v37 = vld [vmem:[#allocation2 + $0x1a8] sm:$0xff]  ;;  %v3652_v22 = vld [vmem:[#allocation2 + $0x270] sm:$0xff] }
 0x419   :  { %2183 = vmatprep.mubr.f32.mxu0 %v3595_v23  ;;  %v3653_v23 = vld [vmem:[#allocation2 + $0x290] sm:$0xff] }
 0x41a   :  { %v2065_v24 = vpop.f32.mrb[160].mxu1 }
 0x41b   :  { %v3360_v25 = vpack.c.bf16 %v2065_v24, %v2060_v19  ;;  %v2067_v26 = vpop.f32.mrb[161].mxu1  ;;  %v3649_v19 = vld [vmem:[#allocation2 + $0x258] sm:$0xff]  ;;  %v3654_v24 = vld [vmem:[#allocation2 + $0x1c0] sm:$0xff] }
 0x41c   :  { %2184 = vmatmul.mubr.f32.gmra.mrb[96].mxu0 %v3596_v27  ;;  %v3656_v26 = vld [vmem:[#allocation2 + $0x2a8] sm:$0xff]  ;;  %v3657_v27 = vld [vmem:[#allocation2 + $0x1d8] sm:$0xff] }
 0x41d   :  { %3361 = vmatpush3.bf16.msra.mxu1 %v3360_v25  ;;  %2188 = vmatprep.mubr.f32.mxu0 %v3597_v28  ;;  %v3655_v25 = vld [vmem:[#allocation2 + $0x288] sm:$0xff]  ;;  %v3658_v28 = vld [vmem:[#allocation2 + $0x2a0] sm:$0xff] }
 0x41e   :  { %v2070_v29 = vpop.f32.mrb[162].mxu1  ;;  %3053 = vmatprep.subr.mxu1 %v3720_v20 }
 0x41f   :  { %v2072_v30 = vpop.f32.mrb[163].mxu1 }
 0x420   :  { %2189 = vmatmul.mubr.f32.gmra.mrb[98].mxu0 %v3598_v0  ;;  %v3660_v30 = vld [vmem:[#allocation2 + $0x1f0] sm:$0xff]  ;;  %v3661_v0 = vld [vmem:[#allocation2 + $0x2b8] sm:$0xff] }
 0x421   :  { %3054 = vmatpush3.msk.msra.mxu1 %vm331_vm0, %v2070_v29  ;;  %2193 = vmatprep.mubr.f32.mxu0 %v3599_v42  ;;  %v3659_v29 = vld [vmem:[#allocation2 + $0x2c0] sm:$0xff]  ;;  %v3662_v42 = vld [vmem:[#allocation2 + $0x2d8] sm:$0xff] }
 0x422   :  { %3056 = vmatmul.mubr.msk.f32.vlgmr.msra.gmra.mrb[176].mxu1 %vm207_vm2, %v3600_v46  ;;  %v3663_v46 = vld [vmem:[#allocation2 + $0x208] sm:$0xff] }
 0x423   :  { %3058 = vmatprep.mubr.msk.f32.mxu1 %vm3721_vm1, %v3720_v20 }
 0x424   :  { %2194 = vmatmul.mubr.f32.gmra.mrb[100].mxu0 %v3601_v52  ;;  %v3664_v52 = vld [vmem:[#allocation2 + $0x2d0] sm:$0xff] }
 0x425   :  { %2198 = vmatprep.mubr.f32.mxu0 %v3602_v31  ;;  %v3665_v31 = vld [vmem:[#allocation2 + $0x2f0] sm:$0xff] }
 0x426   :  { %3059 = vmatmul.mubr.msk.f32.gmra.mrb[178].mxu1 %vm207_vm2, %v3603_v54  ;;  %v3666_v54 = vld [vmem:[#allocation2 + $0x220] sm:$0xff] }
 0x427   :  { %3061 = vmatprep.mubr.msk.f32.mxu1 %vm3721_vm1, %v3720_v20 }
 0x428   :  { %2199 = vmatmul.mubr.f32.gmra.mrb[102].mxu0 %v3604_v12  ;;  %v3667_v12 = vld [vmem:[#allocation2 + $0x2e8] sm:$0xff] }
 0x429   :  { %2203 = vmatprep.mubr.f32.mxu0 %v3605_v32  ;;  %v3668_v32 = vld [vmem:[#allocation2 + $0x308] sm:$0xff] }
 0x42a   :  { %3062 = vmatmul.mubr.msk.f32.gmra.mrb[180].mxu1 %vm207_vm2, %v3606_v33  ;;  %v3669_v33 = vld [vmem:[#allocation2 + $0x238] sm:$0xff] }
 0x42b   :  { %3064 = vmatprep.mubr.msk.f32.mxu1 %vm3721_vm1, %v3720_v20 }
 0x42c   :  { %2204 = vmatmul.mubr.f32.gmra.mrb[104].mxu0 %v3607_v34  ;;  %v3670_v34 = vld [vmem:[#allocation2 + $0x300] sm:$0xff] }
 0x42d   :  { %2208 = vmatprep.mubr.f32.mxu0 %v3608_v35  ;;  %v3671_v35 = vld [vmem:[#allocation2 + $0x320] sm:$0xff] }
 0x42e   :  { %3065 = vmatmul.mubr.msk.f32.gmra.mrb[182].mxu1 %vm207_vm2, %v3609_v38  ;;  %v3672_v38 = vld [vmem:[#allocation2 + $0x250] sm:$0xff] }
 0x42f   :  { %3067 = vmatprep.mubr.msk.f32.mxu1 %vm3721_vm1, %v3720_v20 }
 0x430   :  { %2209 = vmatmul.mubr.f32.gmra.mrb[106].mxu0 %v3610_v39  ;;  %v3673_v39 = vld [vmem:[#allocation2 + $0x318] sm:$0xff] }
 0x431   :  { %2213 = vmatprep.mubr.f32.mxu0 %v3611_v40  ;;  %v3674_v40 = vld [vmem:[#allocation2 + $0x338] sm:$0xff] }
 0x432   :  { %3068 = vmatmul.mubr.msk.f32.gmra.mrb[184].mxu1 %vm207_vm2, %v3612_v41  ;;  %v3675_v41 = vld [vmem:[#allocation2 + $0x268] sm:$0xff] }
 0x433   :  { %3070 = vmatprep.mubr.msk.f32.mxu1 %vm3721_vm1, %v3720_v20 }
 0x434   :  { %2214 = vmatmul.mubr.f32.gmra.mrb[108].mxu0 %v3613_v43  ;;  %v3676_v43 = vld [vmem:[#allocation2 + $0x330] sm:$0xff] }
 0x435   :  { %2218 = vmatprep.mubr.f32.mxu0 %v3614_v44  ;;  %v3677_v44 = vld [vmem:[#allocation2 + $0x280] sm:$0xff] }
 0x436   :  { %3071 = vmatmul.mubr.msk.f32.gmra.mrb[186].mxu1 %vm207_vm2, %v3615_v45  ;;  %v3678_v45 = vld [vmem:[#allocation2 + $0x298] sm:$0xff] }
 0x437   :  { %3073 = vmatprep.mubr.msk.f32.mxu1 %vm3721_vm1, %v3720_v20 }
 0x438   :  { %2219 = vmatmul.mubr.f32.gmra.mrb[110].mxu0 %v3616_v47  ;;  %v3679_v47 = vld [vmem:[#allocation2 + $0x2b0] sm:$0xff] }
 0x439   :  { %2223 = vmatprep.mubr.f32.mxu0 %v3617_v48  ;;  %v3680_v48 = vld [vmem:[#allocation2 + $0x2c8] sm:$0xff] }
 0x43a   :  { %3074 = vmatmul.mubr.msk.f32.gmra.mrb[188].mxu1 %vm207_vm2, %v3618_v49  ;;  %v3681_v49 = vld [vmem:[#allocation2 + $0x2e0] sm:$0xff] }
 0x43b   :  { %3076 = vmatprep.mubr.msk.f32.mxu1 %vm3721_vm1, %v3720_v20 }
 0x43c   :  { %2224 = vmatmul.mubr.f32.gmra.mrb[112].mxu0 %v3619_v50  ;;  %v3682_v50 = vld [vmem:[#allocation2 + $0x2f8] sm:$0xff] }
 0x43d   :  { %2228 = vmatprep.mubr.f32.mxu0 %v3620_v51  ;;  %v3683_v51 = vld [vmem:[#allocation2 + $0x310] sm:$0xff] }
 0x43e   :  { %3077 = vmatmul.mubr.msk.f32.gmra.mrb[190].mxu1 %vm207_vm2, %v3621_v53  ;;  %v3684_v53 = vld [vmem:[#allocation2 + $0x328] sm:$0xff] }
 0x43f   :  { %3079 = vmatprep.mubr.msk.f32.mxu1 %vm3721_vm1, %v3720_v20 }
 0x440   :  { %2229 = vmatmul.mubr.f32.gmra.mrb[114].mxu0 %v3622_v55  ;;  %v3685_v55 = vld [vmem:[#allocation2 + $0x340] sm:$0xff] }
 0x441   :  { %2233 = vmatprep.mubr.f32.mxu0 %v3623_v56  ;;  %v3686_v56 = vld [vmem:[#allocation2 + $0x358] sm:$0xff] }
 0x442   :  { %3080 = vmatmul.mubr.msk.f32.gmra.mrb[192].mxu1 %vm207_vm2, %v3624_v57  ;;  %v3687_v57 = vld [vmem:[#allocation2 + $0x370] sm:$0xff] }
 0x443   :  { %3082 = vmatprep.mubr.msk.f32.mxu1 %vm3721_vm1, %v3720_v20 }
 0x444   :  { %2234 = vmatmul.mubr.f32.gmra.mrb[116].mxu0 %v3625_v58  ;;  %v3688_v58 = vld [vmem:[#allocation2 + $0x388] sm:$0xff] }
 0x445   :  { %2238 = vmatprep.mubr.f32.mxu0 %v3626_v59  ;;  %v3689_v59 = vld [vmem:[#allocation2 + $0x3a0] sm:$0xff] }
 0x446   :  { %3083 = vmatmul.mubr.msk.f32.gmra.mrb[194].mxu1 %vm207_vm2, %v3627_v60  ;;  %v3690_v60 = vld [vmem:[#allocation2 + $0x3b8] sm:$0xff] }
 0x447   :  { %3085 = vmatprep.mubr.msk.f32.mxu1 %vm3721_vm1, %v3720_v20 }
 0x448   :  { %2239 = vmatmul.mubr.f32.gmra.mrb[118].mxu0 %v3628_v61  ;;  %v3691_v61 = vld [vmem:[#allocation2 + $0x3d0] sm:$0xf] }
 0x449   :  { %2243 = vmatprep.mubr.f32.mxu0 %v3629_v62 }
 0x44a   :  { %3086 = vmatmul.mubr.msk.f32.gmra.mrb[196].mxu1 %vm207_vm2, %v3630_v63 }
 0x44b   :  { %3088 = vmatprep.mubr.msk.f32.mxu1 %vm3721_vm1, %v3720_v20 }
 0x44c   :  { %2244 = vmatmul.mubr.f32.gmra.mrb[120].mxu0 %v3631_v1 }
 0x44d   :  { %2248 = vmatprep.mubr.f32.mxu0 %v3632_v2 }
 0x44e   :  { %3089 = vmatmul.mubr.msk.f32.gmra.mrb[198].mxu1 %vm207_vm2, %v3633_v3 }
 0x44f   :  { %3091 = vmatprep.mubr.msk.f32.mxu1 %vm3721_vm1, %v3720_v20 }
 0x450   :  { %2249 = vmatmul.mubr.f32.gmra.mrb[122].mxu0 %v3634_v4 }
 0x451   :  { %2253 = vmatprep.mubr.f32.mxu0 %v3635_v5 }
 0x452   :  { %3092 = vmatmul.mubr.msk.f32.gmra.mrb[200].mxu1 %vm207_vm2, %v3636_v6 }
 0x453   :  { %3094 = vmatprep.mubr.msk.f32.mxu1 %vm3721_vm1, %v3720_v20 }
 0x454   :  { %2254 = vmatmul.mubr.f32.gmra.mrb[124].mxu0 %v3637_v7 }
 0x455   :  { %2258 = vmatprep.mubr.f32.mxu0 %v3638_v8 }
 0x456   :  { %3095 = vmatmul.mubr.msk.f32.gmra.mrb[202].mxu1 %vm207_vm2, %v3639_v9 }
 0x457   :  { %3097 = vmatprep.mubr.msk.f32.mxu1 %vm3721_vm1, %v3720_v20 }
 0x458   :  { %2259 = vmatmul.mubr.f32.gmra.mrb[126].mxu0 %v3640_v10 }
 0x459   :  { %2263 = vmatprep.mubr.f32.mxu0 %v3641_v11 }
 0x45a   :  { %3098 = vmatmul.mubr.msk.f32.gmra.mrb[204].mxu1 %vm207_vm2, %v3642_v13 }
 0x45b   :  { %3100 = vmatprep.mubr.msk.f32.mxu1 %vm3721_vm1, %v3720_v20 }
 0x45c   :  { %2264 = vmatmul.mubr.f32.gmra.mrb[128].mxu0 %v3643_v14 }
 0x45d   :  { %2268 = vmatprep.mubr.f32.mxu0 %v3644_v15 }
 0x45e   :  { %3101 = vmatmul.mubr.msk.f32.gmra.mrb[206].mxu1 %vm207_vm2, %v3645_v16 }
 0x45f   :  { %3103 = vmatprep.mubr.msk.f32.mxu1 %vm3721_vm1, %v3720_v20 }
 0x460   :  { %2269 = vmatmul.mubr.f32.gmra.mrb[130].mxu0 %v3646_v17 }
 0x461   :  { %2273 = vmatprep.mubr.f32.mxu0 %v3647_v18 }
 0x462   :  { %3104 = vmatmul.mubr.msk.f32.gmra.mrb[208].mxu1 %vm207_vm2, %v3648_v36 }
 0x463   :  { %3106 = vmatprep.mubr.msk.f32.mxu1 %vm3721_vm1, %v3720_v20 }
 0x464   :  { %2274 = vmatmul.mubr.f32.gmra.mrb[132].mxu0 %v3649_v19 }
 0x465   :  { %2278 = vmatprep.mubr.f32.mxu0 %v3650_v21 }
 0x466   :  { %3107 = vmatmul.mubr.msk.f32.gmra.mrb[210].mxu1 %vm207_vm2, %v3651_v37 }
 0x467   :  { %3109 = vmatprep.mubr.msk.f32.mxu1 %vm3721_vm1, %v3720_v20 }
 0x468   :  { %2279 = vmatmul.mubr.f32.gmra.mrb[134].mxu0 %v3652_v22 }
 0x469   :  { %2283 = vmatprep.mubr.f32.mxu0 %v3653_v23 }
 0x46a   :  { %3110 = vmatmul.mubr.msk.f32.gmra.mrb[212].mxu1 %vm207_vm2, %v3654_v24 }
 0x46b   :  { %3112 = vmatprep.mubr.msk.f32.mxu1 %vm3721_vm1, %v3720_v20 }
 0x46c   :  { %2284 = vmatmul.mubr.f32.gmra.mrb[136].mxu0 %v3655_v25 }
 0x46d   :  { %2288 = vmatprep.mubr.f32.mxu0 %v3656_v26 }
 0x46e   :  { %3113 = vmatmul.mubr.msk.f32.gmra.mrb[214].mxu1 %vm207_vm2, %v3657_v27 }
 0x46f   :  { %3115 = vmatprep.mubr.msk.f32.mxu1 %vm3721_vm1, %v3720_v20 }
 0x470   :  { %2289 = vmatmul.mubr.f32.gmra.mrb[138].mxu0 %v3658_v28 }
 0x471   :  { %2293 = vmatprep.mubr.f32.mxu0 %v3659_v29 }
 0x472   :  { %3116 = vmatmul.mubr.msk.f32.gmra.mrb[216].mxu1 %vm207_vm2, %v3660_v30 }
 0x473   :  { %3118 = vmatprep.mubr.msk.f32.mxu1 %vm3721_vm1, %v3720_v20 }
 0x474   :  { %2294 = vmatmul.mubr.f32.gmra.mrb[140].mxu0 %v3661_v0 }
 0x475   :  { %2298 = vmatprep.mubr.f32.mxu0 %v3662_v42 }
 0x476   :  { %3119 = vmatmul.mubr.msk.f32.gmra.mrb[218].mxu1 %vm207_vm2, %v3663_v46 }
 0x477   :  { %3121 = vmatprep.mubr.msk.f32.mxu1 %vm3721_vm1, %v3720_v20 }
 0x478   :  { %2299 = vmatmul.mubr.f32.gmra.mrb[142].mxu0 %v3664_v52 }
 0x479   :  { %2303 = vmatprep.mubr.f32.mxu0 %v3665_v31 }
 0x47a   :  { %3122 = vmatmul.mubr.msk.f32.gmra.mrb[220].mxu1 %vm207_vm2, %v3666_v54 }
 0x47b   :  { %3124 = vmatprep.mubr.msk.f32.mxu1 %vm3721_vm1, %v3720_v20 }
 0x47c   :  { %2304 = vmatmul.mubr.f32.gmra.mrb[144].mxu0 %v3667_v12 }
 0x47d   :  { %2308 = vmatprep.mubr.f32.mxu0 %v3668_v32 }
 0x47e   :  { %3125 = vmatmul.mubr.msk.f32.gmra.mrb[222].mxu1 %vm207_vm2, %v3669_v33 }
 0x47f   :  { %3127 = vmatprep.mubr.msk.f32.mxu1 %vm3721_vm1, %v3720_v20 }
 0x480   :  { %2309 = vmatmul.mubr.f32.gmra.mrb[146].mxu0 %v3670_v34 }
 0x481   :  { %2313 = vmatprep.mubr.f32.mxu0 %v3671_v35 }
 0x482   :  { %3128 = vmatmul.mubr.msk.f32.gmra.mrb[224].mxu1 %vm207_vm2, %v3672_v38 }
 0x483   :  { %3130 = vmatprep.mubr.msk.f32.mxu1 %vm3721_vm1, %v3720_v20 }
 0x484   :  { %2314 = vmatmul.mubr.f32.gmra.mrb[148].mxu0 %v3673_v39 }
 0x485   :  { %2318 = vmatprep.mubr.f32.mxu0 %v3674_v40 }
 0x486   :  { %3131 = vmatmul.mubr.msk.f32.gmra.mrb[226].mxu1 %vm207_vm2, %v3675_v41 }
 0x487   :  { %3133 = vmatprep.mubr.msk.f32.mxu1 %vm3721_vm1, %v3720_v20 }
 0x488   :  { %2319 = vmatmul.mubr.f32.gmra.mrb[150].mxu0 %v3676_v43 }
 0x48a   :  { %3134 = vmatmul.mubr.msk.f32.gmra.mrb[228].mxu1 %vm207_vm2, %v3677_v44 }
 0x48b   :  { %3136 = vmatprep.mubr.msk.f32.mxu1 %vm3721_vm1, %v3720_v20 }
 0x48e   :  { %3137 = vmatmul.mubr.msk.f32.gmra.mrb[230].mxu1 %vm207_vm2, %v3678_v45 }
 0x48f   :  { %3139 = vmatprep.mubr.msk.f32.mxu1 %vm3721_vm1, %v3720_v20 }
 0x492   :  { %3140 = vmatmul.mubr.msk.f32.gmra.mrb[232].mxu1 %vm207_vm2, %v3679_v47 }
 0x493   :  { %3142 = vmatprep.mubr.msk.f32.mxu1 %vm3721_vm1, %v3720_v20 }
 0x496   :  { %3143 = vmatmul.mubr.msk.f32.gmra.mrb[234].mxu1 %vm207_vm2, %v3680_v48 }
 0x497   :  { %3145 = vmatprep.mubr.msk.f32.mxu1 %vm3721_vm1, %v3720_v20 }
 0x49a   :  { %3146 = vmatmul.mubr.msk.f32.gmra.mrb[236].mxu1 %vm207_vm2, %v3681_v49 }
 0x49b   :  { %3148 = vmatprep.mubr.msk.f32.mxu1 %vm3721_vm1, %v3720_v20 }
 0x49e   :  { %3149 = vmatmul.mubr.msk.f32.gmra.mrb[238].mxu1 %vm207_vm2, %v3682_v50 }
 0x49f   :  { %3151 = vmatprep.mubr.msk.f32.mxu1 %vm3721_vm1, %v3720_v20 }
 0x4a2   :  { %3152 = vmatmul.mubr.msk.f32.gmra.mrb[240].mxu1 %vm207_vm2, %v3683_v51 }
 0x4a3   :  { %3154 = vmatprep.mubr.msk.f32.mxu1 %vm3721_vm1, %v3720_v20 }
 0x4a6   :  { %3155 = vmatmul.mubr.msk.f32.gmra.mrb[242].mxu1 %vm207_vm2, %v3684_v53 }
 0x4a7   :  { %3157 = vmatprep.mubr.msk.f32.mxu1 %vm3721_vm1, %v3720_v20 }
 0x4aa   :  { %3158 = vmatmul.mubr.msk.f32.gmra.mrb[244].mxu1 %vm207_vm2, %v3685_v55 }
 0x4ab   :  { %3160 = vmatprep.mubr.msk.f32.mxu1 %vm3721_vm1, %v3720_v20 }
 0x4ae   :  { %3161 = vmatmul.mubr.msk.f32.gmra.mrb[164].mxu1 %vm207_vm2, %v3686_v56 }
 0x4af   :  { %3163 = vmatprep.mubr.msk.f32.mxu1 %vm3721_vm1, %v3720_v20 }
 0x4b2   :  { %3164 = vmatmul.mubr.msk.f32.gmra.mrb[166].mxu1 %vm207_vm2, %v3687_v57 }
 0x4b3   :  { %3166 = vmatprep.mubr.msk.f32.mxu1 %vm3721_vm1, %v3720_v20 }
 0x4b6   :  { %3167 = vmatmul.mubr.msk.f32.gmra.mrb[168].mxu1 %vm207_vm2, %v3688_v58 }
 0x4b7   :  { %3169 = vmatprep.mubr.msk.f32.mxu1 %vm3721_vm1, %v3720_v20 }
 0x4ba   :  { %3170 = vmatmul.mubr.msk.f32.gmra.mrb[170].mxu1 %vm207_vm2, %v3689_v59 }
 0x4bb   :  { %3172 = vmatprep.mubr.msk.f32.mxu1 %vm3721_vm1, %v3720_v20 }
 0x4be   :  { %3173 = vmatmul.mubr.msk.f32.gmra.mrb[172].mxu1 %vm207_vm2, %v3690_v60 }
 0x4bf   :  { %3175 = vmatprep.mubr.msk.f32.mxu1 %vm3721_vm1, %v3720_v20  ;;  %v4724_v20 = vld [vmem:[%s4897_s7] ss:$0 sm:$0xff] }
 0x4c2   :  { %3176 = vmatmul.mubr.msk.f32.gmra.mrb[174].mxu1 %vm207_vm2, %v3691_v61 }
 0x4d3   :  { %v2150_v62 = vpop.f32.mrb[82].mxu0 }
 0x4d4   :  { %v2152_v63 = vpop.f32.mrb[83].mxu0  ;;  %v2151_v16 = vadd.f32 %v4724_v20, %v2150_v62 }
 0x4d7   :  { %v2155_v1 = vpop.f32.mrb[84].mxu0 }
 0x4d8   :  { %v2157_v2 = vpop.f32.mrb[85].mxu0  ;;  %v2156_v37 = vadd.f32 %v4724_v20, %v2155_v1 }
 0x4db   :  { %v2160_v3 = vpop.f32.mrb[86].mxu0 }
 0x4dc   :  { %v2162_v4 = vpop.f32.mrb[87].mxu0  ;;  %v2161_v27 = vadd.f32 %v4724_v20, %v2160_v3 }
 0x4df   :  { %v2165_v5 = vpop.f32.mrb[88].mxu0 }
 0x4e0   :  { %v2167_v6 = vpop.f32.mrb[89].mxu0  ;;  %v2166_v46 = vadd.f32 %v4724_v20, %v2165_v5 }
 0x4e3   :  { %v2170_v7 = vpop.f32.mrb[90].mxu0 }
 0x4e4   :  { %v2172_v8 = vpop.f32.mrb[91].mxu0  ;;  %v2171_v33 = vadd.f32 %v4724_v20, %v2170_v7 }
 0x4e7   :  { %v2175_v9 = vpop.f32.mrb[92].mxu0 }
 0x4e8   :  { %v2177_v10 = vpop.f32.mrb[93].mxu0  ;;  %v2176_v41 = vadd.f32 %v4724_v20, %v2175_v9 }
 0x4eb   :  { %v2180_v11 = vpop.f32.mrb[94].mxu0 }
 0x4ec   :  { %v2182_v13 = vpop.f32.mrb[95].mxu0  ;;  %v2181_v49 = vadd.f32 %v4724_v20, %v2180_v11 }
 0x4ef   :  { %v2185_v14 = vpop.f32.mrb[96].mxu0 }
 0x4f0   :  { %v2187_v15 = vpop.f32.mrb[97].mxu0  ;;  %v2186_v57 = vadd.f32 %v4724_v20, %v2185_v14 }
 0x4f3   :  { %v2190_v17 = vpop.f32.mrb[98].mxu0 }
 0x4f4   :  { %v2192_v18 = vpop.f32.mrb[99].mxu0  ;;  %v2191_v63 = vadd.f32 %v4724_v20, %v2190_v17 }
 0x4f5   :  { %v2420_v36 = vpop.f32.mrb[176].mxu1 }
 0x4f6   :  { %v2421_v19 = vadd.f32 %v2420_v36, %v2151_v16  ;;  %v3057_v21 = vpop.f32.mrb[177].mxu1 }
 0x4f7   :  { %v2195_v22 = vpop.f32.mrb[100].mxu0 }
 0x4f8   :  { %2624 = vst [vmem:[%s4898_s8] sm:$0xff] %v2421_v19  ;;  %v2197_v23 = vpop.f32.mrb[101].mxu0  ;;  %v2196_v6 = vadd.f32 %v4724_v20, %v2195_v22 }
 0x4f9   :  { %v2425_v24 = vpop.f32.mrb[178].mxu1 }
 0x4fa   :  { %v2426_v25 = vadd.f32 %v2425_v24, %v2156_v37  ;;  %v3060_v26 = vpop.f32.mrb[179].mxu1 }
 0x4fb   :  { %v2200_v28 = vpop.f32.mrb[102].mxu0 }
 0x4fc   :  { %2625 = vst [vmem:[%s4898_s8 + $0x8] sm:$0xff] %v2426_v25  ;;  %v2202_v29 = vpop.f32.mrb[103].mxu0  ;;  %v2201_v13 = vadd.f32 %v4724_v20, %v2200_v28 }
 0x4fd   :  { %v2430_v30 = vpop.f32.mrb[180].mxu1 }
 0x4fe   :  { %v2431_v0 = vadd.f32 %v2430_v30, %v2161_v27  ;;  %v3063_v42 = vpop.f32.mrb[181].mxu1 }
 0x4ff   :  { %v2205_v52 = vpop.f32.mrb[104].mxu0 }
 0x500   :  { %2626 = vst [vmem:[%s4898_s8 + $0x10] sm:$0xff] %v2431_v0  ;;  %v2207_v31 = vpop.f32.mrb[105].mxu0  ;;  %v2206_v36 = vadd.f32 %v4724_v20, %v2205_v52 }
 0x501   :  { %v2435_v54 = vpop.f32.mrb[182].mxu1 }
 0x502   :  { %v2436_v12 = vadd.f32 %v2435_v54, %v2166_v46  ;;  %v3066_v32 = vpop.f32.mrb[183].mxu1 }
 0x503   :  { %v2210_v34 = vpop.f32.mrb[106].mxu0 }
 0x504   :  { %2627 = vst [vmem:[%s4898_s8 + $0x18] sm:$0xff] %v2436_v12  ;;  %v2212_v35 = vpop.f32.mrb[107].mxu0  ;;  %v2211_v24 = vadd.f32 %v4724_v20, %v2210_v34 }
 0x505   :  { %v2440_v38 = vpop.f32.mrb[184].mxu1 }
 0x506   :  { %v2441_v39 = vadd.f32 %v2440_v38, %v2171_v33  ;;  %v3069_v40 = vpop.f32.mrb[185].mxu1 }
 0x507   :  { %v2215_v43 = vpop.f32.mrb[108].mxu0 }
 0x508   :  { %2628 = vst [vmem:[%s4898_s8 + $0x20] sm:$0xff] %v2441_v39  ;;  %v2217_v44 = vpop.f32.mrb[109].mxu0  ;;  %v2216_v30 = vadd.f32 %v4724_v20, %v2215_v43 }
 0x509   :  { %v2445_v45 = vpop.f32.mrb[186].mxu1 }
 0x50a   :  { %v2446_v47 = vadd.f32 %v2445_v45, %v2176_v41  ;;  %v3072_v48 = vpop.f32.mrb[187].mxu1 }
 0x50b   :  { %v2220_v50 = vpop.f32.mrb[110].mxu0 }
 0x50c   :  { %2629 = vst [vmem:[%s4898_s8 + $0x28] sm:$0xff] %v2446_v47  ;;  %v2222_v51 = vpop.f32.mrb[111].mxu0  ;;  %v2221_v54 = vadd.f32 %v4724_v20, %v2220_v50 }
 0x50d   :  { %v2450_v53 = vpop.f32.mrb[188].mxu1 }
 0x50e   :  { %v2451_v55 = vadd.f32 %v2450_v53, %v2181_v49  ;;  %v3075_v56 = vpop.f32.mrb[189].mxu1 }
 0x50f   :  { %v2225_v58 = vpop.f32.mrb[112].mxu0 }
 0x510   :  { %2630 = vst [vmem:[%s4898_s8 + $0x30] sm:$0xff] %v2451_v55  ;;  %v2227_v59 = vpop.f32.mrb[113].mxu0  ;;  %v2226_v38 = vadd.f32 %v4724_v20, %v2225_v58 }
 0x511   :  { %v2455_v60 = vpop.f32.mrb[190].mxu1 }
 0x512   :  { %v2456_v61 = vadd.f32 %v2455_v60, %v2186_v57  ;;  %v3078_v62 = vpop.f32.mrb[191].mxu1 }
 0x513   :  { %v2230_v1 = vpop.f32.mrb[114].mxu0 }
 0x514   :  { %2631 = vst [vmem:[%s4898_s8 + $0x38] sm:$0xff] %v2456_v61  ;;  %v2232_v2 = vpop.f32.mrb[115].mxu0  ;;  %v2231_v45 = vadd.f32 %v4724_v20, %v2230_v1 }
 0x515   :  { %v2460_v3 = vpop.f32.mrb[192].mxu1 }
 0x516   :  { %v2461_v4 = vadd.f32 %v2460_v3, %v2191_v63  ;;  %v3081_v5 = vpop.f32.mrb[193].mxu1 }
 0x517   :  { %v2235_v7 = vpop.f32.mrb[116].mxu0 }
 0x518   :  { %2632 = vst [vmem:[%s4898_s8 + $0x40] sm:$0xff] %v2461_v4  ;;  %v2237_v8 = vpop.f32.mrb[117].mxu0  ;;  %v2236_v53 = vadd.f32 %v4724_v20, %v2235_v7 }
 0x519   :  { %v2465_v9 = vpop.f32.mrb[194].mxu1 }
 0x51a   :  { %v2466_v10 = vadd.f32 %v2465_v9, %v2196_v6  ;;  %v3084_v11 = vpop.f32.mrb[195].mxu1 }
 0x51b   :  { %v2240_v14 = vpop.f32.mrb[118].mxu0 }
 0x51c   :  { %2633 = vst [vmem:[%s4898_s8 + $0x48] sm:$0xff] %v2466_v10  ;;  %v2242_v15 = vpop.f32.mrb[119].mxu0  ;;  %v2241_v60 = vadd.f32 %v4724_v20, %v2240_v14 }
 0x51d   :  { %v2470_v16 = vpop.f32.mrb[196].mxu1 }
 0x51e   :  { %v2471_v17 = vadd.f32 %v2470_v16, %v2201_v13  ;;  %v3087_v18 = vpop.f32.mrb[197].mxu1 }
 0x51f   :  { %v2245_v19 = vpop.f32.mrb[120].mxu0 }
 0x520   :  { %2634 = vst [vmem:[%s4898_s8 + $0x50] sm:$0xff] %v2471_v17  ;;  %v2247_v21 = vpop.f32.mrb[121].mxu0  ;;  %v2246_v3 = vadd.f32 %v4724_v20, %v2245_v19 }
 0x521   :  { %v2475_v37 = vpop.f32.mrb[198].mxu1 }
 0x522   :  { %v2476_v22 = vadd.f32 %v2475_v37, %v2206_v36  ;;  %v3090_v23 = vpop.f32.mrb[199].mxu1 }
 0x523   :  { %v2250_v25 = vpop.f32.mrb[122].mxu0 }
 0x524   :  { %2635 = vst [vmem:[%s4898_s8 + $0x58] sm:$0xff] %v2476_v22  ;;  %v2252_v26 = vpop.f32.mrb[123].mxu0  ;;  %v2251_v9 = vadd.f32 %v4724_v20, %v2250_v25 }
 0x525   :  { %v2480_v27 = vpop.f32.mrb[200].mxu1 }
 0x526   :  { %v2481_v28 = vadd.f32 %v2480_v27, %v2211_v24  ;;  %v3093_v29 = vpop.f32.mrb[201].mxu1 }
 0x527   :  { %v2255_v0 = vpop.f32.mrb[124].mxu0 }
 0x528   :  { %2636 = vst [vmem:[%s4898_s8 + $0x60] sm:$0xff] %v2481_v28  ;;  %v2257_v42 = vpop.f32.mrb[125].mxu0  ;;  %v2256_v16 = vadd.f32 %v4724_v20, %v2255_v0 }
 0x529   :  { %v2485_v46 = vpop.f32.mrb[202].mxu1 }
 0x52a   :  { %v2486_v52 = vadd.f32 %v2485_v46, %v2216_v30  ;;  %v3096_v31 = vpop.f32.mrb[203].mxu1 }
 0x52b   :  { %v2260_v12 = vpop.f32.mrb[126].mxu0 }
 0x52c   :  { %2637 = vst [vmem:[%s4898_s8 + $0x68] sm:$0xff] %v2486_v52  ;;  %v2262_v32 = vpop.f32.mrb[127].mxu0  ;;  %v2261_v37 = vadd.f32 %v4724_v20, %v2260_v12 }
 0x52d   :  { %v2490_v33 = vpop.f32.mrb[204].mxu1 }
 0x52e   :  { %v2491_v34 = vadd.f32 %v2490_v33, %v2221_v54  ;;  %v3099_v35 = vpop.f32.mrb[205].mxu1 }
 0x52f   :  { %v2265_v39 = vpop.f32.mrb[128].mxu0 }
 0x530   :  { %2638 = vst [vmem:[%s4898_s8 + $0x70] sm:$0xff] %v2491_v34  ;;  %v2267_v40 = vpop.f32.mrb[129].mxu0  ;;  %v2266_v27 = vadd.f32 %v4724_v20, %v2265_v39 }
 0x531   :  { %v2495_v41 = vpop.f32.mrb[206].mxu1 }
 0x532   :  { %v2496_v43 = vadd.f32 %v2495_v41, %v2226_v38  ;;  %v3102_v44 = vpop.f32.mrb[207].mxu1 }
 0x533   :  { %v2270_v47 = vpop.f32.mrb[130].mxu0 }
 0x534   :  { %2639 = vst [vmem:[%s4898_s8 + $0x78] sm:$0xff] %v2496_v43  ;;  %v2272_v48 = vpop.f32.mrb[131].mxu0  ;;  %v2271_v46 = vadd.f32 %v4724_v20, %v2270_v47 }
 0x535   :  { %v2500_v49 = vpop.f32.mrb[208].mxu1 }
 0x536   :  { %v2501_v50 = vadd.f32 %v2500_v49, %v2231_v45  ;;  %v3105_v51 = vpop.f32.mrb[209].mxu1 }
 0x537   :  { %v2275_v55 = vpop.f32.mrb[132].mxu0 }
 0x538   :  { %2640 = vst [vmem:[%s4898_s8 + $0x80] sm:$0xff] %v2501_v50  ;;  %v2277_v56 = vpop.f32.mrb[133].mxu0  ;;  %v2276_v33 = vadd.f32 %v4724_v20, %v2275_v55 }
 0x539   :  { %v2505_v57 = vpop.f32.mrb[210].mxu1 }
 0x53a   :  { %v2506_v58 = vadd.f32 %v2505_v57, %v2236_v53  ;;  %v3108_v59 = vpop.f32.mrb[211].mxu1 }
 0x53b   :  { %v2280_v61 = vpop.f32.mrb[134].mxu0 }
 0x53c   :  { %2641 = vst [vmem:[%s4898_s8 + $0x88] sm:$0xff] %v2506_v58  ;;  %v2282_v62 = vpop.f32.mrb[135].mxu0  ;;  %v2281_v41 = vadd.f32 %v4724_v20, %v2280_v61 }
 0x53d   :  { %v2510_v63 = vpop.f32.mrb[212].mxu1 }
 0x53e   :  { %v2511_v1 = vadd.f32 %v2510_v63, %v2241_v60  ;;  %v3111_v2 = vpop.f32.mrb[213].mxu1 }
 0x53f   :  { %v2285_v4 = vpop.f32.mrb[136].mxu0 }
 0x540   :  { %2642 = vst [vmem:[%s4898_s8 + $0x90] sm:$0xff] %v2511_v1  ;;  %v2287_v5 = vpop.f32.mrb[137].mxu0  ;;  %v2286_v49 = vadd.f32 %v4724_v20, %v2285_v4 }
 0x541   :  { %v2515_v6 = vpop.f32.mrb[214].mxu1 }
 0x542   :  { %v2516_v7 = vadd.f32 %v2515_v6, %v2246_v3  ;;  %v3114_v8 = vpop.f32.mrb[215].mxu1 }
 0x543   :  { %v2290_v10 = vpop.f32.mrb[138].mxu0 }
 0x544   :  { %2643 = vst [vmem:[%s4898_s8 + $0x98] sm:$0xff] %v2516_v7  ;;  %v2292_v11 = vpop.f32.mrb[139].mxu0  ;;  %v2291_v55 = vadd.f32 %v4724_v20, %v2290_v10 }
 0x545   :  { %v2520_v13 = vpop.f32.mrb[216].mxu1 }
 0x546   :  { %v2521_v14 = vadd.f32 %v2520_v13, %v2251_v9  ;;  %v3117_v15 = vpop.f32.mrb[217].mxu1 }
 0x547   :  { %v2295_v17 = vpop.f32.mrb[140].mxu0 }
 0x548   :  { %2644 = vst [vmem:[%s4898_s8 + $0xa0] sm:$0xff] %v2521_v14  ;;  %v2297_v18 = vpop.f32.mrb[141].mxu0  ;;  %v2296_v59 = vadd.f32 %v4724_v20, %v2295_v17 }
 0x549   :  { %v2525_v36 = vpop.f32.mrb[218].mxu1 }
 0x54a   :  { %v2526_v19 = vadd.f32 %v2525_v36, %v2256_v16  ;;  %v3120_v21 = vpop.f32.mrb[219].mxu1 }
 0x54b   :  { %v2300_v22 = vpop.f32.mrb[142].mxu0 }
 0x54c   :  { %2645 = vst [vmem:[%s4898_s8 + $0xa8] sm:$0xff] %v2526_v19  ;;  %v2302_v23 = vpop.f32.mrb[143].mxu0  ;;  %v2301_v63 = vadd.f32 %v4724_v20, %v2300_v22 }
 0x54d   :  { %v2530_v24 = vpop.f32.mrb[220].mxu1 }
 0x54e   :  { %v3123_v25 = vpop.f32.mrb[221].mxu1  ;;  %v2531_v26 = vadd.f32 %v2530_v24, %v2261_v37 }
 0x54f   :  { %v2305_v28 = vpop.f32.mrb[144].mxu0 }
 0x550   :  { %2646 = vst [vmem:[%s4898_s8 + $0xb0] sm:$0xff] %v2531_v26  ;;  %v2307_v29 = vpop.f32.mrb[145].mxu0  ;;  %v2306_v4 = vadd.f32 %v4724_v20, %v2305_v28 }
 0x551   :  { %v2535_v30 = vpop.f32.mrb[222].mxu1 }
 0x552   :  { %v3126_v0 = vpop.f32.mrb[223].mxu1  ;;  %v2536_v42 = vadd.f32 %v2535_v30, %v2266_v27 }
 0x553   :  { %v2310_v52 = vpop.f32.mrb[146].mxu0 }
 0x554   :  { %2647 = vst [vmem:[%s4898_s8 + $0xb8] sm:$0xff] %v2536_v42  ;;  %v2312_v31 = vpop.f32.mrb[147].mxu0  ;;  %v2311_v8 = vadd.f32 %v4724_v20, %v2310_v52 }
 0x555   :  { %v2540_v54 = vpop.f32.mrb[224].mxu1 }
 0x556   :  { %v3129_v12 = vpop.f32.mrb[225].mxu1  ;;  %v2541_v32 = vadd.f32 %v2540_v54, %v2271_v46 }
 0x557   :  { %v2315_v34 = vpop.f32.mrb[148].mxu0 }
 0x558   :  { %2648 = vst [vmem:[%s4898_s8 + $0xc0] sm:$0xff] %v2541_v32  ;;  %v2317_v35 = vpop.f32.mrb[149].mxu0  ;;  %v2316_v13 = vadd.f32 %v4724_v20, %v2315_v34 }
 0x559   :  { %v2545_v38 = vpop.f32.mrb[226].mxu1 }
 0x55a   :  { %v3132_v39 = vpop.f32.mrb[227].mxu1  ;;  %v2546_v40 = vadd.f32 %v2545_v38, %v2276_v33 }
 0x55b   :  { %v2320_v43 = vpop.f32.mrb[150].mxu0 }
 0x55c   :  { %2649 = vst [vmem:[%s4898_s8 + $0xc8] sm:$0xff] %v2546_v40  ;;  %v2322_v44 = vpop.f32.mrb[151].mxu0  ;;  %v2321_v17 = vadd.f32 %v4724_v20, %v2320_v43 }
 0x55d   :  { %v2550_v45 = vpop.f32.mrb[228].mxu1 }
 0x55e   :  { %v3135_v47 = vpop.f32.mrb[229].mxu1  ;;  %v2551_v48 = vadd.f32 %v2550_v45, %v2281_v41 }
 0x560   :  { %2650 = vst [vmem:[%s4898_s8 + $0xd0] sm:$0xff] %v2551_v48 }
 0x561   :  { %v2555_v50 = vpop.f32.mrb[230].mxu1 }
 0x562   :  { %v3138_v51 = vpop.f32.mrb[231].mxu1  ;;  %v2556_v53 = vadd.f32 %v2555_v50, %v2286_v49 }
 0x564   :  { %2651 = vst [vmem:[%s4898_s8 + $0xd8] sm:$0xff] %v2556_v53 }
 0x565   :  { %v2560_v56 = vpop.f32.mrb[232].mxu1 }
 0x566   :  { %v3141_v57 = vpop.f32.mrb[233].mxu1  ;;  %v2561_v58 = vadd.f32 %v2560_v56, %v2291_v55 }
 0x568   :  { %2652 = vst [vmem:[%s4898_s8 + $0xe0] sm:$0xff] %v2561_v58 }
 0x569   :  { %v2565_v60 = vpop.f32.mrb[234].mxu1 }
 0x56a   :  { %v3144_v61 = vpop.f32.mrb[235].mxu1  ;;  %v2566_v62 = vadd.f32 %v2565_v60, %v2296_v59 }
 0x56c   :  { %2653 = vst [vmem:[%s4898_s8 + $0xe8] sm:$0xff] %v2566_v62 }
 0x56d   :  { %v2570_v1 = vpop.f32.mrb[236].mxu1 }
 0x56e   :  { %v3147_v2 = vpop.f32.mrb[237].mxu1  ;;  %v2571_v3 = vadd.f32 %v2570_v1, %v2301_v63 }
 0x570   :  { %2654 = vst [vmem:[%s4898_s8 + $0xf0] sm:$0xff] %v2571_v3 }
 0x571   :  { %v2575_v5 = vpop.f32.mrb[238].mxu1 }
 0x572   :  { %v3150_v6 = vpop.f32.mrb[239].mxu1  ;;  %v2576_v7 = vadd.f32 %v2575_v5, %v2306_v4 }
 0x574   :  { %2655 = vst [vmem:[%s4898_s8 + $0xf8] sm:$0xff] %v2576_v7 }
 0x575   :  { %v2580_v9 = vpop.f32.mrb[240].mxu1 }
 0x576   :  { %v3153_v10 = vpop.f32.mrb[241].mxu1  ;;  %v2581_v11 = vadd.f32 %v2580_v9, %v2311_v8 }
 0x578   :  { %2656 = vst [vmem:[%s4898_s8 + $0x100] sm:$0xff] %v2581_v11 }
 0x579   :  { %v2585_v14 = vpop.f32.mrb[242].mxu1 }
 0x57a   :  { %v3156_v15 = vpop.f32.mrb[243].mxu1  ;;  %v2586_v16 = vadd.f32 %v2585_v14, %v2316_v13 }
 0x57c   :  { %2657 = vst [vmem:[%s4898_s8 + $0x108] sm:$0xff] %v2586_v16 }
 0x57d   :  { %v2590_v18 = vpop.f32.mrb[244].mxu1 }
 0x57e   :  { %v3159_v36 = vpop.f32.mrb[245].mxu1  ;;  %v2591_v19 = vadd.f32 %v2590_v18, %v2321_v17 }
 0x580   :  { %2658 = vst [vmem:[%s4898_s8 + $0x110] sm:$0xff] %v2591_v19 }
 0x581   :  { %v2595_v21 = vpop.f32.mrb[164].mxu1 }
 0x582   :  { %v3464_v37 = vadd.f32 %v4724_v20, %v2595_v21  ;;  %v3162_v22 = vpop.f32.mrb[165].mxu1 }
 0x584   :  { %2659 = vst [vmem:[%s4898_s8 + $0x118] sm:$0xff] %v3464_v37 }
 0x585   :  { %v2600_v23 = vpop.f32.mrb[166].mxu1 }
 0x586   :  { %v3465_v24 = vadd.f32 %v4724_v20, %v2600_v23  ;;  %v3165_v25 = vpop.f32.mrb[167].mxu1 }
 0x588   :  { %2660 = vst [vmem:[%s4898_s8 + $0x120] sm:$0xff] %v3465_v24 }
 0x589   :  { %v2605_v26 = vpop.f32.mrb[168].mxu1 }
 0x58a   :  { %v3466_v27 = vadd.f32 %v4724_v20, %v2605_v26  ;;  %v3168_v28 = vpop.f32.mrb[169].mxu1 }
 0x58c   :  { %2661 = vst [vmem:[%s4898_s8 + $0x128] sm:$0xff] %v3466_v27 }
 0x58d   :  { %v2610_v29 = vpop.f32.mrb[170].mxu1 }
 0x58e   :  { %v3467_v30 = vadd.f32 %v4724_v20, %v2610_v29  ;;  %v3171_v0 = vpop.f32.mrb[171].mxu1 }
 0x590   :  { %2662 = vst [vmem:[%s4898_s8 + $0x130] sm:$0xff] %v3467_v30 }
 0x591   :  { %v2615_v42 = vpop.f32.mrb[172].mxu1 }
 0x592   :  { %v3468_v46 = vadd.f32 %v4724_v20, %v2615_v42  ;;  %v3174_v52 = vpop.f32.mrb[173].mxu1 }
 0x594   :  { %2663 = vst [vmem:[%s4898_s8 + $0x138] sm:$0xff] %v3468_v46 }
 0x595   :  { %v2620_v31 = vpop.f32.mrb[174].mxu1 }
 0x596   :  { %v3469_v54 = vadd.f32 %v4724_v20, %v2620_v31  ;;  %v3177_v12 = vpop.f32.mrb[175].mxu1 }
 0x598   :  { %2664 = vst [vmem:[%s4898_s8 + $0x140] sm:$0xf] %v3469_v54 }
 0x599   :  { %2669 = vsyncpa [#allocation3], 1 }

</bundles_post_ra>
